<compile_context>
chip_gen: v6e
topology: v6e:2x2x1
jax: 0.10.0
libtpu: 0.0.40
codegen_flags: <defaults>
</compile_context>

<pallas_src>
import math
import functools

import jax
import jax.numpy as jnp
from jax import lax
from jax.experimental import pallas as pl
from jax.experimental.pallas import tpu as pltpu

NEG_BIG = float(-2 ** 32 + 1)   # padding masked_fill value used by the PyTorch module
LN_EPS = 1e-5                   # nn.LayerNorm default eps


def _layernorm(x, g, b):
    mu = jnp.mean(x, axis=-1, keepdims=True)
    var = jnp.mean((x - mu) ** 2, axis=-1, keepdims=True)
    return (x - mu) * lax.rsqrt(var + LN_EPS) * g + b


def _gelu_tanh(x):
    # BERT GELU (tanh approximation); dtype-preserving (weak python-scalar constants).
    c = math.sqrt(2.0 / math.pi)
    return 0.5 * x * (1.0 + jnp.tanh(c * (x + 0.044715 * x * x * x)))


def encoder_block_kernel(x_ref, am_ref, pm_ref,
                         wq_ref, bq_ref, wk_ref, bk_ref, wv_ref, bv_ref,
                         wo_ref, bo_ref,
                         ln1g_ref, ln1b_ref, ln2g_ref, ln2b_ref,
                         w1_ref, b1_ref, w2_ref, b2_ref,
                         out_ref,
                         k_scr, v_scr, attn_scr,
                         *, n_heads, tq, ffn_bf16):
    S = x_ref.shape[1]
    D = x_ref.shape[2]
    hd = D // n_heads
    scale = 1.0 / math.sqrt(hd)
    qt = pl.program_id(1)

    # ---- K/V for the whole row: computed once per batch element (qt == 0),
    #      cached in VMEM scratch as bf16 and reused across query tiles. ----
    @pl.when(qt == 0)
    def _():
        xf = x_ref[0]                                                # (S, D) f32
        hf = _layernorm(xf, ln1g_ref[...], ln1b_ref[...]).astype(jnp.bfloat16)
        k = jnp.dot(hf, wk_ref[...], preferred_element_type=jnp.float32) + bk_ref[...]
        v = jnp.dot(hf, wv_ref[...], preferred_element_type=jnp.float32) + bv_ref[...]
        k_scr[...] = k.astype(jnp.bfloat16)
        v_scr[...] = v.astype(jnp.bfloat16)

    # ---- query tile ----
    q0 = pl.multiple_of(qt * tq, tq)
    x_t = x_ref[0, pl.ds(q0, tq), :]                                 # (TQ, D) f32

    # input sublayer: x + MHA(LayerNorm(x))
    h_t = _layernorm(x_t, ln1g_ref[...], ln1b_ref[...]).astype(jnp.bfloat16)
    q = jnp.dot(h_t, wq_ref[...], preferred_element_type=jnp.float32) + bq_ref[...]
    q = (q * scale).astype(jnp.bfloat16)                             # fold 1/sqrt(hd) once

    k_all = k_scr[...]                                               # (S, D) bf16
    v_all = v_scr[...]                                               # (S, D) bf16

    # Additive-only mask (computed once per tile, hoisted out of the head loop):
    #   masked key : energy += NEG_BIG  (exp underflows to exactly 0 after row-max sub)
    #   valid  key : energy += attn_mask
    pad = jnp.broadcast_to(pm_ref[0], (tq, S)) > 0.5                 # (TQ, S) bool
    bias = jnp.where(pad, NEG_BIG, am_ref[...].astype(jnp.float32))  # (TQ, S) f32

    # Per-head attention; each head's context goes straight into the bf16 scratch,
    # so the only cross-iteration state is a VMEM store (bounded live ranges) and the
    # output projection becomes one full-depth matmul below.
    for hidx in range(n_heads):                                      # static, small H
        sl = slice(hidx * hd, (hidx + 1) * hd)
        # QK^T without materializing a transpose: contract last dims of q and k.
        e = lax.dot_general(q[:, sl], k_all[:, sl],
                            (((1,), (1,)), ((), ())),
                            preferred_element_type=jnp.float32)      # (TQ, S)
        e = e + bias
        e = e - jnp.max(e, axis=-1, keepdims=True)                   # stable softmax
        p = jnp.exp(e)
        p = p * pl.reciprocal(jnp.sum(p, axis=-1, keepdims=True), approx=True)
        head_o = jnp.dot(p.astype(jnp.bfloat16), v_all[:, sl],
                         preferred_element_type=jnp.float32)         # (TQ, hd)
        attn_scr[:, sl] = head_o.astype(jnp.bfloat16)                # "concat" via store

    # Fused output projection: one D-deep MXU matmul for all heads.
    o = jnp.dot(attn_scr[...], wo_ref[...], preferred_element_type=jnp.float32)
    x_t = x_t + o + bo_ref[...]                                      # residual (dropout == id)

    # output sublayer: x + FFN(LayerNorm(x))
    h2 = _layernorm(x_t, ln2g_ref[...], ln2b_ref[...]).astype(jnp.bfloat16)
    f = jnp.dot(h2, w1_ref[...], preferred_element_type=jnp.float32) + b1_ref[...]
    if ffn_bf16:
        f = _gelu_tanh(f.astype(jnp.bfloat16))                       # bf16 VPU/EUP (v6e/v7x)
    else:
        f = _gelu_tanh(f).astype(jnp.bfloat16)                       # f32 epilogue (v5e)
    f = jnp.dot(f, w2_ref[...], preferred_element_type=jnp.float32) + b2_ref[...]
    out_ref[0] = x_t + f                                             # residual (dropout == id)


def _pick_tq(s):
    for t in (256, 128, 64, 32, 16, 8):
        if s % t == 0:
            return t
    return s


def _default_ffn_bf16():
    # v6e/v7x have bf16 VPU/EUP; v5e does not (bf16 GELU would only add conversions).
    try:
        kind = jax.devices()[0].device_kind.lower()
    except Exception:
        return True
    return "v5" not in kind


def bert_encoder_block(x, attn_mask, padding_mask, params, *, n_heads,
                       single_buffer_weights=True, ffn_bf16=None):
    """x: (B,S,D) f32, attn_mask: (S,S) additive f32, padding_mask: (B,S) {0,1}.

    params: matmul weights (wq/wk/wv/wo/w1/w2) in bf16 stored as (in_dim, out_dim);
            biases and LayerNorm params in f32 with shape (1, dim).
    """
    B, S, D = x.shape
    tq = _pick_tq(S)
    nq = S // tq
    if ffn_bf16 is None:
        ffn_bf16 = _default_ffn_bf16()

    pm3 = padding_mask.reshape(B, 1, S).astype(jnp.float32)
    # Stream the additive mask in bf16 (it is only ever 0 / large-negative); keep f32
    # if the block shape would violate bf16 sublane tiling.
    am_dtype = jnp.bfloat16 if (tq % 16 == 0 or tq == S) else jnp.float32
    am = attn_mask.astype(am_dtype)

    weight_order = ["wq", "bq", "wk", "bk", "wv", "bv", "wo", "bo",
                    "ln1g", "ln1b", "ln2g", "ln2b", "w1", "b1", "w2", "b2"]
    weights = [params[k] for k in weight_order]
    d_ff = params["w1"].shape[1]

    # Advisory cost estimate so XLA schedules neighboring ops (e.g. next-layer weight
    # prefetch) around this custom call.
    flops = int(2 * B * S * (4 * D * D + 2 * S * D + 2 * D * d_ff))
    transcendentals = int(B * S * (n_heads * S + d_ff))
    bytes_accessed = int(2 * B * S * D * 4
                         + sum(int(w.size) * w.dtype.itemsize for w in weights)
                         + S * S * am.dtype.itemsize + B * S * 4)

    def build(single_buffer):
        def const_spec(shape):
            nd = len(shape)
            idx = lambda b, q, _n=nd: (0,) * _n
            if single_buffer:
                try:
                    # Weights never change block index -> single buffer (halves their
                    # VMEM footprint; matters on v7x's 64 MiB VMEM).
                    return pl.BlockSpec(shape, idx, pipeline_mode=pl.Buffered(1))
                except Exception:
                    return pl.BlockSpec(shape, idx)
            return pl.BlockSpec(shape, idx)

        in_specs = (
            [pl.BlockSpec((1, S, D), lambda b, q: (b, 0, 0)),    # x row, resident across q-tiles
             pl.BlockSpec((tq, S), lambda b, q: (q, 0)),         # attn_mask rows (bf16)
             pl.BlockSpec((1, 1, S), lambda b, q: (b, 0, 0))]    # padding mask per batch row
            + [const_spec(w.shape) for w in weights])            # parameters, untiled

        return pl.pallas_call(
            functools.partial(encoder_block_kernel, n_heads=n_heads, tq=tq,
                              ffn_bf16=ffn_bf16),
            out_shape=jax.ShapeDtypeStruct((B, S, D), jnp.float32),
            grid=(B, nq),
            in_specs=in_specs,
            out_specs=pl.BlockSpec((1, tq, D), lambda b, q: (b, q, 0)),
            scratch_shapes=[pltpu.VMEM((S, D), jnp.bfloat16),    # K cache (per batch row)
                            pltpu.VMEM((S, D), jnp.bfloat16),    # V cache (per batch row)
                            pltpu.VMEM((tq, D), jnp.bfloat16)],  # per-tile head "concat"
            compiler_params=pltpu.CompilerParams(
                dimension_semantics=("parallel", "arbitrary"),
                vmem_limit_bytes=48 * 1024 * 1024),
            cost_estimate=pl.CostEstimate(flops=flops,
                                          transcendentals=transcendentals,
                                          bytes_accessed=bytes_accessed),
        )

    args = (x, am, pm3, *weights)
    if single_buffer_weights:
        try:
            return jax.block_until_ready(build(True)(*args))
        except Exception:
            pass  # runtime rejected Buffered(1); fall back to default double-buffering
    return build(False)(*args)


# ------------------------- pure-JAX reference (for verification) -------------------------
def reference_block(x, attn_mask, padding_mask, p, *, n_heads):
    B, S, D = x.shape
    hd = D // n_heads

    def mha(h):
        q = h @ p["wq"] + p["bq"][0]
        k = h @ p["wk"] + p["bk"][0]
        v = h @ p["wv"] + p["bv"][0]
        q = q.reshape(B, S, n_heads, hd).transpose(0, 2, 1, 3)
        k = k.reshape(B, S, n_heads, hd).transpose(0, 2, 1, 3)
        v = v.reshape(B, S, n_heads, hd).transpose(0, 2, 1, 3)
        e = jnp.einsum("bhqd,bhkd->bhqk", q, k) / math.sqrt(hd)
        e = e + attn_mask[None, None]
        e = jnp.where(padding_mask[:, None, None, :] > 0.5, NEG_BIG, e)
        a = jax.nn.softmax(e, axis=-1)
        o = jnp.einsum("bhqk,bhkd->bhqd", a, v)
        o = o.transpose(0, 2, 1, 3).reshape(B, S, D)
        return o @ p["wo"] + p["bo"][0]

    def ln(z, g, b):
        return _layernorm(z, g[0], b[0])

    x = x + mha(ln(x, p["ln1g"], p["ln1b"]))
    h2 = ln(x, p["ln2g"], p["ln2b"])
    f = _gelu_tanh(h2 @ p["w1"] + p["b1"][0]) @ p["w2"] + p["b2"][0]
    return x + f


def make_params(key, d_model, d_ff):
    ks = jax.random.split(key, 12)
    s = 0.05
    p = {
        "wq": jax.random.normal(ks[0], (d_model, d_model), jnp.float32) * s,
        "bq": jax.random.normal(ks[1], (1, d_model), jnp.float32) * s,
        "wk": jax.random.normal(ks[2], (d_model, d_model), jnp.float32) * s,
        "bk": jax.random.normal(ks[3], (1, d_model), jnp.float32) * s,
        "wv": jax.random.normal(ks[4], (d_model, d_model), jnp.float32) * s,
        "bv": jax.random.normal(ks[5], (1, d_model), jnp.float32) * s,
        "wo": jax.random.normal(ks[6], (d_model, d_model), jnp.float32) * s,
        "bo": jax.random.normal(ks[7], (1, d_model), jnp.float32) * s,
        "ln1g": jnp.ones((1, d_model), jnp.float32),
        "ln1b": jnp.zeros((1, d_model), jnp.float32),
        "ln2g": jnp.ones((1, d_model), jnp.float32),
        "ln2b": jnp.zeros((1, d_model), jnp.float32),
        "w1": jax.random.normal(ks[8], (d_model, d_ff), jnp.float32) * s,
        "b1": jax.random.normal(ks[9], (1, d_ff), jnp.float32) * s,
        "w2": jax.random.normal(ks[10], (d_ff, d_model), jnp.float32) * s,
        "b2": jax.random.normal(ks[11], (1, d_model), jnp.float32) * s,
    }
    return p


if __name__ == "__main__":
    B, S, D, H = 2, 8, 32, 4
    D_FF = D  # PointWiseFeedForwardByLinear: d_ff defaults to d_model

    key = jax.random.PRNGKey(0)
    k_x, k_p = jax.random.split(key)
    x = jax.random.normal(k_x, (B, S, D), jnp.float32)

    # additive attention mask (added to energy, as in the PyTorch code): causal-style
    causal = jnp.triu(jnp.ones((S, S), jnp.float32), k=1)
    attn_mask = causal * (-1e9)
    # padding mask: 1 == masked. Mask the last 2 positions of batch element 1.
    padding_mask = jnp.zeros((B, S), jnp.float32).at[1, -2:].set(1.0)

    params_f32 = make_params(k_p, D, D_FF)
    MAT = {"wq", "wk", "wv", "wo", "w1", "w2"}
    # kernel gets bf16 matmul weights; reference uses the same (bf16-rounded) values in f32
    params_kernel = {k: (v.astype(jnp.bfloat16) if k in MAT else v)
                     for k, v in params_f32.items()}
    params_ref = {k: v.astype(jnp.float32) for k, v in params_kernel.items()}

    out = bert_encoder_block(x, attn_mask, padding_mask, params_kernel, n_heads=H)
    out = jax.block_until_ready(out)

    ref = reference_block(x, attn_mask, padding_mask, params_ref, n_heads=H)
    assert out.shape == (B, S, D)
    err = jnp.max(jnp.abs(out - ref))
    assert jnp.allclose(out, ref, atol=2e-2, rtol=2e-2), (
        f"kernel does not match reference, max abs err = {err}")

    print("KERNEL_OK")
</pallas_src>

<mosaic_0001>
module attributes {stable_mosaic.version = 11 : i64} {
  func.func @encoder_block_kernel(%arg0: i32, %arg1: i32, %arg2: memref<1x8x32xf32, #tpu.memory_space<vmem>>, %arg3: memref<8x8xbf16, #tpu.memory_space<vmem>>, %arg4: memref<1x1x8xf32, #tpu.memory_space<vmem>>, %arg5: memref<32x32xbf16, #tpu.memory_space<vmem>>, %arg6: memref<1x32xf32, #tpu.memory_space<vmem>>, %arg7: memref<32x32xbf16, #tpu.memory_space<vmem>>, %arg8: memref<1x32xf32, #tpu.memory_space<vmem>>, %arg9: memref<32x32xbf16, #tpu.memory_space<vmem>>, %arg10: memref<1x32xf32, #tpu.memory_space<vmem>>, %arg11: memref<32x32xbf16, #tpu.memory_space<vmem>>, %arg12: memref<1x32xf32, #tpu.memory_space<vmem>>, %arg13: memref<1x32xf32, #tpu.memory_space<vmem>>, %arg14: memref<1x32xf32, #tpu.memory_space<vmem>>, %arg15: memref<1x32xf32, #tpu.memory_space<vmem>>, %arg16: memref<1x32xf32, #tpu.memory_space<vmem>>, %arg17: memref<32x32xbf16, #tpu.memory_space<vmem>>, %arg18: memref<1x32xf32, #tpu.memory_space<vmem>>, %arg19: memref<32x32xbf16, #tpu.memory_space<vmem>>, %arg20: memref<1x32xf32, #tpu.memory_space<vmem>>, %arg21: memref<1x8x32xf32, #tpu.memory_space<vmem>>, %arg22: memref<8x32xbf16, #tpu.memory_space<vmem>>, %arg23: memref<8x32xbf16, #tpu.memory_space<vmem>>, %arg24: memref<8x32xbf16, #tpu.memory_space<vmem>>) attributes {dimension_semantics = [#tpu.dimension_semantics<parallel>, #tpu.dimension_semantics<arbitrary>], iteration_bounds = array<i64: 2, 1>, scalar_prefetch = 0 : i64, scratch_operands = 3 : i64, tpu.core_type = #tpu.core_type<tc>, window_params = [{transform_indices = @transform_0, window_bounds = array<i64: 1, 8, 32>}, {transform_indices = @transform_1, window_bounds = array<i64: 8, 8>}, {transform_indices = @transform_2, window_bounds = array<i64: 1, 1, 8>}, {pipeline_mode = #tpu.pipeline_mode<synchronous>, transform_indices = @transform_3, window_bounds = array<i64: 32, 32>}, {pipeline_mode = #tpu.pipeline_mode<synchronous>, transform_indices = @transform_4, window_bounds = array<i64: 1, 32>}, {pipeline_mode = #tpu.pipeline_mode<synchronous>, transform_indices = @transform_5, window_bounds = array<i64: 32, 32>}, {pipeline_mode = #tpu.pipeline_mode<synchronous>, transform_indices = @transform_6, window_bounds = array<i64: 1, 32>}, {pipeline_mode = #tpu.pipeline_mode<synchronous>, transform_indices = @transform_7, window_bounds = array<i64: 32, 32>}, {pipeline_mode = #tpu.pipeline_mode<synchronous>, transform_indices = @transform_8, window_bounds = array<i64: 1, 32>}, {pipeline_mode = #tpu.pipeline_mode<synchronous>, transform_indices = @transform_9, window_bounds = array<i64: 32, 32>}, {pipeline_mode = #tpu.pipeline_mode<synchronous>, transform_indices = @transform_10, window_bounds = array<i64: 1, 32>}, {pipeline_mode = #tpu.pipeline_mode<synchronous>, transform_indices = @transform_11, window_bounds = array<i64: 1, 32>}, {pipeline_mode = #tpu.pipeline_mode<synchronous>, transform_indices = @transform_12, window_bounds = array<i64: 1, 32>}, {pipeline_mode = #tpu.pipeline_mode<synchronous>, transform_indices = @transform_13, window_bounds = array<i64: 1, 32>}, {pipeline_mode = #tpu.pipeline_mode<synchronous>, transform_indices = @transform_14, window_bounds = array<i64: 1, 32>}, {pipeline_mode = #tpu.pipeline_mode<synchronous>, transform_indices = @transform_15, window_bounds = array<i64: 32, 32>}, {pipeline_mode = #tpu.pipeline_mode<synchronous>, transform_indices = @transform_16, window_bounds = array<i64: 1, 32>}, {pipeline_mode = #tpu.pipeline_mode<synchronous>, transform_indices = @transform_17, window_bounds = array<i64: 32, 32>}, {pipeline_mode = #tpu.pipeline_mode<synchronous>, transform_indices = @transform_18, window_bounds = array<i64: 1, 32>}, {transform_indices = @transform_19, window_bounds = array<i64: 1, 8, 32>}]} {
    %c0_i32 = arith.constant 0 : i32
    %0 = arith.cmpi eq, %arg1, %c0_i32 : i32
    %1 = arith.extui %0 : i1 to i32
    %c0_i32_0 = arith.constant 0 : i32
    %2 = arith.cmpi ne, %1, %c0_i32_0 : i32
    scf.if %2 {
      %c0_81 = arith.constant 0 : index
      %c0_82 = arith.constant 0 : index
      %c0_83 = arith.constant 0 : index
      %189 = vector.load %arg2[%c0_81, %c0_82, %c0_83] : memref<1x8x32xf32, #tpu.memory_space<vmem>>, vector<1x8x32xf32>
      %190 = vector.shape_cast %189 : vector<1x8x32xf32> to vector<8x32xf32>
      %c0_84 = arith.constant 0 : index
      %c0_85 = arith.constant 0 : index
      %191 = vector.load %arg13[%c0_84, %c0_85] : memref<1x32xf32, #tpu.memory_space<vmem>>, vector<1x32xf32>
      %c0_86 = arith.constant 0 : index
      %c0_87 = arith.constant 0 : index
      %192 = vector.load %arg14[%c0_86, %c0_87] : memref<1x32xf32, #tpu.memory_space<vmem>>, vector<1x32xf32>
      %cst_88 = arith.constant dense<0.000000e+00> : vector<8xf32>
      %193 = vector.multi_reduction <add>, %190, %cst_88 [1] : vector<8x32xf32> to vector<8xf32>
      %194 = vector.shape_cast %193 : vector<8xf32> to vector<8x1xf32>
      %cst_89 = arith.constant 3.200000e+01 : f32
      %195 = vector.broadcast %cst_89 : f32 to vector<8x1xf32>
      %196 = arith.divf %194, %195 : vector<8x1xf32>
      %197 = vector.broadcast %196 : vector<8x1xf32> to vector<8x32xf32>
      %198 = arith.subf %190, %197 : vector<8x32xf32>
      %199 = arith.mulf %198, %198 : vector<8x32xf32>
      %cst_90 = arith.constant dense<0.000000e+00> : vector<8xf32>
      %200 = vector.multi_reduction <add>, %199, %cst_90 [1] : vector<8x32xf32> to vector<8xf32>
      %201 = vector.shape_cast %200 : vector<8xf32> to vector<8x1xf32>
      %cst_91 = arith.constant 3.200000e+01 : f32
      %202 = vector.broadcast %cst_91 : f32 to vector<8x1xf32>
      %203 = arith.divf %201, %202 : vector<8x1xf32>
      %204 = vector.broadcast %196 : vector<8x1xf32> to vector<8x32xf32>
      %205 = arith.subf %190, %204 : vector<8x32xf32>
      %cst_92 = arith.constant 9.99999974E-6 : f32
      %206 = vector.broadcast %cst_92 : f32 to vector<8x1xf32>
      %207 = arith.addf %203, %206 : vector<8x1xf32>
      %208 = math.rsqrt %207 : vector<8x1xf32>
      %209 = vector.broadcast %208 : vector<8x1xf32> to vector<8x32xf32>
      %210 = arith.mulf %205, %209 : vector<8x32xf32>
      %211 = vector.broadcast %191 : vector<1x32xf32> to vector<8x32xf32>
      %212 = arith.mulf %210, %211 : vector<8x32xf32>
      %213 = vector.broadcast %192 : vector<1x32xf32> to vector<8x32xf32>
      %214 = arith.addf %212, %213 : vector<8x32xf32>
      %215 = arith.truncf %214 : vector<8x32xf32> to vector<8x32xbf16>
      %c0_93 = arith.constant 0 : index
      %c0_94 = arith.constant 0 : index
      %216 = vector.load %arg7[%c0_93, %c0_94] : memref<32x32xbf16, #tpu.memory_space<vmem>>, vector<32x32xbf16>
      %cst_95 = arith.constant dense<0.000000e+00> : vector<8x32xf32>
      %217 = tpu.matmul %215, %216, %cst_95 {dimension_numbers = #tpu.dot_dimension_numbers<[1], [0], [0], [1], [0, 0, 1, 1], [], []>} : vector<8x32xbf16>, vector<32x32xbf16>, vector<8x32xf32> -> vector<8x32xf32>
      %c0_96 = arith.constant 0 : index
      %c0_97 = arith.constant 0 : index
      %218 = vector.load %arg8[%c0_96, %c0_97] : memref<1x32xf32, #tpu.memory_space<vmem>>, vector<1x32xf32>
      %219 = vector.broadcast %218 : vector<1x32xf32> to vector<8x32xf32>
      %220 = arith.addf %217, %219 : vector<8x32xf32>
      %c0_98 = arith.constant 0 : index
      %c0_99 = arith.constant 0 : index
      %221 = vector.load %arg9[%c0_98, %c0_99] : memref<32x32xbf16, #tpu.memory_space<vmem>>, vector<32x32xbf16>
      %cst_100 = arith.constant dense<0.000000e+00> : vector<8x32xf32>
      %222 = tpu.matmul %215, %221, %cst_100 {dimension_numbers = #tpu.dot_dimension_numbers<[1], [0], [0], [1], [0, 0, 1, 1], [], []>} : vector<8x32xbf16>, vector<32x32xbf16>, vector<8x32xf32> -> vector<8x32xf32>
      %c0_101 = arith.constant 0 : index
      %c0_102 = arith.constant 0 : index
      %223 = vector.load %arg10[%c0_101, %c0_102] : memref<1x32xf32, #tpu.memory_space<vmem>>, vector<1x32xf32>
      %224 = vector.broadcast %223 : vector<1x32xf32> to vector<8x32xf32>
      %225 = arith.addf %222, %224 : vector<8x32xf32>
      %226 = arith.truncf %220 : vector<8x32xf32> to vector<8x32xbf16>
      %c0_103 = arith.constant 0 : index
      %c0_104 = arith.constant 0 : index
      %227 = vector.load %arg22[%c0_103, %c0_104] : memref<8x32xbf16, #tpu.memory_space<vmem>>, vector<8x32xbf16>
      tpu.vector_store %arg22[%c0_103, %c0_104], %226 {strides = array<i32>} : memref<8x32xbf16, #tpu.memory_space<vmem>>, vector<8x32xbf16>,
      %228 = arith.truncf %225 : vector<8x32xf32> to vector<8x32xbf16>
      %c0_105 = arith.constant 0 : index
      %c0_106 = arith.constant 0 : index
      %229 = vector.load %arg23[%c0_105, %c0_106] : memref<8x32xbf16, #tpu.memory_space<vmem>>, vector<8x32xbf16>
      tpu.vector_store %arg23[%c0_105, %c0_106], %228 {strides = array<i32>} : memref<8x32xbf16, #tpu.memory_space<vmem>>, vector<8x32xbf16>,
    } else {
    }
    %c8_i32 = arith.constant 8 : i32
    %3 = arith.muli %arg1, %c8_i32 : i32
    %4 = tpu.assume_multiple %3, 8 : i32
    %c0 = arith.constant 0 : index
    %5 = arith.index_cast %4 : i32 to index
    %c0_1 = arith.constant 0 : index
    %6 = vector.load %arg2[%c0, %5, %c0_1] : memref<1x8x32xf32, #tpu.memory_space<vmem>>, vector<1x8x32xf32>
    %7 = vector.shape_cast %6 : vector<1x8x32xf32> to vector<8x32xf32>
    %c0_2 = arith.constant 0 : index
    %c0_3 = arith.constant 0 : index
    %8 = vector.load %arg13[%c0_2, %c0_3] : memref<1x32xf32, #tpu.memory_space<vmem>>, vector<1x32xf32>
    %c0_4 = arith.constant 0 : index
    %c0_5 = arith.constant 0 : index
    %9 = vector.load %arg14[%c0_4, %c0_5] : memref<1x32xf32, #tpu.memory_space<vmem>>, vector<1x32xf32>
    %cst = arith.constant dense<0.000000e+00> : vector<8xf32>
    %10 = vector.multi_reduction <add>, %7, %cst [1] : vector<8x32xf32> to vector<8xf32>
    %11 = vector.shape_cast %10 : vector<8xf32> to vector<8x1xf32>
    %cst_6 = arith.constant 3.200000e+01 : f32
    %12 = vector.broadcast %cst_6 : f32 to vector<8x1xf32>
    %13 = arith.divf %11, %12 : vector<8x1xf32>
    %14 = vector.broadcast %13 : vector<8x1xf32> to vector<8x32xf32>
    %15 = arith.subf %7, %14 : vector<8x32xf32>
    %16 = arith.mulf %15, %15 : vector<8x32xf32>
    %cst_7 = arith.constant dense<0.000000e+00> : vector<8xf32>
    %17 = vector.multi_reduction <add>, %16, %cst_7 [1] : vector<8x32xf32> to vector<8xf32>
    %18 = vector.shape_cast %17 : vector<8xf32> to vector<8x1xf32>
    %cst_8 = arith.constant 3.200000e+01 : f32
    %19 = vector.broadcast %cst_8 : f32 to vector<8x1xf32>
    %20 = arith.divf %18, %19 : vector<8x1xf32>
    %21 = vector.broadcast %13 : vector<8x1xf32> to vector<8x32xf32>
    %22 = arith.subf %7, %21 : vector<8x32xf32>
    %cst_9 = arith.constant 9.99999974E-6 : f32
    %23 = vector.broadcast %cst_9 : f32 to vector<8x1xf32>
    %24 = arith.addf %20, %23 : vector<8x1xf32>
    %25 = math.rsqrt %24 : vector<8x1xf32>
    %26 = vector.broadcast %25 : vector<8x1xf32> to vector<8x32xf32>
    %27 = arith.mulf %22, %26 : vector<8x32xf32>
    %28 = vector.broadcast %8 : vector<1x32xf32> to vector<8x32xf32>
    %29 = arith.mulf %27, %28 : vector<8x32xf32>
    %30 = vector.broadcast %9 : vector<1x32xf32> to vector<8x32xf32>
    %31 = arith.addf %29, %30 : vector<8x32xf32>
    %32 = arith.truncf %31 : vector<8x32xf32> to vector<8x32xbf16>
    %c0_10 = arith.constant 0 : index
    %c0_11 = arith.constant 0 : index
    %33 = vector.load %arg5[%c0_10, %c0_11] : memref<32x32xbf16, #tpu.memory_space<vmem>>, vector<32x32xbf16>
    %cst_12 = arith.constant dense<0.000000e+00> : vector<8x32xf32>
    %34 = tpu.matmul %32, %33, %cst_12 {dimension_numbers = #tpu.dot_dimension_numbers<[1], [0], [0], [1], [0, 0, 1, 1], [], []>} : vector<8x32xbf16>, vector<32x32xbf16>, vector<8x32xf32> -> vector<8x32xf32>
    %c0_13 = arith.constant 0 : index
    %c0_14 = arith.constant 0 : index
    %35 = vector.load %arg6[%c0_13, %c0_14] : memref<1x32xf32, #tpu.memory_space<vmem>>, vector<1x32xf32>
    %36 = vector.broadcast %35 : vector<1x32xf32> to vector<8x32xf32>
    %37 = arith.addf %34, %36 : vector<8x32xf32>
    %cst_15 = arith.constant 0.353553385 : f32
    %38 = vector.broadcast %cst_15 : f32 to vector<8x32xf32>
    %39 = arith.mulf %37, %38 : vector<8x32xf32>
    %40 = arith.truncf %39 : vector<8x32xf32> to vector<8x32xbf16>
    %c0_16 = arith.constant 0 : index
    %c0_17 = arith.constant 0 : index
    %41 = vector.load %arg22[%c0_16, %c0_17] : memref<8x32xbf16, #tpu.memory_space<vmem>>, vector<8x32xbf16>
    %c0_18 = arith.constant 0 : index
    %c0_19 = arith.constant 0 : index
    %42 = vector.load %arg23[%c0_18, %c0_19] : memref<8x32xbf16, #tpu.memory_space<vmem>>, vector<8x32xbf16>
    %c0_20 = arith.constant 0 : index
    %c0_21 = arith.constant 0 : index
    %c0_22 = arith.constant 0 : index
    %43 = vector.load %arg4[%c0_20, %c0_21, %c0_22] : memref<1x1x8xf32, #tpu.memory_space<vmem>>, vector<1x1x8xf32>
    %44 = vector.shape_cast %43 : vector<1x1x8xf32> to vector<1x8xf32>
    %45 = vector.shape_cast %44 : vector<1x8xf32> to vector<1x8xf32>
    %46 = vector.broadcast %45 : vector<1x8xf32> to vector<8x8xf32>
    %cst_23 = arith.constant 5.000000e-01 : f32
    %47 = vector.broadcast %cst_23 : f32 to vector<8x8xf32>
    %48 = arith.cmpf ogt, %46, %47 : vector<8x8xf32>
    %c0_24 = arith.constant 0 : index
    %c0_25 = arith.constant 0 : index
    %49 = vector.load %arg3[%c0_24, %c0_25] : memref<8x8xbf16, #tpu.memory_space<vmem>>, vector<8x8xbf16>
    %50 = arith.extf %49 : vector<8x8xbf16> to vector<8x8xf32>
    %cst_26 = arith.constant -4.2949673E+9 : f32
    %51 = vector.broadcast %cst_26 : f32 to vector<8x8xf32>
    %52 = arith.select %48, %51, %50 : vector<8x8xi1>, vector<8x8xf32>
    %53 = vector.extract_strided_slice %40 {offsets = [0, 0], sizes = [8, 8], strides = [1, 1]} : vector<8x32xbf16> to vector<8x8xbf16>
    %54 = vector.extract_strided_slice %41 {offsets = [0, 0], sizes = [8, 8], strides = [1, 1]} : vector<8x32xbf16> to vector<8x8xbf16>
    %cst_27 = arith.constant dense<0.000000e+00> : vector<8x8xf32>
    %55 = tpu.matmul %53, %54, %cst_27 {dimension_numbers = #tpu.dot_dimension_numbers<[1], [1], [0], [0], [0, 0, 1, 0], [], []>} : vector<8x8xbf16>, vector<8x8xbf16>, vector<8x8xf32> -> vector<8x8xf32>
    %56 = arith.addf %55, %52 : vector<8x8xf32>
    %cst_28 = arith.constant dense<0xFF800000> : vector<8xf32>
    %57 = vector.multi_reduction <maximumf>, %56, %cst_28 [1] : vector<8x8xf32> to vector<8xf32>
    %58 = vector.shape_cast %57 : vector<8xf32> to vector<8x1xf32>
    %59 = vector.broadcast %58 : vector<8x1xf32> to vector<8x8xf32>
    %60 = arith.subf %56, %59 : vector<8x8xf32>
    %61 = math.exp %60 : vector<8x8xf32>
    %cst_29 = arith.constant dense<0.000000e+00> : vector<8xf32>
    %62 = vector.multi_reduction <add>, %61, %cst_29 [1] : vector<8x8xf32> to vector<8xf32>
    %63 = vector.shape_cast %62 : vector<8xf32> to vector<8x1xf32>
    %64 = tpu.reciprocal %63 {approx = true} : vector<8x1xf32> -> vector<8x1xf32>
    %65 = vector.broadcast %64 : vector<8x1xf32> to vector<8x8xf32>
    %66 = arith.mulf %61, %65 : vector<8x8xf32>
    %67 = arith.truncf %66 : vector<8x8xf32> to vector<8x8xbf16>
    %68 = vector.extract_strided_slice %42 {offsets = [0, 0], sizes = [8, 8], strides = [1, 1]} : vector<8x32xbf16> to vector<8x8xbf16>
    %cst_30 = arith.constant dense<0.000000e+00> : vector<8x8xf32>
    %69 = tpu.matmul %67, %68, %cst_30 {dimension_numbers = #tpu.dot_dimension_numbers<[1], [0], [0], [1], [0, 0, 1, 1], [], []>} : vector<8x8xbf16>, vector<8x8xbf16>, vector<8x8xf32> -> vector<8x8xf32>
    %70 = arith.truncf %69 : vector<8x8xf32> to vector<8x8xbf16>
    %c0_31 = arith.constant 0 : index
    %c0_32 = arith.constant 0 : index
    %71 = vector.load %arg24[%c0_31, %c0_32] : memref<8x32xbf16, #tpu.memory_space<vmem>>, vector<8x8xbf16>
    tpu.vector_store %arg24[%c0_31, %c0_32], %70 {strides = array<i32>} : memref<8x32xbf16, #tpu.memory_space<vmem>>, vector<8x8xbf16>,
    %72 = vector.extract_strided_slice %40 {offsets = [0, 8], sizes = [8, 8], strides = [1, 1]} : vector<8x32xbf16> to vector<8x8xbf16>
    %73 = vector.extract_strided_slice %41 {offsets = [0, 8], sizes = [8, 8], strides = [1, 1]} : vector<8x32xbf16> to vector<8x8xbf16>
    %cst_33 = arith.constant dense<0.000000e+00> : vector<8x8xf32>
    %74 = tpu.matmul %72, %73, %cst_33 {dimension_numbers = #tpu.dot_dimension_numbers<[1], [1], [0], [0], [0, 0, 1, 0], [], []>} : vector<8x8xbf16>, vector<8x8xbf16>, vector<8x8xf32> -> vector<8x8xf32>
    %75 = arith.addf %74, %52 : vector<8x8xf32>
    %cst_34 = arith.constant dense<0xFF800000> : vector<8xf32>
    %76 = vector.multi_reduction <maximumf>, %75, %cst_34 [1] : vector<8x8xf32> to vector<8xf32>
    %77 = vector.shape_cast %76 : vector<8xf32> to vector<8x1xf32>
    %78 = vector.broadcast %77 : vector<8x1xf32> to vector<8x8xf32>
    %79 = arith.subf %75, %78 : vector<8x8xf32>
    %80 = math.exp %79 : vector<8x8xf32>
    %cst_35 = arith.constant dense<0.000000e+00> : vector<8xf32>
    %81 = vector.multi_reduction <add>, %80, %cst_35 [1] : vector<8x8xf32> to vector<8xf32>
    %82 = vector.shape_cast %81 : vector<8xf32> to vector<8x1xf32>
    %83 = tpu.reciprocal %82 {approx = true} : vector<8x1xf32> -> vector<8x1xf32>
    %84 = vector.broadcast %83 : vector<8x1xf32> to vector<8x8xf32>
    %85 = arith.mulf %80, %84 : vector<8x8xf32>
    %86 = arith.truncf %85 : vector<8x8xf32> to vector<8x8xbf16>
    %87 = vector.extract_strided_slice %42 {offsets = [0, 8], sizes = [8, 8], strides = [1, 1]} : vector<8x32xbf16> to vector<8x8xbf16>
    %cst_36 = arith.constant dense<0.000000e+00> : vector<8x8xf32>
    %88 = tpu.matmul %86, %87, %cst_36 {dimension_numbers = #tpu.dot_dimension_numbers<[1], [0], [0], [1], [0, 0, 1, 1], [], []>} : vector<8x8xbf16>, vector<8x8xbf16>, vector<8x8xf32> -> vector<8x8xf32>
    %89 = arith.truncf %88 : vector<8x8xf32> to vector<8x8xbf16>
    %c0_37 = arith.constant 0 : index
    %c8 = arith.constant 8 : index
    %90 = vector.load %arg24[%c0_37, %c8] : memref<8x32xbf16, #tpu.memory_space<vmem>>, vector<8x8xbf16>
    tpu.vector_store %arg24[%c0_37, %c8], %89 {strides = array<i32>} : memref<8x32xbf16, #tpu.memory_space<vmem>>, vector<8x8xbf16>,
    %91 = vector.extract_strided_slice %40 {offsets = [0, 16], sizes = [8, 8], strides = [1, 1]} : vector<8x32xbf16> to vector<8x8xbf16>
    %92 = vector.extract_strided_slice %41 {offsets = [0, 16], sizes = [8, 8], strides = [1, 1]} : vector<8x32xbf16> to vector<8x8xbf16>
    %cst_38 = arith.constant dense<0.000000e+00> : vector<8x8xf32>
    %93 = tpu.matmul %91, %92, %cst_38 {dimension_numbers = #tpu.dot_dimension_numbers<[1], [1], [0], [0], [0, 0, 1, 0], [], []>} : vector<8x8xbf16>, vector<8x8xbf16>, vector<8x8xf32> -> vector<8x8xf32>
    %94 = arith.addf %93, %52 : vector<8x8xf32>
    %cst_39 = arith.constant dense<0xFF800000> : vector<8xf32>
    %95 = vector.multi_reduction <maximumf>, %94, %cst_39 [1] : vector<8x8xf32> to vector<8xf32>
    %96 = vector.shape_cast %95 : vector<8xf32> to vector<8x1xf32>
    %97 = vector.broadcast %96 : vector<8x1xf32> to vector<8x8xf32>
    %98 = arith.subf %94, %97 : vector<8x8xf32>
    %99 = math.exp %98 : vector<8x8xf32>
    %cst_40 = arith.constant dense<0.000000e+00> : vector<8xf32>
    %100 = vector.multi_reduction <add>, %99, %cst_40 [1] : vector<8x8xf32> to vector<8xf32>
    %101 = vector.shape_cast %100 : vector<8xf32> to vector<8x1xf32>
    %102 = tpu.reciprocal %101 {approx = true} : vector<8x1xf32> -> vector<8x1xf32>
    %103 = vector.broadcast %102 : vector<8x1xf32> to vector<8x8xf32>
    %104 = arith.mulf %99, %103 : vector<8x8xf32>
    %105 = arith.truncf %104 : vector<8x8xf32> to vector<8x8xbf16>
    %106 = vector.extract_strided_slice %42 {offsets = [0, 16], sizes = [8, 8], strides = [1, 1]} : vector<8x32xbf16> to vector<8x8xbf16>
    %cst_41 = arith.constant dense<0.000000e+00> : vector<8x8xf32>
    %107 = tpu.matmul %105, %106, %cst_41 {dimension_numbers = #tpu.dot_dimension_numbers<[1], [0], [0], [1], [0, 0, 1, 1], [], []>} : vector<8x8xbf16>, vector<8x8xbf16>, vector<8x8xf32> -> vector<8x8xf32>
    %108 = arith.truncf %107 : vector<8x8xf32> to vector<8x8xbf16>
    %c0_42 = arith.constant 0 : index
    %c16 = arith.constant 16 : index
    %109 = vector.load %arg24[%c0_42, %c16] : memref<8x32xbf16, #tpu.memory_space<vmem>>, vector<8x8xbf16>
    tpu.vector_store %arg24[%c0_42, %c16], %108 {strides = array<i32>} : memref<8x32xbf16, #tpu.memory_space<vmem>>, vector<8x8xbf16>,
    %110 = vector.extract_strided_slice %40 {offsets = [0, 24], sizes = [8, 8], strides = [1, 1]} : vector<8x32xbf16> to vector<8x8xbf16>
    %111 = vector.extract_strided_slice %41 {offsets = [0, 24], sizes = [8, 8], strides = [1, 1]} : vector<8x32xbf16> to vector<8x8xbf16>
    %cst_43 = arith.constant dense<0.000000e+00> : vector<8x8xf32>
    %112 = tpu.matmul %110, %111, %cst_43 {dimension_numbers = #tpu.dot_dimension_numbers<[1], [1], [0], [0], [0, 0, 1, 0], [], []>} : vector<8x8xbf16>, vector<8x8xbf16>, vector<8x8xf32> -> vector<8x8xf32>
    %113 = arith.addf %112, %52 : vector<8x8xf32>
    %cst_44 = arith.constant dense<0xFF800000> : vector<8xf32>
    %114 = vector.multi_reduction <maximumf>, %113, %cst_44 [1] : vector<8x8xf32> to vector<8xf32>
    %115 = vector.shape_cast %114 : vector<8xf32> to vector<8x1xf32>
    %116 = vector.broadcast %115 : vector<8x1xf32> to vector<8x8xf32>
    %117 = arith.subf %113, %116 : vector<8x8xf32>
    %118 = math.exp %117 : vector<8x8xf32>
    %cst_45 = arith.constant dense<0.000000e+00> : vector<8xf32>
    %119 = vector.multi_reduction <add>, %118, %cst_45 [1] : vector<8x8xf32> to vector<8xf32>
    %120 = vector.shape_cast %119 : vector<8xf32> to vector<8x1xf32>
    %121 = tpu.reciprocal %120 {approx = true} : vector<8x1xf32> -> vector<8x1xf32>
    %122 = vector.broadcast %121 : vector<8x1xf32> to vector<8x8xf32>
    %123 = arith.mulf %118, %122 : vector<8x8xf32>
    %124 = arith.truncf %123 : vector<8x8xf32> to vector<8x8xbf16>
    %125 = vector.extract_strided_slice %42 {offsets = [0, 24], sizes = [8, 8], strides = [1, 1]} : vector<8x32xbf16> to vector<8x8xbf16>
    %cst_46 = arith.constant dense<0.000000e+00> : vector<8x8xf32>
    %126 = tpu.matmul %124, %125, %cst_46 {dimension_numbers = #tpu.dot_dimension_numbers<[1], [0], [0], [1], [0, 0, 1, 1], [], []>} : vector<8x8xbf16>, vector<8x8xbf16>, vector<8x8xf32> -> vector<8x8xf32>
    %127 = arith.truncf %126 : vector<8x8xf32> to vector<8x8xbf16>
    %c0_47 = arith.constant 0 : index
    %c24 = arith.constant 24 : index
    %128 = vector.load %arg24[%c0_47, %c24] : memref<8x32xbf16, #tpu.memory_space<vmem>>, vector<8x8xbf16>
    tpu.vector_store %arg24[%c0_47, %c24], %127 {strides = array<i32>} : memref<8x32xbf16, #tpu.memory_space<vmem>>, vector<8x8xbf16>,
    %c0_48 = arith.constant 0 : index
    %c0_49 = arith.constant 0 : index
    %129 = vector.load %arg24[%c0_48, %c0_49] : memref<8x32xbf16, #tpu.memory_space<vmem>>, vector<8x32xbf16>
    %c0_50 = arith.constant 0 : index
    %c0_51 = arith.constant 0 : index
    %130 = vector.load %arg11[%c0_50, %c0_51] : memref<32x32xbf16, #tpu.memory_space<vmem>>, vector<32x32xbf16>
    %cst_52 = arith.constant dense<0.000000e+00> : vector<8x32xf32>
    %131 = tpu.matmul %129, %130, %cst_52 {dimension_numbers = #tpu.dot_dimension_numbers<[1], [0], [0], [1], [0, 0, 1, 1], [], []>} : vector<8x32xbf16>, vector<32x32xbf16>, vector<8x32xf32> -> vector<8x32xf32>
    %132 = arith.addf %7, %131 : vector<8x32xf32>
    %c0_53 = arith.constant 0 : index
    %c0_54 = arith.constant 0 : index
    %133 = vector.load %arg12[%c0_53, %c0_54] : memref<1x32xf32, #tpu.memory_space<vmem>>, vector<1x32xf32>
    %134 = vector.broadcast %133 : vector<1x32xf32> to vector<8x32xf32>
    %135 = arith.addf %132, %134 : vector<8x32xf32>
    %c0_55 = arith.constant 0 : index
    %c0_56 = arith.constant 0 : index
    %136 = vector.load %arg15[%c0_55, %c0_56] : memref<1x32xf32, #tpu.memory_space<vmem>>, vector<1x32xf32>
    %c0_57 = arith.constant 0 : index
    %c0_58 = arith.constant 0 : index
    %137 = vector.load %arg16[%c0_57, %c0_58] : memref<1x32xf32, #tpu.memory_space<vmem>>, vector<1x32xf32>
    %cst_59 = arith.constant dense<0.000000e+00> : vector<8xf32>
    %138 = vector.multi_reduction <add>, %135, %cst_59 [1] : vector<8x32xf32> to vector<8xf32>
    %139 = vector.shape_cast %138 : vector<8xf32> to vector<8x1xf32>
    %cst_60 = arith.constant 3.200000e+01 : f32
    %140 = vector.broadcast %cst_60 : f32 to vector<8x1xf32>
    %141 = arith.divf %139, %140 : vector<8x1xf32>
    %142 = vector.broadcast %141 : vector<8x1xf32> to vector<8x32xf32>
    %143 = arith.subf %135, %142 : vector<8x32xf32>
    %144 = arith.mulf %143, %143 : vector<8x32xf32>
    %cst_61 = arith.constant dense<0.000000e+00> : vector<8xf32>
    %145 = vector.multi_reduction <add>, %144, %cst_61 [1] : vector<8x32xf32> to vector<8xf32>
    %146 = vector.shape_cast %145 : vector<8xf32> to vector<8x1xf32>
    %cst_62 = arith.constant 3.200000e+01 : f32
    %147 = vector.broadcast %cst_62 : f32 to vector<8x1xf32>
    %148 = arith.divf %146, %147 : vector<8x1xf32>
    %149 = vector.broadcast %141 : vector<8x1xf32> to vector<8x32xf32>
    %150 = arith.subf %135, %149 : vector<8x32xf32>
    %cst_63 = arith.constant 9.99999974E-6 : f32
    %151 = vector.broadcast %cst_63 : f32 to vector<8x1xf32>
    %152 = arith.addf %148, %151 : vector<8x1xf32>
    %153 = math.rsqrt %152 : vector<8x1xf32>
    %154 = vector.broadcast %153 : vector<8x1xf32> to vector<8x32xf32>
    %155 = arith.mulf %150, %154 : vector<8x32xf32>
    %156 = vector.broadcast %136 : vector<1x32xf32> to vector<8x32xf32>
    %157 = arith.mulf %155, %156 : vector<8x32xf32>
    %158 = vector.broadcast %137 : vector<1x32xf32> to vector<8x32xf32>
    %159 = arith.addf %157, %158 : vector<8x32xf32>
    %160 = arith.truncf %159 : vector<8x32xf32> to vector<8x32xbf16>
    %c0_64 = arith.constant 0 : index
    %c0_65 = arith.constant 0 : index
    %161 = vector.load %arg17[%c0_64, %c0_65] : memref<32x32xbf16, #tpu.memory_space<vmem>>, vector<32x32xbf16>
    %cst_66 = arith.constant dense<0.000000e+00> : vector<8x32xf32>
    %162 = tpu.matmul %160, %161, %cst_66 {dimension_numbers = #tpu.dot_dimension_numbers<[1], [0], [0], [1], [0, 0, 1, 1], [], []>} : vector<8x32xbf16>, vector<32x32xbf16>, vector<8x32xf32> -> vector<8x32xf32>
    %c0_67 = arith.constant 0 : index
    %c0_68 = arith.constant 0 : index
    %163 = vector.load %arg18[%c0_67, %c0_68] : memref<1x32xf32, #tpu.memory_space<vmem>>, vector<1x32xf32>
    %164 = vector.broadcast %163 : vector<1x32xf32> to vector<8x32xf32>
    %165 = arith.addf %162, %164 : vector<8x32xf32>
    %166 = arith.truncf %165 : vector<8x32xf32> to vector<8x32xbf16>
    %cst_69 = arith.constant 5.000000e-01 : bf16
    %167 = vector.broadcast %cst_69 : bf16 to vector<8x32xbf16>
    %168 = arith.mulf %167, %166 : vector<8x32xbf16>
    %cst_70 = arith.constant 4.467770e-02 : bf16
    %169 = vector.broadcast %cst_70 : bf16 to vector<8x32xbf16>
    %170 = arith.mulf %169, %166 : vector<8x32xbf16>
    %171 = arith.mulf %170, %166 : vector<8x32xbf16>
    %172 = arith.mulf %171, %166 : vector<8x32xbf16>
    %173 = arith.addf %166, %172 : vector<8x32xbf16>
    %cst_71 = arith.constant 7.968750e-01 : bf16
    %174 = vector.broadcast %cst_71 : bf16 to vector<8x32xbf16>
    %175 = arith.mulf %174, %173 : vector<8x32xbf16>
    %176 = math.tanh %175 : vector<8x32xbf16>
    %cst_72 = arith.constant 1.000000e+00 : bf16
    %177 = vector.broadcast %cst_72 : bf16 to vector<8x32xbf16>
    %178 = arith.addf %177, %176 : vector<8x32xbf16>
    %179 = arith.mulf %168, %178 : vector<8x32xbf16>
    %c0_73 = arith.constant 0 : index
    %c0_74 = arith.constant 0 : index
    %180 = vector.load %arg19[%c0_73, %c0_74] : memref<32x32xbf16, #tpu.memory_space<vmem>>, vector<32x32xbf16>
    %cst_75 = arith.constant dense<0.000000e+00> : vector<8x32xf32>
    %181 = tpu.matmul %179, %180, %cst_75 {dimension_numbers = #tpu.dot_dimension_numbers<[1], [0], [0], [1], [0, 0, 1, 1], [], []>} : vector<8x32xbf16>, vector<32x32xbf16>, vector<8x32xf32> -> vector<8x32xf32>
    %c0_76 = arith.constant 0 : index
    %c0_77 = arith.constant 0 : index
    %182 = vector.load %arg20[%c0_76, %c0_77] : memref<1x32xf32, #tpu.memory_space<vmem>>, vector<1x32xf32>
    %183 = vector.broadcast %182 : vector<1x32xf32> to vector<8x32xf32>
    %184 = arith.addf %181, %183 : vector<8x32xf32>
    %185 = arith.addf %135, %184 : vector<8x32xf32>
    %c0_78 = arith.constant 0 : index
    %c0_79 = arith.constant 0 : index
    %c0_80 = arith.constant 0 : index
    %186 = vector.load %arg21[%c0_78, %c0_79, %c0_80] : memref<1x8x32xf32, #tpu.memory_space<vmem>>, vector<1x8x32xf32>
    %187 = vector.shape_cast %186 : vector<1x8x32xf32> to vector<8x32xf32>
    %188 = vector.shape_cast %185 : vector<8x32xf32> to vector<1x8x32xf32>
    tpu.vector_store %arg21[%c0_78, %c0_79, %c0_80], %188 {strides = array<i32>} : memref<1x8x32xf32, #tpu.memory_space<vmem>>, vector<1x8x32xf32>,
    return
  }
  func.func @transform_0(%arg0: i32, %arg1: i32) -> (i32, i32, i32) {
    %c0_i32 = arith.constant 0 : i32
    %c0_i32_0 = arith.constant 0 : i32
    %c0_i32_1 = arith.constant 0 : i32
    return %arg0, %c0_i32, %c0_i32_0 : i32, i32, i32
  }
  func.func @transform_1(%arg0: i32, %arg1: i32) -> (i32, i32) {
    %c0_i32 = arith.constant 0 : i32
    %c0_i32_0 = arith.constant 0 : i32
    return %arg1, %c0_i32 : i32, i32
  }
  func.func @transform_2(%arg0: i32, %arg1: i32) -> (i32, i32, i32) {
    %c0_i32 = arith.constant 0 : i32
    %c0_i32_0 = arith.constant 0 : i32
    %c0_i32_1 = arith.constant 0 : i32
    return %arg0, %c0_i32, %c0_i32_0 : i32, i32, i32
  }
  func.func @transform_3(%arg0: i32, %arg1: i32) -> (i32, i32) {
    %c0_i32 = arith.constant 0 : i32
    %c0_i32_0 = arith.constant 0 : i32
    %c0_i32_1 = arith.constant 0 : i32
    return %c0_i32, %c0_i32_0 : i32, i32
  }
  func.func @transform_4(%arg0: i32, %arg1: i32) -> (i32, i32) {
    %c0_i32 = arith.constant 0 : i32
    %c0_i32_0 = arith.constant 0 : i32
    %c0_i32_1 = arith.constant 0 : i32
    return %c0_i32, %c0_i32_0 : i32, i32
  }
  func.func @transform_5(%arg0: i32, %arg1: i32) -> (i32, i32) {
    %c0_i32 = arith.constant 0 : i32
    %c0_i32_0 = arith.constant 0 : i32
    %c0_i32_1 = arith.constant 0 : i32
    return %c0_i32, %c0_i32_0 : i32, i32
  }
  func.func @transform_6(%arg0: i32, %arg1: i32) -> (i32, i32) {
    %c0_i32 = arith.constant 0 : i32
    %c0_i32_0 = arith.constant 0 : i32
    %c0_i32_1 = arith.constant 0 : i32
    return %c0_i32, %c0_i32_0 : i32, i32
  }
  func.func @transform_7(%arg0: i32, %arg1: i32) -> (i32, i32) {
    %c0_i32 = arith.constant 0 : i32
    %c0_i32_0 = arith.constant 0 : i32
    %c0_i32_1 = arith.constant 0 : i32
    return %c0_i32, %c0_i32_0 : i32, i32
  }
  func.func @transform_8(%arg0: i32, %arg1: i32) -> (i32, i32) {
    %c0_i32 = arith.constant 0 : i32
    %c0_i32_0 = arith.constant 0 : i32
    %c0_i32_1 = arith.constant 0 : i32
    return %c0_i32, %c0_i32_0 : i32, i32
  }
  func.func @transform_9(%arg0: i32, %arg1: i32) -> (i32, i32) {
    %c0_i32 = arith.constant 0 : i32
    %c0_i32_0 = arith.constant 0 : i32
    %c0_i32_1 = arith.constant 0 : i32
    return %c0_i32, %c0_i32_0 : i32, i32
  }
  func.func @transform_10(%arg0: i32, %arg1: i32) -> (i32, i32) {
    %c0_i32 = arith.constant 0 : i32
    %c0_i32_0 = arith.constant 0 : i32
    %c0_i32_1 = arith.constant 0 : i32
    return %c0_i32, %c0_i32_0 : i32, i32
  }
  func.func @transform_11(%arg0: i32, %arg1: i32) -> (i32, i32) {
    %c0_i32 = arith.constant 0 : i32
    %c0_i32_0 = arith.constant 0 : i32
    %c0_i32_1 = arith.constant 0 : i32
    return %c0_i32, %c0_i32_0 : i32, i32
  }
  func.func @transform_12(%arg0: i32, %arg1: i32) -> (i32, i32) {
    %c0_i32 = arith.constant 0 : i32
    %c0_i32_0 = arith.constant 0 : i32
    %c0_i32_1 = arith.constant 0 : i32
    return %c0_i32, %c0_i32_0 : i32, i32
  }
  func.func @transform_13(%arg0: i32, %arg1: i32) -> (i32, i32) {
    %c0_i32 = arith.constant 0 : i32
    %c0_i32_0 = arith.constant 0 : i32
    %c0_i32_1 = arith.constant 0 : i32
    return %c0_i32, %c0_i32_0 : i32, i32
  }
  func.func @transform_14(%arg0: i32, %arg1: i32) -> (i32, i32) {
    %c0_i32 = arith.constant 0 : i32
    %c0_i32_0 = arith.constant 0 : i32
    %c0_i32_1 = arith.constant 0 : i32
    return %c0_i32, %c0_i32_0 : i32, i32
  }
  func.func @transform_15(%arg0: i32, %arg1: i32) -> (i32, i32) {
    %c0_i32 = arith.constant 0 : i32
    %c0_i32_0 = arith.constant 0 : i32
    %c0_i32_1 = arith.constant 0 : i32
    return %c0_i32, %c0_i32_0 : i32, i32
  }
  func.func @transform_16(%arg0: i32, %arg1: i32) -> (i32, i32) {
    %c0_i32 = arith.constant 0 : i32
    %c0_i32_0 = arith.constant 0 : i32
    %c0_i32_1 = arith.constant 0 : i32
    return %c0_i32, %c0_i32_0 : i32, i32
  }
  func.func @transform_17(%arg0: i32, %arg1: i32) -> (i32, i32) {
    %c0_i32 = arith.constant 0 : i32
    %c0_i32_0 = arith.constant 0 : i32
    %c0_i32_1 = arith.constant 0 : i32
    return %c0_i32, %c0_i32_0 : i32, i32
  }
  func.func @transform_18(%arg0: i32, %arg1: i32) -> (i32, i32) {
    %c0_i32 = arith.constant 0 : i32
    %c0_i32_0 = arith.constant 0 : i32
    %c0_i32_1 = arith.constant 0 : i32
    return %c0_i32, %c0_i32_0 : i32, i32
  }
  func.func @transform_19(%arg0: i32, %arg1: i32) -> (i32, i32, i32) {
    %c0_i32 = arith.constant 0 : i32
    %c0_i32_0 = arith.constant 0 : i32
    return %arg0, %arg1, %c0_i32 : i32, i32, i32
  }
}

module attributes {stable_mosaic.version = 11 : i64} {
  func.func @encoder_block_kernel(%arg0: i32, %arg1: i32, %arg2: memref<1x8x32xf32, #tpu.memory_space<vmem>>, %arg3: memref<8x8xbf16, #tpu.memory_space<vmem>>, %arg4: memref<1x1x8xf32, #tpu.memory_space<vmem>>, %arg5: memref<32x32xbf16, #tpu.memory_space<vmem>>, %arg6: memref<1x32xf32, #tpu.memory_space<vmem>>, %arg7: memref<32x32xbf16, #tpu.memory_space<vmem>>, %arg8: memref<1x32xf32, #tpu.memory_space<vmem>>, %arg9: memref<32x32xbf16, #tpu.memory_space<vmem>>, %arg10: memref<1x32xf32, #tpu.memory_space<vmem>>, %arg11: memref<32x32xbf16, #tpu.memory_space<vmem>>, %arg12: memref<1x32xf32, #tpu.memory_space<vmem>>, %arg13: memref<1x32xf32, #tpu.memory_space<vmem>>, %arg14: memref<1x32xf32, #tpu.memory_space<vmem>>, %arg15: memref<1x32xf32, #tpu.memory_space<vmem>>, %arg16: memref<1x32xf32, #tpu.memory_space<vmem>>, %arg17: memref<32x32xbf16, #tpu.memory_space<vmem>>, %arg18: memref<1x32xf32, #tpu.memory_space<vmem>>, %arg19: memref<32x32xbf16, #tpu.memory_space<vmem>>, %arg20: memref<1x32xf32, #tpu.memory_space<vmem>>, %arg21: memref<1x8x32xf32, #tpu.memory_space<vmem>>, %arg22: memref<8x32xbf16, #tpu.memory_space<vmem>>, %arg23: memref<8x32xbf16, #tpu.memory_space<vmem>>, %arg24: memref<8x32xbf16, #tpu.memory_space<vmem>>) attributes {dimension_semantics = [#tpu.dimension_semantics<parallel>, #tpu.dimension_semantics<arbitrary>], iteration_bounds = array<i64: 2, 1>, scalar_prefetch = 0 : i64, scratch_operands = 3 : i64, tpu.core_type = #tpu.core_type<tc>, window_params = [{transform_indices = @transform_0, window_bounds = array<i64: 1, 8, 32>}, {transform_indices = @transform_1, window_bounds = array<i64: 8, 8>}, {transform_indices = @transform_2, window_bounds = array<i64: 1, 1, 8>}, {pipeline_mode = #tpu.pipeline_mode<synchronous>, transform_indices = @transform_3, window_bounds = array<i64: 32, 32>}, {pipeline_mode = #tpu.pipeline_mode<synchronous>, transform_indices = @transform_4, window_bounds = array<i64: 1, 32>}, {pipeline_mode = #tpu.pipeline_mode<synchronous>, transform_indices = @transform_5, window_bounds = array<i64: 32, 32>}, {pipeline_mode = #tpu.pipeline_mode<synchronous>, transform_indices = @transform_6, window_bounds = array<i64: 1, 32>}, {pipeline_mode = #tpu.pipeline_mode<synchronous>, transform_indices = @transform_7, window_bounds = array<i64: 32, 32>}, {pipeline_mode = #tpu.pipeline_mode<synchronous>, transform_indices = @transform_8, window_bounds = array<i64: 1, 32>}, {pipeline_mode = #tpu.pipeline_mode<synchronous>, transform_indices = @transform_9, window_bounds = array<i64: 32, 32>}, {pipeline_mode = #tpu.pipeline_mode<synchronous>, transform_indices = @transform_10, window_bounds = array<i64: 1, 32>}, {pipeline_mode = #tpu.pipeline_mode<synchronous>, transform_indices = @transform_11, window_bounds = array<i64: 1, 32>}, {pipeline_mode = #tpu.pipeline_mode<synchronous>, transform_indices = @transform_12, window_bounds = array<i64: 1, 32>}, {pipeline_mode = #tpu.pipeline_mode<synchronous>, transform_indices = @transform_13, window_bounds = array<i64: 1, 32>}, {pipeline_mode = #tpu.pipeline_mode<synchronous>, transform_indices = @transform_14, window_bounds = array<i64: 1, 32>}, {pipeline_mode = #tpu.pipeline_mode<synchronous>, transform_indices = @transform_15, window_bounds = array<i64: 32, 32>}, {pipeline_mode = #tpu.pipeline_mode<synchronous>, transform_indices = @transform_16, window_bounds = array<i64: 1, 32>}, {pipeline_mode = #tpu.pipeline_mode<synchronous>, transform_indices = @transform_17, window_bounds = array<i64: 32, 32>}, {pipeline_mode = #tpu.pipeline_mode<synchronous>, transform_indices = @transform_18, window_bounds = array<i64: 1, 32>}, {transform_indices = @transform_19, window_bounds = array<i64: 1, 8, 32>}]} {
    %c0_i32 = arith.constant 0 : i32
    %0 = arith.cmpi eq, %arg1, %c0_i32 : i32
    %1 = arith.extui %0 : i1 to i32
    %c0_i32_0 = arith.constant 0 : i32
    %2 = arith.cmpi ne, %1, %c0_i32_0 : i32
    scf.if %2 {
      %c0_81 = arith.constant 0 : index
      %c0_82 = arith.constant 0 : index
      %c0_83 = arith.constant 0 : index
      %189 = vector.load %arg2[%c0_81, %c0_82, %c0_83] : memref<1x8x32xf32, #tpu.memory_space<vmem>>, vector<1x8x32xf32>
      %190 = vector.shape_cast %189 : vector<1x8x32xf32> to vector<8x32xf32>
      %c0_84 = arith.constant 0 : index
      %c0_85 = arith.constant 0 : index
      %191 = vector.load %arg13[%c0_84, %c0_85] : memref<1x32xf32, #tpu.memory_space<vmem>>, vector<1x32xf32>
      %c0_86 = arith.constant 0 : index
      %c0_87 = arith.constant 0 : index
      %192 = vector.load %arg14[%c0_86, %c0_87] : memref<1x32xf32, #tpu.memory_space<vmem>>, vector<1x32xf32>
      %cst_88 = arith.constant dense<0.000000e+00> : vector<8xf32>
      %193 = vector.multi_reduction <add>, %190, %cst_88 [1] : vector<8x32xf32> to vector<8xf32>
      %194 = vector.shape_cast %193 : vector<8xf32> to vector<8x1xf32>
      %cst_89 = arith.constant 3.200000e+01 : f32
      %195 = vector.broadcast %cst_89 : f32 to vector<8x1xf32>
      %196 = arith.divf %194, %195 : vector<8x1xf32>
      %197 = vector.broadcast %196 : vector<8x1xf32> to vector<8x32xf32>
      %198 = arith.subf %190, %197 : vector<8x32xf32>
      %199 = arith.mulf %198, %198 : vector<8x32xf32>
      %cst_90 = arith.constant dense<0.000000e+00> : vector<8xf32>
      %200 = vector.multi_reduction <add>, %199, %cst_90 [1] : vector<8x32xf32> to vector<8xf32>
      %201 = vector.shape_cast %200 : vector<8xf32> to vector<8x1xf32>
      %cst_91 = arith.constant 3.200000e+01 : f32
      %202 = vector.broadcast %cst_91 : f32 to vector<8x1xf32>
      %203 = arith.divf %201, %202 : vector<8x1xf32>
      %204 = vector.broadcast %196 : vector<8x1xf32> to vector<8x32xf32>
      %205 = arith.subf %190, %204 : vector<8x32xf32>
      %cst_92 = arith.constant 9.99999974E-6 : f32
      %206 = vector.broadcast %cst_92 : f32 to vector<8x1xf32>
      %207 = arith.addf %203, %206 : vector<8x1xf32>
      %208 = math.rsqrt %207 : vector<8x1xf32>
      %209 = vector.broadcast %208 : vector<8x1xf32> to vector<8x32xf32>
      %210 = arith.mulf %205, %209 : vector<8x32xf32>
      %211 = vector.broadcast %191 : vector<1x32xf32> to vector<8x32xf32>
      %212 = arith.mulf %210, %211 : vector<8x32xf32>
      %213 = vector.broadcast %192 : vector<1x32xf32> to vector<8x32xf32>
      %214 = arith.addf %212, %213 : vector<8x32xf32>
      %215 = arith.truncf %214 : vector<8x32xf32> to vector<8x32xbf16>
      %c0_93 = arith.constant 0 : index
      %c0_94 = arith.constant 0 : index
      %216 = vector.load %arg7[%c0_93, %c0_94] : memref<32x32xbf16, #tpu.memory_space<vmem>>, vector<32x32xbf16>
      %cst_95 = arith.constant dense<0.000000e+00> : vector<8x32xf32>
      %217 = tpu.matmul %215, %216, %cst_95 {dimension_numbers = #tpu.dot_dimension_numbers<[1], [0], [0], [1], [0, 0, 1, 1], [], []>} : vector<8x32xbf16>, vector<32x32xbf16>, vector<8x32xf32> -> vector<8x32xf32>
      %c0_96 = arith.constant 0 : index
      %c0_97 = arith.constant 0 : index
      %218 = vector.load %arg8[%c0_96, %c0_97] : memref<1x32xf32, #tpu.memory_space<vmem>>, vector<1x32xf32>
      %219 = vector.broadcast %218 : vector<1x32xf32> to vector<8x32xf32>
      %220 = arith.addf %217, %219 : vector<8x32xf32>
      %c0_98 = arith.constant 0 : index
      %c0_99 = arith.constant 0 : index
      %221 = vector.load %arg9[%c0_98, %c0_99] : memref<32x32xbf16, #tpu.memory_space<vmem>>, vector<32x32xbf16>
      %cst_100 = arith.constant dense<0.000000e+00> : vector<8x32xf32>
      %222 = tpu.matmul %215, %221, %cst_100 {dimension_numbers = #tpu.dot_dimension_numbers<[1], [0], [0], [1], [0, 0, 1, 1], [], []>} : vector<8x32xbf16>, vector<32x32xbf16>, vector<8x32xf32> -> vector<8x32xf32>
      %c0_101 = arith.constant 0 : index
      %c0_102 = arith.constant 0 : index
      %223 = vector.load %arg10[%c0_101, %c0_102] : memref<1x32xf32, #tpu.memory_space<vmem>>, vector<1x32xf32>
      %224 = vector.broadcast %223 : vector<1x32xf32> to vector<8x32xf32>
      %225 = arith.addf %222, %224 : vector<8x32xf32>
      %226 = arith.truncf %220 : vector<8x32xf32> to vector<8x32xbf16>
      %c0_103 = arith.constant 0 : index
      %c0_104 = arith.constant 0 : index
      %227 = vector.load %arg22[%c0_103, %c0_104] : memref<8x32xbf16, #tpu.memory_space<vmem>>, vector<8x32xbf16>
      tpu.vector_store %arg22[%c0_103, %c0_104], %226 {strides = array<i32>} : memref<8x32xbf16, #tpu.memory_space<vmem>>, vector<8x32xbf16>,
      %228 = arith.truncf %225 : vector<8x32xf32> to vector<8x32xbf16>
      %c0_105 = arith.constant 0 : index
      %c0_106 = arith.constant 0 : index
      %229 = vector.load %arg23[%c0_105, %c0_106] : memref<8x32xbf16, #tpu.memory_space<vmem>>, vector<8x32xbf16>
      tpu.vector_store %arg23[%c0_105, %c0_106], %228 {strides = array<i32>} : memref<8x32xbf16, #tpu.memory_space<vmem>>, vector<8x32xbf16>,
    } else {
    }
    %c8_i32 = arith.constant 8 : i32
    %3 = arith.muli %arg1, %c8_i32 : i32
    %4 = tpu.assume_multiple %3, 8 : i32
    %c0 = arith.constant 0 : index
    %5 = arith.index_cast %4 : i32 to index
    %c0_1 = arith.constant 0 : index
    %6 = vector.load %arg2[%c0, %5, %c0_1] : memref<1x8x32xf32, #tpu.memory_space<vmem>>, vector<1x8x32xf32>
    %7 = vector.shape_cast %6 : vector<1x8x32xf32> to vector<8x32xf32>
    %c0_2 = arith.constant 0 : index
    %c0_3 = arith.constant 0 : index
    %8 = vector.load %arg13[%c0_2, %c0_3] : memref<1x32xf32, #tpu.memory_space<vmem>>, vector<1x32xf32>
    %c0_4 = arith.constant 0 : index
    %c0_5 = arith.constant 0 : index
    %9 = vector.load %arg14[%c0_4, %c0_5] : memref<1x32xf32, #tpu.memory_space<vmem>>, vector<1x32xf32>
    %cst = arith.constant dense<0.000000e+00> : vector<8xf32>
    %10 = vector.multi_reduction <add>, %7, %cst [1] : vector<8x32xf32> to vector<8xf32>
    %11 = vector.shape_cast %10 : vector<8xf32> to vector<8x1xf32>
    %cst_6 = arith.constant 3.200000e+01 : f32
    %12 = vector.broadcast %cst_6 : f32 to vector<8x1xf32>
    %13 = arith.divf %11, %12 : vector<8x1xf32>
    %14 = vector.broadcast %13 : vector<8x1xf32> to vector<8x32xf32>
    %15 = arith.subf %7, %14 : vector<8x32xf32>
    %16 = arith.mulf %15, %15 : vector<8x32xf32>
    %cst_7 = arith.constant dense<0.000000e+00> : vector<8xf32>
    %17 = vector.multi_reduction <add>, %16, %cst_7 [1] : vector<8x32xf32> to vector<8xf32>
    %18 = vector.shape_cast %17 : vector<8xf32> to vector<8x1xf32>
    %cst_8 = arith.constant 3.200000e+01 : f32
    %19 = vector.broadcast %cst_8 : f32 to vector<8x1xf32>
    %20 = arith.divf %18, %19 : vector<8x1xf32>
    %21 = vector.broadcast %13 : vector<8x1xf32> to vector<8x32xf32>
    %22 = arith.subf %7, %21 : vector<8x32xf32>
    %cst_9 = arith.constant 9.99999974E-6 : f32
    %23 = vector.broadcast %cst_9 : f32 to vector<8x1xf32>
    %24 = arith.addf %20, %23 : vector<8x1xf32>
    %25 = math.rsqrt %24 : vector<8x1xf32>
    %26 = vector.broadcast %25 : vector<8x1xf32> to vector<8x32xf32>
    %27 = arith.mulf %22, %26 : vector<8x32xf32>
    %28 = vector.broadcast %8 : vector<1x32xf32> to vector<8x32xf32>
    %29 = arith.mulf %27, %28 : vector<8x32xf32>
    %30 = vector.broadcast %9 : vector<1x32xf32> to vector<8x32xf32>
    %31 = arith.addf %29, %30 : vector<8x32xf32>
    %32 = arith.truncf %31 : vector<8x32xf32> to vector<8x32xbf16>
    %c0_10 = arith.constant 0 : index
    %c0_11 = arith.constant 0 : index
    %33 = vector.load %arg5[%c0_10, %c0_11] : memref<32x32xbf16, #tpu.memory_space<vmem>>, vector<32x32xbf16>
    %cst_12 = arith.constant dense<0.000000e+00> : vector<8x32xf32>
    %34 = tpu.matmul %32, %33, %cst_12 {dimension_numbers = #tpu.dot_dimension_numbers<[1], [0], [0], [1], [0, 0, 1, 1], [], []>} : vector<8x32xbf16>, vector<32x32xbf16>, vector<8x32xf32> -> vector<8x32xf32>
    %c0_13 = arith.constant 0 : index
    %c0_14 = arith.constant 0 : index
    %35 = vector.load %arg6[%c0_13, %c0_14] : memref<1x32xf32, #tpu.memory_space<vmem>>, vector<1x32xf32>
    %36 = vector.broadcast %35 : vector<1x32xf32> to vector<8x32xf32>
    %37 = arith.addf %34, %36 : vector<8x32xf32>
    %cst_15 = arith.constant 0.353553385 : f32
    %38 = vector.broadcast %cst_15 : f32 to vector<8x32xf32>
    %39 = arith.mulf %37, %38 : vector<8x32xf32>
    %40 = arith.truncf %39 : vector<8x32xf32> to vector<8x32xbf16>
    %c0_16 = arith.constant 0 : index
    %c0_17 = arith.constant 0 : index
    %41 = vector.load %arg22[%c0_16, %c0_17] : memref<8x32xbf16, #tpu.memory_space<vmem>>, vector<8x32xbf16>
    %c0_18 = arith.constant 0 : index
    %c0_19 = arith.constant 0 : index
    %42 = vector.load %arg23[%c0_18, %c0_19] : memref<8x32xbf16, #tpu.memory_space<vmem>>, vector<8x32xbf16>
    %c0_20 = arith.constant 0 : index
    %c0_21 = arith.constant 0 : index
    %c0_22 = arith.constant 0 : index
    %43 = vector.load %arg4[%c0_20, %c0_21, %c0_22] : memref<1x1x8xf32, #tpu.memory_space<vmem>>, vector<1x1x8xf32>
    %44 = vector.shape_cast %43 : vector<1x1x8xf32> to vector<1x8xf32>
    %45 = vector.shape_cast %44 : vector<1x8xf32> to vector<1x8xf32>
    %46 = vector.broadcast %45 : vector<1x8xf32> to vector<8x8xf32>
    %cst_23 = arith.constant 5.000000e-01 : f32
    %47 = vector.broadcast %cst_23 : f32 to vector<8x8xf32>
    %48 = arith.cmpf ogt, %46, %47 : vector<8x8xf32>
    %c0_24 = arith.constant 0 : index
    %c0_25 = arith.constant 0 : index
    %49 = vector.load %arg3[%c0_24, %c0_25] : memref<8x8xbf16, #tpu.memory_space<vmem>>, vector<8x8xbf16>
    %50 = arith.extf %49 : vector<8x8xbf16> to vector<8x8xf32>
    %cst_26 = arith.constant -4.2949673E+9 : f32
    %51 = vector.broadcast %cst_26 : f32 to vector<8x8xf32>
    %52 = arith.select %48, %51, %50 : vector<8x8xi1>, vector<8x8xf32>
    %53 = vector.extract_strided_slice %40 {offsets = [0, 0], sizes = [8, 8], strides = [1, 1]} : vector<8x32xbf16> to vector<8x8xbf16>
    %54 = vector.extract_strided_slice %41 {offsets = [0, 0], sizes = [8, 8], strides = [1, 1]} : vector<8x32xbf16> to vector<8x8xbf16>
    %cst_27 = arith.constant dense<0.000000e+00> : vector<8x8xf32>
    %55 = tpu.matmul %53, %54, %cst_27 {dimension_numbers = #tpu.dot_dimension_numbers<[1], [1], [0], [0], [0, 0, 1, 0], [], []>} : vector<8x8xbf16>, vector<8x8xbf16>, vector<8x8xf32> -> vector<8x8xf32>
    %56 = arith.addf %55, %52 : vector<8x8xf32>
    %cst_28 = arith.constant dense<0xFF800000> : vector<8xf32>
    %57 = vector.multi_reduction <maximumf>, %56, %cst_28 [1] : vector<8x8xf32> to vector<8xf32>
    %58 = vector.shape_cast %57 : vector<8xf32> to vector<8x1xf32>
    %59 = vector.broadcast %58 : vector<8x1xf32> to vector<8x8xf32>
    %60 = arith.subf %56, %59 : vector<8x8xf32>
    %61 = math.exp %60 : vector<8x8xf32>
    %cst_29 = arith.constant dense<0.000000e+00> : vector<8xf32>
    %62 = vector.multi_reduction <add>, %61, %cst_29 [1] : vector<8x8xf32> to vector<8xf32>
    %63 = vector.shape_cast %62 : vector<8xf32> to vector<8x1xf32>
    %64 = tpu.reciprocal %63 {approx = true} : vector<8x1xf32> -> vector<8x1xf32>
    %65 = vector.broadcast %64 : vector<8x1xf32> to vector<8x8xf32>
    %66 = arith.mulf %61, %65 : vector<8x8xf32>
    %67 = arith.truncf %66 : vector<8x8xf32> to vector<8x8xbf16>
    %68 = vector.extract_strided_slice %42 {offsets = [0, 0], sizes = [8, 8], strides = [1, 1]} : vector<8x32xbf16> to vector<8x8xbf16>
    %cst_30 = arith.constant dense<0.000000e+00> : vector<8x8xf32>
    %69 = tpu.matmul %67, %68, %cst_30 {dimension_numbers = #tpu.dot_dimension_numbers<[1], [0], [0], [1], [0, 0, 1, 1], [], []>} : vector<8x8xbf16>, vector<8x8xbf16>, vector<8x8xf32> -> vector<8x8xf32>
    %70 = arith.truncf %69 : vector<8x8xf32> to vector<8x8xbf16>
    %c0_31 = arith.constant 0 : index
    %c0_32 = arith.constant 0 : index
    %71 = vector.load %arg24[%c0_31, %c0_32] : memref<8x32xbf16, #tpu.memory_space<vmem>>, vector<8x8xbf16>
    tpu.vector_store %arg24[%c0_31, %c0_32], %70 {strides = array<i32>} : memref<8x32xbf16, #tpu.memory_space<vmem>>, vector<8x8xbf16>,
    %72 = vector.extract_strided_slice %40 {offsets = [0, 8], sizes = [8, 8], strides = [1, 1]} : vector<8x32xbf16> to vector<8x8xbf16>
    %73 = vector.extract_strided_slice %41 {offsets = [0, 8], sizes = [8, 8], strides = [1, 1]} : vector<8x32xbf16> to vector<8x8xbf16>
    %cst_33 = arith.constant dense<0.000000e+00> : vector<8x8xf32>
    %74 = tpu.matmul %72, %73, %cst_33 {dimension_numbers = #tpu.dot_dimension_numbers<[1], [1], [0], [0], [0, 0, 1, 0], [], []>} : vector<8x8xbf16>, vector<8x8xbf16>, vector<8x8xf32> -> vector<8x8xf32>
    %75 = arith.addf %74, %52 : vector<8x8xf32>
    %cst_34 = arith.constant dense<0xFF800000> : vector<8xf32>
    %76 = vector.multi_reduction <maximumf>, %75, %cst_34 [1] : vector<8x8xf32> to vector<8xf32>
    %77 = vector.shape_cast %76 : vector<8xf32> to vector<8x1xf32>
    %78 = vector.broadcast %77 : vector<8x1xf32> to vector<8x8xf32>
    %79 = arith.subf %75, %78 : vector<8x8xf32>
    %80 = math.exp %79 : vector<8x8xf32>
    %cst_35 = arith.constant dense<0.000000e+00> : vector<8xf32>
    %81 = vector.multi_reduction <add>, %80, %cst_35 [1] : vector<8x8xf32> to vector<8xf32>
    %82 = vector.shape_cast %81 : vector<8xf32> to vector<8x1xf32>
    %83 = tpu.reciprocal %82 {approx = true} : vector<8x1xf32> -> vector<8x1xf32>
    %84 = vector.broadcast %83 : vector<8x1xf32> to vector<8x8xf32>
    %85 = arith.mulf %80, %84 : vector<8x8xf32>
    %86 = arith.truncf %85 : vector<8x8xf32> to vector<8x8xbf16>
    %87 = vector.extract_strided_slice %42 {offsets = [0, 8], sizes = [8, 8], strides = [1, 1]} : vector<8x32xbf16> to vector<8x8xbf16>
    %cst_36 = arith.constant dense<0.000000e+00> : vector<8x8xf32>
    %88 = tpu.matmul %86, %87, %cst_36 {dimension_numbers = #tpu.dot_dimension_numbers<[1], [0], [0], [1], [0, 0, 1, 1], [], []>} : vector<8x8xbf16>, vector<8x8xbf16>, vector<8x8xf32> -> vector<8x8xf32>
    %89 = arith.truncf %88 : vector<8x8xf32> to vector<8x8xbf16>
    %c0_37 = arith.constant 0 : index
    %c8 = arith.constant 8 : index
    %90 = vector.load %arg24[%c0_37, %c8] : memref<8x32xbf16, #tpu.memory_space<vmem>>, vector<8x8xbf16>
    tpu.vector_store %arg24[%c0_37, %c8], %89 {strides = array<i32>} : memref<8x32xbf16, #tpu.memory_space<vmem>>, vector<8x8xbf16>,
    %91 = vector.extract_strided_slice %40 {offsets = [0, 16], sizes = [8, 8], strides = [1, 1]} : vector<8x32xbf16> to vector<8x8xbf16>
    %92 = vector.extract_strided_slice %41 {offsets = [0, 16], sizes = [8, 8], strides = [1, 1]} : vector<8x32xbf16> to vector<8x8xbf16>
    %cst_38 = arith.constant dense<0.000000e+00> : vector<8x8xf32>
    %93 = tpu.matmul %91, %92, %cst_38 {dimension_numbers = #tpu.dot_dimension_numbers<[1], [1], [0], [0], [0, 0, 1, 0], [], []>} : vector<8x8xbf16>, vector<8x8xbf16>, vector<8x8xf32> -> vector<8x8xf32>
    %94 = arith.addf %93, %52 : vector<8x8xf32>
    %cst_39 = arith.constant dense<0xFF800000> : vector<8xf32>
    %95 = vector.multi_reduction <maximumf>, %94, %cst_39 [1] : vector<8x8xf32> to vector<8xf32>
    %96 = vector.shape_cast %95 : vector<8xf32> to vector<8x1xf32>
    %97 = vector.broadcast %96 : vector<8x1xf32> to vector<8x8xf32>
    %98 = arith.subf %94, %97 : vector<8x8xf32>
    %99 = math.exp %98 : vector<8x8xf32>
    %cst_40 = arith.constant dense<0.000000e+00> : vector<8xf32>
    %100 = vector.multi_reduction <add>, %99, %cst_40 [1] : vector<8x8xf32> to vector<8xf32>
    %101 = vector.shape_cast %100 : vector<8xf32> to vector<8x1xf32>
    %102 = tpu.reciprocal %101 {approx = true} : vector<8x1xf32> -> vector<8x1xf32>
    %103 = vector.broadcast %102 : vector<8x1xf32> to vector<8x8xf32>
    %104 = arith.mulf %99, %103 : vector<8x8xf32>
    %105 = arith.truncf %104 : vector<8x8xf32> to vector<8x8xbf16>
    %106 = vector.extract_strided_slice %42 {offsets = [0, 16], sizes = [8, 8], strides = [1, 1]} : vector<8x32xbf16> to vector<8x8xbf16>
    %cst_41 = arith.constant dense<0.000000e+00> : vector<8x8xf32>
    %107 = tpu.matmul %105, %106, %cst_41 {dimension_numbers = #tpu.dot_dimension_numbers<[1], [0], [0], [1], [0, 0, 1, 1], [], []>} : vector<8x8xbf16>, vector<8x8xbf16>, vector<8x8xf32> -> vector<8x8xf32>
    %108 = arith.truncf %107 : vector<8x8xf32> to vector<8x8xbf16>
    %c0_42 = arith.constant 0 : index
    %c16 = arith.constant 16 : index
    %109 = vector.load %arg24[%c0_42, %c16] : memref<8x32xbf16, #tpu.memory_space<vmem>>, vector<8x8xbf16>
    tpu.vector_store %arg24[%c0_42, %c16], %108 {strides = array<i32>} : memref<8x32xbf16, #tpu.memory_space<vmem>>, vector<8x8xbf16>,
    %110 = vector.extract_strided_slice %40 {offsets = [0, 24], sizes = [8, 8], strides = [1, 1]} : vector<8x32xbf16> to vector<8x8xbf16>
    %111 = vector.extract_strided_slice %41 {offsets = [0, 24], sizes = [8, 8], strides = [1, 1]} : vector<8x32xbf16> to vector<8x8xbf16>
    %cst_43 = arith.constant dense<0.000000e+00> : vector<8x8xf32>
    %112 = tpu.matmul %110, %111, %cst_43 {dimension_numbers = #tpu.dot_dimension_numbers<[1], [1], [0], [0], [0, 0, 1, 0], [], []>} : vector<8x8xbf16>, vector<8x8xbf16>, vector<8x8xf32> -> vector<8x8xf32>
    %113 = arith.addf %112, %52 : vector<8x8xf32>
    %cst_44 = arith.constant dense<0xFF800000> : vector<8xf32>
    %114 = vector.multi_reduction <maximumf>, %113, %cst_44 [1] : vector<8x8xf32> to vector<8xf32>
    %115 = vector.shape_cast %114 : vector<8xf32> to vector<8x1xf32>
    %116 = vector.broadcast %115 : vector<8x1xf32> to vector<8x8xf32>
    %117 = arith.subf %113, %116 : vector<8x8xf32>
    %118 = math.exp %117 : vector<8x8xf32>
    %cst_45 = arith.constant dense<0.000000e+00> : vector<8xf32>
    %119 = vector.multi_reduction <add>, %118, %cst_45 [1] : vector<8x8xf32> to vector<8xf32>
    %120 = vector.shape_cast %119 : vector<8xf32> to vector<8x1xf32>
    %121 = tpu.reciprocal %120 {approx = true} : vector<8x1xf32> -> vector<8x1xf32>
    %122 = vector.broadcast %121 : vector<8x1xf32> to vector<8x8xf32>
    %123 = arith.mulf %118, %122 : vector<8x8xf32>
    %124 = arith.truncf %123 : vector<8x8xf32> to vector<8x8xbf16>
    %125 = vector.extract_strided_slice %42 {offsets = [0, 24], sizes = [8, 8], strides = [1, 1]} : vector<8x32xbf16> to vector<8x8xbf16>
    %cst_46 = arith.constant dense<0.000000e+00> : vector<8x8xf32>
    %126 = tpu.matmul %124, %125, %cst_46 {dimension_numbers = #tpu.dot_dimension_numbers<[1], [0], [0], [1], [0, 0, 1, 1], [], []>} : vector<8x8xbf16>, vector<8x8xbf16>, vector<8x8xf32> -> vector<8x8xf32>
    %127 = arith.truncf %126 : vector<8x8xf32> to vector<8x8xbf16>
    %c0_47 = arith.constant 0 : index
    %c24 = arith.constant 24 : index
    %128 = vector.load %arg24[%c0_47, %c24] : memref<8x32xbf16, #tpu.memory_space<vmem>>, vector<8x8xbf16>
    tpu.vector_store %arg24[%c0_47, %c24], %127 {strides = array<i32>} : memref<8x32xbf16, #tpu.memory_space<vmem>>, vector<8x8xbf16>,
    %c0_48 = arith.constant 0 : index
    %c0_49 = arith.constant 0 : index
    %129 = vector.load %arg24[%c0_48, %c0_49] : memref<8x32xbf16, #tpu.memory_space<vmem>>, vector<8x32xbf16>
    %c0_50 = arith.constant 0 : index
    %c0_51 = arith.constant 0 : index
    %130 = vector.load %arg11[%c0_50, %c0_51] : memref<32x32xbf16, #tpu.memory_space<vmem>>, vector<32x32xbf16>
    %cst_52 = arith.constant dense<0.000000e+00> : vector<8x32xf32>
    %131 = tpu.matmul %129, %130, %cst_52 {dimension_numbers = #tpu.dot_dimension_numbers<[1], [0], [0], [1], [0, 0, 1, 1], [], []>} : vector<8x32xbf16>, vector<32x32xbf16>, vector<8x32xf32> -> vector<8x32xf32>
    %132 = arith.addf %7, %131 : vector<8x32xf32>
    %c0_53 = arith.constant 0 : index
    %c0_54 = arith.constant 0 : index
    %133 = vector.load %arg12[%c0_53, %c0_54] : memref<1x32xf32, #tpu.memory_space<vmem>>, vector<1x32xf32>
    %134 = vector.broadcast %133 : vector<1x32xf32> to vector<8x32xf32>
    %135 = arith.addf %132, %134 : vector<8x32xf32>
    %c0_55 = arith.constant 0 : index
    %c0_56 = arith.constant 0 : index
    %136 = vector.load %arg15[%c0_55, %c0_56] : memref<1x32xf32, #tpu.memory_space<vmem>>, vector<1x32xf32>
    %c0_57 = arith.constant 0 : index
    %c0_58 = arith.constant 0 : index
    %137 = vector.load %arg16[%c0_57, %c0_58] : memref<1x32xf32, #tpu.memory_space<vmem>>, vector<1x32xf32>
    %cst_59 = arith.constant dense<0.000000e+00> : vector<8xf32>
    %138 = vector.multi_reduction <add>, %135, %cst_59 [1] : vector<8x32xf32> to vector<8xf32>
    %139 = vector.shape_cast %138 : vector<8xf32> to vector<8x1xf32>
    %cst_60 = arith.constant 3.200000e+01 : f32
    %140 = vector.broadcast %cst_60 : f32 to vector<8x1xf32>
    %141 = arith.divf %139, %140 : vector<8x1xf32>
    %142 = vector.broadcast %141 : vector<8x1xf32> to vector<8x32xf32>
    %143 = arith.subf %135, %142 : vector<8x32xf32>
    %144 = arith.mulf %143, %143 : vector<8x32xf32>
    %cst_61 = arith.constant dense<0.000000e+00> : vector<8xf32>
    %145 = vector.multi_reduction <add>, %144, %cst_61 [1] : vector<8x32xf32> to vector<8xf32>
    %146 = vector.shape_cast %145 : vector<8xf32> to vector<8x1xf32>
    %cst_62 = arith.constant 3.200000e+01 : f32
    %147 = vector.broadcast %cst_62 : f32 to vector<8x1xf32>
    %148 = arith.divf %146, %147 : vector<8x1xf32>
    %149 = vector.broadcast %141 : vector<8x1xf32> to vector<8x32xf32>
    %150 = arith.subf %135, %149 : vector<8x32xf32>
    %cst_63 = arith.constant 9.99999974E-6 : f32
    %151 = vector.broadcast %cst_63 : f32 to vector<8x1xf32>
    %152 = arith.addf %148, %151 : vector<8x1xf32>
    %153 = math.rsqrt %152 : vector<8x1xf32>
    %154 = vector.broadcast %153 : vector<8x1xf32> to vector<8x32xf32>
    %155 = arith.mulf %150, %154 : vector<8x32xf32>
    %156 = vector.broadcast %136 : vector<1x32xf32> to vector<8x32xf32>
    %157 = arith.mulf %155, %156 : vector<8x32xf32>
    %158 = vector.broadcast %137 : vector<1x32xf32> to vector<8x32xf32>
    %159 = arith.addf %157, %158 : vector<8x32xf32>
    %160 = arith.truncf %159 : vector<8x32xf32> to vector<8x32xbf16>
    %c0_64 = arith.constant 0 : index
    %c0_65 = arith.constant 0 : index
    %161 = vector.load %arg17[%c0_64, %c0_65] : memref<32x32xbf16, #tpu.memory_space<vmem>>, vector<32x32xbf16>
    %cst_66 = arith.constant dense<0.000000e+00> : vector<8x32xf32>
    %162 = tpu.matmul %160, %161, %cst_66 {dimension_numbers = #tpu.dot_dimension_numbers<[1], [0], [0], [1], [0, 0, 1, 1], [], []>} : vector<8x32xbf16>, vector<32x32xbf16>, vector<8x32xf32> -> vector<8x32xf32>
    %c0_67 = arith.constant 0 : index
    %c0_68 = arith.constant 0 : index
    %163 = vector.load %arg18[%c0_67, %c0_68] : memref<1x32xf32, #tpu.memory_space<vmem>>, vector<1x32xf32>
    %164 = vector.broadcast %163 : vector<1x32xf32> to vector<8x32xf32>
    %165 = arith.addf %162, %164 : vector<8x32xf32>
    %166 = arith.truncf %165 : vector<8x32xf32> to vector<8x32xbf16>
    %cst_69 = arith.constant 5.000000e-01 : bf16
    %167 = vector.broadcast %cst_69 : bf16 to vector<8x32xbf16>
    %168 = arith.mulf %167, %166 : vector<8x32xbf16>
    %cst_70 = arith.constant 4.467770e-02 : bf16
    %169 = vector.broadcast %cst_70 : bf16 to vector<8x32xbf16>
    %170 = arith.mulf %169, %166 : vector<8x32xbf16>
    %171 = arith.mulf %170, %166 : vector<8x32xbf16>
    %172 = arith.mulf %171, %166 : vector<8x32xbf16>
    %173 = arith.addf %166, %172 : vector<8x32xbf16>
    %cst_71 = arith.constant 7.968750e-01 : bf16
    %174 = vector.broadcast %cst_71 : bf16 to vector<8x32xbf16>
    %175 = arith.mulf %174, %173 : vector<8x32xbf16>
    %176 = math.tanh %175 : vector<8x32xbf16>
    %cst_72 = arith.constant 1.000000e+00 : bf16
    %177 = vector.broadcast %cst_72 : bf16 to vector<8x32xbf16>
    %178 = arith.addf %177, %176 : vector<8x32xbf16>
    %179 = arith.mulf %168, %178 : vector<8x32xbf16>
    %c0_73 = arith.constant 0 : index
    %c0_74 = arith.constant 0 : index
    %180 = vector.load %arg19[%c0_73, %c0_74] : memref<32x32xbf16, #tpu.memory_space<vmem>>, vector<32x32xbf16>
    %cst_75 = arith.constant dense<0.000000e+00> : vector<8x32xf32>
    %181 = tpu.matmul %179, %180, %cst_75 {dimension_numbers = #tpu.dot_dimension_numbers<[1], [0], [0], [1], [0, 0, 1, 1], [], []>} : vector<8x32xbf16>, vector<32x32xbf16>, vector<8x32xf32> -> vector<8x32xf32>
    %c0_76 = arith.constant 0 : index
    %c0_77 = arith.constant 0 : index
    %182 = vector.load %arg20[%c0_76, %c0_77] : memref<1x32xf32, #tpu.memory_space<vmem>>, vector<1x32xf32>
    %183 = vector.broadcast %182 : vector<1x32xf32> to vector<8x32xf32>
    %184 = arith.addf %181, %183 : vector<8x32xf32>
    %185 = arith.addf %135, %184 : vector<8x32xf32>
    %c0_78 = arith.constant 0 : index
    %c0_79 = arith.constant 0 : index
    %c0_80 = arith.constant 0 : index
    %186 = vector.load %arg21[%c0_78, %c0_79, %c0_80] : memref<1x8x32xf32, #tpu.memory_space<vmem>>, vector<1x8x32xf32>
    %187 = vector.shape_cast %186 : vector<1x8x32xf32> to vector<8x32xf32>
    %188 = vector.shape_cast %185 : vector<8x32xf32> to vector<1x8x32xf32>
    tpu.vector_store %arg21[%c0_78, %c0_79, %c0_80], %188 {strides = array<i32>} : memref<1x8x32xf32, #tpu.memory_space<vmem>>, vector<1x8x32xf32>,
    return
  }
  func.func @transform_0(%arg0: i32, %arg1: i32) -> (i32, i32, i32) {
    %c0_i32 = arith.constant 0 : i32
    %c0_i32_0 = arith.constant 0 : i32
    %c0_i32_1 = arith.constant 0 : i32
    return %arg0, %c0_i32, %c0_i32_0 : i32, i32, i32
  }
  func.func @transform_1(%arg0: i32, %arg1: i32) -> (i32, i32) {
    %c0_i32 = arith.constant 0 : i32
    %c0_i32_0 = arith.constant 0 : i32
    return %arg1, %c0_i32 : i32, i32
  }
  func.func @transform_2(%arg0: i32, %arg1: i32) -> (i32, i32, i32) {
    %c0_i32 = arith.constant 0 : i32
    %c0_i32_0 = arith.constant 0 : i32
    %c0_i32_1 = arith.constant 0 : i32
    return %arg0, %c0_i32, %c0_i32_0 : i32, i32, i32
  }
  func.func @transform_3(%arg0: i32, %arg1: i32) -> (i32, i32) {
    %c0_i32 = arith.constant 0 : i32
    %c0_i32_0 = arith.constant 0 : i32
    %c0_i32_1 = arith.constant 0 : i32
    return %c0_i32, %c0_i32_0 : i32, i32
  }
  func.func @transform_4(%arg0: i32, %arg1: i32) -> (i32, i32) {
    %c0_i32 = arith.constant 0 : i32
    %c0_i32_0 = arith.constant 0 : i32
    %c0_i32_1 = arith.constant 0 : i32
    return %c0_i32, %c0_i32_0 : i32, i32
  }
  func.func @transform_5(%arg0: i32, %arg1: i32) -> (i32, i32) {
    %c0_i32 = arith.constant 0 : i32
    %c0_i32_0 = arith.constant 0 : i32
    %c0_i32_1 = arith.constant 0 : i32
    return %c0_i32, %c0_i32_0 : i32, i32
  }
  func.func @transform_6(%arg0: i32, %arg1: i32) -> (i32, i32) {
    %c0_i32 = arith.constant 0 : i32
    %c0_i32_0 = arith.constant 0 : i32
    %c0_i32_1 = arith.constant 0 : i32
    return %c0_i32, %c0_i32_0 : i32, i32
  }
  func.func @transform_7(%arg0: i32, %arg1: i32) -> (i32, i32) {
    %c0_i32 = arith.constant 0 : i32
    %c0_i32_0 = arith.constant 0 : i32
    %c0_i32_1 = arith.constant 0 : i32
    return %c0_i32, %c0_i32_0 : i32, i32
  }
  func.func @transform_8(%arg0: i32, %arg1: i32) -> (i32, i32) {
    %c0_i32 = arith.constant 0 : i32
    %c0_i32_0 = arith.constant 0 : i32
    %c0_i32_1 = arith.constant 0 : i32
    return %c0_i32, %c0_i32_0 : i32, i32
  }
  func.func @transform_9(%arg0: i32, %arg1: i32) -> (i32, i32) {
    %c0_i32 = arith.constant 0 : i32
    %c0_i32_0 = arith.constant 0 : i32
    %c0_i32_1 = arith.constant 0 : i32
    return %c0_i32, %c0_i32_0 : i32, i32
  }
  func.func @transform_10(%arg0: i32, %arg1: i32) -> (i32, i32) {
    %c0_i32 = arith.constant 0 : i32
    %c0_i32_0 = arith.constant 0 : i32
    %c0_i32_1 = arith.constant 0 : i32
    return %c0_i32, %c0_i32_0 : i32, i32
  }
  func.func @transform_11(%arg0: i32, %arg1: i32) -> (i32, i32) {
    %c0_i32 = arith.constant 0 : i32
    %c0_i32_0 = arith.constant 0 : i32
    %c0_i32_1 = arith.constant 0 : i32
    return %c0_i32, %c0_i32_0 : i32, i32
  }
  func.func @transform_12(%arg0: i32, %arg1: i32) -> (i32, i32) {
    %c0_i32 = arith.constant 0 : i32
    %c0_i32_0 = arith.constant 0 : i32
    %c0_i32_1 = arith.constant 0 : i32
    return %c0_i32, %c0_i32_0 : i32, i32
  }
  func.func @transform_13(%arg0: i32, %arg1: i32) -> (i32, i32) {
    %c0_i32 = arith.constant 0 : i32
    %c0_i32_0 = arith.constant 0 : i32
    %c0_i32_1 = arith.constant 0 : i32
    return %c0_i32, %c0_i32_0 : i32, i32
  }
  func.func @transform_14(%arg0: i32, %arg1: i32) -> (i32, i32) {
    %c0_i32 = arith.constant 0 : i32
    %c0_i32_0 = arith.constant 0 : i32
    %c0_i32_1 = arith.constant 0 : i32
    return %c0_i32, %c0_i32_0 : i32, i32
  }
  func.func @transform_15(%arg0: i32, %arg1: i32) -> (i32, i32) {
    %c0_i32 = arith.constant 0 : i32
    %c0_i32_0 = arith.constant 0 : i32
    %c0_i32_1 = arith.constant 0 : i32
    return %c0_i32, %c0_i32_0 : i32, i32
  }
  func.func @transform_16(%arg0: i32, %arg1: i32) -> (i32, i32) {
    %c0_i32 = arith.constant 0 : i32
    %c0_i32_0 = arith.constant 0 : i32
    %c0_i32_1 = arith.constant 0 : i32
    return %c0_i32, %c0_i32_0 : i32, i32
  }
  func.func @transform_17(%arg0: i32, %arg1: i32) -> (i32, i32) {
    %c0_i32 = arith.constant 0 : i32
    %c0_i32_0 = arith.constant 0 : i32
    %c0_i32_1 = arith.constant 0 : i32
    return %c0_i32, %c0_i32_0 : i32, i32
  }
  func.func @transform_18(%arg0: i32, %arg1: i32) -> (i32, i32) {
    %c0_i32 = arith.constant 0 : i32
    %c0_i32_0 = arith.constant 0 : i32
    %c0_i32_1 = arith.constant 0 : i32
    return %c0_i32, %c0_i32_0 : i32, i32
  }
  func.func @transform_19(%arg0: i32, %arg1: i32) -> (i32, i32, i32) {
    %c0_i32 = arith.constant 0 : i32
    %c0_i32_0 = arith.constant 0 : i32
    return %arg0, %arg1, %c0_i32 : i32, i32, i32
  }
}

</mosaic_0001>

<bundles_post_ra>
// kernel: tpu_custom_call.1
= control target key start
LH: loop header
LB: loop body
LE: loop exit
PB: predicated region body
PF: predicated region fallthrough
CT: control target
= control target key end

     0   :  { %s3380_s0 = inlined_call_operand.hbm [shape: f32[2,8,32], index: 0, kind: input, shape index: {}]   ;;  %s3381_s1 = inlined_call_operand.hbm [shape: bf16[8,8], index: 1, kind: input, shape index: {}]   ;;  %s3382_s2 = inlined_call_operand.hbm [shape: f32[2,1,8], index: 2, kind: input, shape index: {}]   ;;  %s3383_s3 = inlined_call_operand.hbm [shape: bf16[32,32], index: 3, kind: input, shape index: {}]   ;;  %s3384_s4 = inlined_call_operand.hbm [shape: f32[1,32], index: 4, kind: input, shape index: {}]   ;;  %s3385_s5 = inlined_call_operand.hbm [shape: bf16[32,32], index: 5, kind: input, shape index: {}]   ;;  %s3386_s6 = inlined_call_operand.hbm [shape: f32[1,32], index: 6, kind: input, shape index: {}]   ;;  %s3387_s7 = inlined_call_operand.hbm [shape: bf16[32,32], index: 7, kind: input, shape index: {}]   ;;  %s3388_s8 = inlined_call_operand.hbm [shape: f32[1,32], index: 8, kind: input, shape index: {}]   ;;  %s3389_s9 = inlined_call_operand.vmem [shape: bf16[32,32], index: 9, kind: input, shape index: {}]   ;;  %s3390_s10 = inlined_call_operand.vmem [shape: f32[1,32], index: 10, kind: input, shape index: {}]   ;;  %s3391_s11 = inlined_call_operand.vmem [shape: f32[1,32], index: 11, kind: input, shape index: {}]   ;;  %s3392_s12 = inlined_call_operand.vmem [shape: f32[1,32], index: 12, kind: input, shape index: {}]   ;;  %s3393_s13 = inlined_call_operand.vmem [shape: f32[1,32], index: 13, kind: input, shape index: {}]   ;;  %s3394_s14 = inlined_call_operand.vmem [shape: f32[1,32], index: 14, kind: input, shape index: {}]   ;;  %s3395_s15 = inlined_call_operand.hbm [shape: bf16[32,32], index: 15, kind: input, shape index: {}]   ;;  %s3396_s16 = inlined_call_operand.vmem [shape: f32[1,32], index: 16, kind: input, shape index: {}]   ;;  %s3397_s17 = inlined_call_operand.hbm [shape: bf16[32,32], index: 17, kind: input, shape index: {}]   ;;  %s3398_s18 = inlined_call_operand.vmem [shape: f32[1,32], index: 18, kind: input, shape index: {}]   ;;  %s3399_s19 = inlined_call_operand.hbm [shape: f32[2,8,32], index: 19, kind: output, shape index: {}]  }
   0x1   :  { %3414 = sst [smem:[#allocation38_spill]] %s3380_s0 }
   0x2   :  { %3415 = sst [smem:[#allocation39_spill]] %s3381_s1 }
   0x3   :  { %3416 = sst [smem:[#allocation40_spill]] %s3382_s2 }
   0x4   :  { %3417 = sst [smem:[#allocation41_spill]] %s3383_s3 }
   0x5   :  { %3418 = sst [smem:[#allocation42_spill]] %s3384_s4 }
   0x6   :  { %3419 = sst [smem:[#allocation43_spill]] %s3386_s6 }
   0x7   :  { %3420 = sst [smem:[#allocation44_spill]] %s3388_s8 }
   0x8   :  { %3421 = sst [smem:[#allocation45_spill]] %s3389_s9 }
   0x9   :  { %3422 = sst [smem:[#allocation46_spill]] %s3390_s10 }
   0xa   :  { %3423 = sst [smem:[#allocation47_spill]] %s3393_s13 }
   0xb   :  { %3424 = sst [smem:[#allocation48_spill]] %s3394_s14 }
   0xc   :  { %3425 = sst [smem:[#allocation49_spill]] %s3396_s16 }
   0xd   :  { %3426 = sst [smem:[#allocation50_spill]] %s3398_s18 }
   0xe   :  { %3427 = sst [smem:[#allocation51_spill]] %s3399_s19 }
   0xf   :  { %24 = vsyncpa [#allocation6], 0 }
  0x10   :  { %26 = vsyncpa [#allocation6 + $0x1], 0 }
  0x11   :  { %27 = vsyncpa [#allocation9], 0 }
  0x12   :  { %28 = vsyncpa [#allocation13], 0 }
  0x13   :  { %29 = vsyncpa [#allocation16], 0 }
  0x14   :  { %30 = vsyncpa [#allocation19], 0 }
  0x15   :  { %31 = vsyncpa [#allocation22], 0 }
  0x16   :  { %32 = vsyncpa [#allocation7], 0 }
  0x17   :  { %34 = vsyncpa [#allocation7 + $0x1], 0  ;;  %s2939_s0 = smov 0   ;;  %s2941_s30 = smov 0  }
  0x18   :  { %s2943_s20 = smov 0   ;;  %s2945_s21 = smov 0  }
  0x19   :  { %s2947_s1 = smov 0   ;;  %s2949_s22 = smov 0  }
  0x1a LB: > { %3428 = sst [smem:[#allocation33_spill]] %s2795_s0  ;;  %s2970_s2 = sadd.s32 4294967295, %s2815_s22   ;;  %s2815_s22 = sphi %s2949_s22, %s40_s22   ;;  %s2811_s1 = sphi %s2947_s1, %s3485_s1   ;;  %s2807_s21 = sphi %s2945_s21, %s3484_s21   ;;  %s2803_s20 = sphi %s2943_s20, %s3483_s20   ;;  %s2799_s30 = sphi %s2941_s30, %s3482_s30   ;;  %s2795_s0 = sphi %s2939_s0, %s3481_s0  }
  0x1b   : > { %3429 = sst [smem:[#allocation34_spill]] %s2807_s21  ;;  %p2004_p0 = scmp.ge.s32.totalorder %s2815_s22, 1 }
  0x1c   : > { %3430 = sst [smem:[#allocation35_spill]] %s2815_s22  ;;  %p3401_p1 = scmp.eq.s32.totalorder %s2970_s2, 0 }
  0x1d   : > { %p499_p2 = scmp.lt.s32.totalorder %s2815_s22, 3  ;;  %s2817_s24 = smov [#allocation8]  }
  0x1e   : > { %s514_s25 = sshll.u32 %s2817_s24, 4  ;;  %s2818_s3 = smov [#allocation12]   ;;  %s515_s25 = int_to_ptr.vmem [resolvable:$true] %s514_s25 }
  0x1f   : > { %p2975_p3 = pnand %p2004_p0, %p499_p2  ;;  %s538_s26 = sshll.u32 %s2818_s3, 4  ;;  %s539_s26 = int_to_ptr.vmem [resolvable:$true] %s538_s26 }
  0x20   : > { %s2819_s28 = smov [#allocation15]   ;;  %s2428_s19 = scalar_lea.vmem %s515_s25, 64 }
  0x21   : > { %s3431_s23 = scalar_select %p2975_p3, 1, 0 }
  0x22   : > { %p2253_p5 = pneg %p2975_p3  ;;  %s562_s29 = sshll.u32 %s2819_s28, 4  ;;  %s2988_s29 = int_to_ptr.vmem [resolvable:$true] %s562_s29 }
  0x23   : > { %p2429_p8 = scmp.ne.s32.totalorder %s515_s25, %s2428_s19  ;;  %p2436_p11 = scmp.lt.s32.totalorder %s515_s25, %s515_s25 }
  0x24   : > { %p2984_p6 = pnand %p2253_p5, %p3401_p1  ;;  %p2437_p12 = scmp.lt.s32.totalorder %s2428_s19, %s2428_s19 }
  0x26   : > { %s3432_s27 = scalar_select %p2984_p6, 1, 0 }
  0x27   : > { %p2992_p7 = pneg %p2984_p6  ;;  %p2438_p13 = por %p2437_p12, %p2436_p11 }
  0x29   : > { %p2431_p9 = pnand %p2429_p8, %p2992_p7 }
  0x2b   : > { %p2432_p10 = pneg %p2431_p9 }
  0x2d   : > { %p2439_p0 = pnand %p2438_p13, %p2432_p10 }
  0x2f   : > { %2442 = shalt.err (!%p2439_p0)
}
  0x30   : > { %s3434_s18 = sld [smem:[#allocation39_spill]]  ;;  %s2454_s21 = scalar_lea.vmem %s539_s26, 16 }
  0x31   : > { %p2455_p2 = scmp.ne.s32.totalorder %s539_s26, %s2454_s21  ;;  %s2461_s16 = scalar_lea.vmem %s539_s26, 32 }
  0x32   : > { %p2462_p8 = scmp.lt.s32.totalorder %s539_s26, %s539_s26  ;;  %p2463_p9 = scmp.lt.s32.totalorder %s2461_s16, %s2454_s21 }
  0x33   : > { %p2457_p5 = pnand %p2455_p2, %p2992_p7 }
  0x34   : > { %p2464_p1 = por %p2463_p9, %p2462_p8 }
  0x35   : > { %p2458_p4 = pneg %p2457_p5 }
  0x36   : > { %2256 = dma.hbm_to_vmem [thread:$0]  (!%p2984_p6), %s3434_s18, 64, %s515_s25, [#allocation9]  }
  0x37   : > { %p2465_p3 = pnand %p2464_p1, %p2458_p4 }
  0x39   : > { %2468 = shalt.err (!%p2465_p3)
}
  0x3a   : > { %s3435_s4 = sld [smem:[#allocation42_spill]]  ;;  %s2480_s18 = scalar_lea.vmem %s2988_s29, 16 }
  0x3b   : > { %p2481_p10 = scmp.ne.s32.totalorder %s2988_s29, %s2480_s18  ;;  %s2487_s16 = scalar_lea.vmem %s2988_s29, 32 }
  0x3c   : > { %p2488_p1 = scmp.lt.s32.totalorder %s2988_s29, %s2988_s29  ;;  %p2489_p3 = scmp.lt.s32.totalorder %s2487_s16, %s2480_s18 }
  0x3d   : > { %p2483_p11 = pnand %p2481_p10, %p2992_p7 }
  0x3e   : > { %p2490_p4 = por %p2489_p3, %p2488_p1 }
  0x3f   : > { %p2484_p12 = pneg %p2483_p11 }
  0x40   : > { %2262 = dma.hbm_to_vmem [thread:$0]  (!%p2984_p6), %s3435_s4, 16, %s539_s26, [#allocation13]  }
  0x41   : > { %p2491_p13 = pnand %p2490_p4, %p2484_p12 }
  0x43   : > { %2494 = shalt.err (!%p2491_p13)
}
  0x44   : > { %s3436_s6 = sld [smem:[#allocation43_spill]]  ;;  %s2820_s25 = smov [#allocation18]  }
  0x45   : > { %s586_s26 = sshll.u32 %s2820_s25, 4  ;;  %s587_s26 = int_to_ptr.vmem [resolvable:$true] %s586_s26 }
  0x46   : > { %s2506_s3 = scalar_lea.vmem %s587_s26, 16  ;;  %s2513_s28 = scalar_lea.vmem %s587_s26, 32 }
  0x47   : > { %p2507_p0 = scmp.ne.s32.totalorder %s587_s26, %s2506_s3  ;;  %p2514_p8 = scmp.lt.s32.totalorder %s587_s26, %s587_s26 }
  0x48   : > { %p2515_p9 = scmp.lt.s32.totalorder %s2513_s28, %s2506_s3 }
  0x49   : > { %p2509_p2 = pnand %p2507_p0, %p2992_p7 }
  0x4a   : > { %2268 = dma.hbm_to_vmem [thread:$0]  (!%p2984_p6), %s3436_s6, 16, %s2988_s29, [#allocation16]  }
  0x4b   : > { %p2510_p5 = pneg %p2509_p2  ;;  %p2516_p10 = por %p2515_p9, %p2514_p8 }
  0x4d   : > { %p2517_p11 = pnand %p2516_p10, %p2510_p5 }
  0x4f   : > { %2520 = shalt.err (!%p2517_p11)
}
  0x50   : > { %s3437_s8 = sld [smem:[#allocation44_spill]]  ;;  %s2003_s29 = sadd.s32 4294967294, %s2815_s22  }
  0x51   : > { %s52_s16 = sadd.s32 1, %s2811_s1  ;;  %s59_s14 = sadd.s32 1, %s2803_s20 }
  0x52   : > { %p54_p12 = scmp.ge.s32.totalorder %s52_s16, 2  ;;  %p66_p1 = scmp.ne.s32.totalorder %s2803_s20, %s2799_s30 }
  0x53   : > { %p67_p3 = scmp.eq.s32.totalorder %s2815_s22, 0  ;;  %p72_p13 = scmp.ne.s32.totalorder %s2799_s30, %s2795_s0 }
  0x54   : > { %s3487_s16 = smov (%p54_p12, %s52_s16), 0  ;;  %p486_p0 = scmp.eq.s32.totalorder %s2970_s2, 1 }
  0x55   : > { %3438 = sst [smem:[#allocation36_spill]] %s3487_s16  ;;  %p3038_p4 = por %p67_p3, %p66_p1 }
  0x56   : > { %2274 = dma.hbm_to_vmem [thread:$0]  (!%p2984_p6), %s3437_s8, 16, %s587_s26, [#allocation19]  }
  0x57   : > { %s56_s25 = ssub.s32 %s2811_s1, %s3487_s16  ;;  %p3440_p5 = scmp.eq.s32.totalorder %s2970_s2, 0 }
  0x58   : > { %p57_p2 = scmp.eq.s32.totalorder %s56_s25, 0  ;;  %p3053_p9 = por %p486_p0, %p66_p1 }
  0x59   : > { %p3049_p8 = por %p3440_p5, %p72_p13  ;;  %p492_p10 = scmp.eq.s32.totalorder %s2003_s29, 1 }
  0x5a   : > { %s3442_s3 = scalar_select %p3053_p9, 1, 0 }
  0x5b   : > { %s3441_s26 = scalar_select %p3049_p8, 1, 0 }
  0x5c   : > { %s3058_s28 = scalar_select %p57_p2, %s2803_s20, %s59_s14  }
  0x5d   : > { %p3060_p11 = por %p492_p10, %p72_p13  ;;  %p2301_p12 = scmp.lt.s32.totalorder %s2815_s22, 2 }
  0x5e   : > { %3443 = sst [smem:[#allocation37_spill]] %s3058_s28  ;;  %s647_s18 = sand.u32 1, %s2815_s22  }
  0x5f   : > { %s3444_s19 = scalar_select %p3060_p11, 1, 0 }
  0x60   : > { %s3408_s4 = sand.u32 1, %s2803_s20   ;;  %s2016_s6 = sshll.u32 %s2811_s1, 7 }
  0x61   : > { %s2015_s25 = sshll.u32 %s3408_s4, 3  ;;  %s3445_s0 = sld [smem:[#allocation38_spill]] }
  0x62   : > { %s651_s10 = scalar_lea.vmem [#allocation5], %s2015_s25  ;;  %p3075_p1 = pnand %p2301_p12, %p3038_p4 }
  0x63   : > { %s658_s9 = sshll.u32 %s651_s10, 4  ;;  %s2821_s14 = smov [#allocation11]   ;;  %s659_s9 = int_to_ptr.vmem [resolvable:$true] %s658_s9 }
  0x64   : > { %s524_s28 = sshll.u32 %s2821_s14, 4  ;;  %s3079_s22 = scalar_lea.sflag [#allocation6], %s647_s18  ;;  %s525_s28 = int_to_ptr.vmem [resolvable:$true] %s524_s28 }
  0x65   : > { %p3409_p3 = pneg %p3075_p1  ;;  %s2534_s4 = scalar_lea.vmem %s659_s9, 128 }
  0x66   : > { %p2535_p13 = scmp.ne.s32.totalorder %s659_s9, %s2534_s4 }
  0x67   : > { %s656_s13 = scalar_lea.hbm %s3445_s0, %s2016_s6  ;;  %s2822_s6 = smov [#allocation5]  }
  0x68   : > { %p2537_p0 = pnand %p2535_p13, %p3409_p3  ;;  %s2539_s8 = sshll.u32 %s2822_s6, 4  ;;  %s2540_s8 = int_to_ptr.vmem [resolvable:$false] %s2539_s8 }
  0x69   : > { %s2541_s10 = scalar_lea.vmem %s2540_s8, 256  ;;  %p2542_p4 = scmp.lt.s32.totalorder %s659_s9, %s2540_s8 }
  0x6a   : > { %p2538_p2 = pneg %p2537_p0  ;;  %p2543_p5 = scmp.lt.s32.totalorder %s2541_s10, %s2534_s4 }
  0x6c   : > { %p2544_p10 = por %p2543_p5, %p2542_p4 }
  0x6e   : > { %p2545_p12 = pnand %p2544_p10, %p2538_p2 }
  0x70   : > { %2548 = shalt.err (!%p2545_p12)
}
  0x71   : > { %2284 = dma.hbm_to_vmem [thread:$0]  (!%p3075_p1), %s656_s13, 128, %s659_s9, %s3079_s22  }
  0x72   : > { %s2560_s0 = scalar_lea.vmem %s525_s28, 256  ;;  %p2568_p3 = scmp.lt.s32.totalorder %s525_s28, %s525_s28 }
  0x73   : > { %p2561_p11 = scmp.ne.s32.totalorder %s525_s28, %s2560_s0  ;;  %p2569_p9 = scmp.lt.s32.totalorder %s2560_s0, %s2560_s0 }
  0x75   : > { %p2563_p13 = pnand %p2561_p11, %p2992_p7  ;;  %p2570_p8 = por %p2569_p9, %p2568_p3 }
  0x77   : > { %p2564_p0 = pneg %p2563_p13 }
  0x79   : > { %p2571_p6 = pnand %p2570_p8, %p2564_p0 }
  0x7b   : > { %2574 = shalt.err (!%p2571_p6)
}
  0x7c   : > { %s2823_s4 = smov 64   ;;  %s2824_s16 = smov 4  }
  0x7d   : > { %p3447_p2 = scmp.ne.s32.totalorder %s3432_s27, 0  ;;  %s3448_s21 = sld [smem:[#allocation41_spill]] }
  0x7e   : > { %s2825_s18 = smov [#allocation14]   ;;  %s2826_s14 = smov [#allocation17]  }
  0x7f   : > { %s548_s25 = sshll.u32 %s2825_s18, 4  ;;  %s572_s6 = sshll.u32 %s2826_s14, 4  ;;  %s549_s25 = int_to_ptr.vmem [resolvable:$true] %s548_s25  ;;  %s573_s6 = int_to_ptr.vmem [resolvable:$true] %s572_s6 }
  0x80   : > { %s2586_s8 = scalar_lea.vmem %s549_s25, 256  ;;  %p2594_p11 = scmp.lt.s32.totalorder %s549_s25, %s549_s25 }
  0x81   : > { %p2587_p6 = scmp.ne.s32.totalorder %s549_s25, %s2586_s8  ;;  %p2595_p3 = scmp.lt.s32.totalorder %s2586_s8, %s2586_s8 }
  0x83   : > { %2259 = dma.hbm_to_vmem [thread:$0]  (!%p3447_p2), %s3448_s21, 256, %s525_s28, [#allocation9], %s2823_s4, %s2823_s4, %s2824_s16  }
  0x84   : > { %p2589_p8 = pnand %p2587_p6, %p2992_p7  ;;  %p2596_p4 = por %p2595_p3, %p2594_p11 }
  0x86   : > { %p2590_p9 = pneg %p2589_p8 }
  0x88   : > { %p2597_p5 = pnand %p2596_p4, %p2590_p9 }
  0x8a   : > { %2600 = shalt.err (!%p2597_p5)
}
  0x8b   : > { %2265 = dma.hbm_to_vmem [thread:$0]  (!%p3447_p2), %s3385_s5, 256, %s549_s25, [#allocation13], %s2823_s4, %s2823_s4, %s2824_s16  }
  0x8c   : > { %s2612_s0 = scalar_lea.vmem %s573_s6, 256  ;;  %p2620_p0 = scmp.lt.s32.totalorder %s573_s6, %s573_s6 }
  0x8d   : > { %p2613_p10 = scmp.ne.s32.totalorder %s573_s6, %s2612_s0  ;;  %p2621_p6 = scmp.lt.s32.totalorder %s2612_s0, %s2612_s0 }
  0x8f   : > { %p2615_p12 = pnand %p2613_p10, %p2992_p7  ;;  %p2622_p8 = por %p2621_p6, %p2620_p0 }
  0x91   : > { %p2616_p13 = pneg %p2615_p12 }
  0x93   : > { %p2623_p9 = pnand %p2622_p8, %p2616_p13 }
  0x95   : > { %2626 = shalt.err (!%p2623_p9)
}
  0x96   : > { %2271 = dma.hbm_to_vmem [thread:$0]  (!%p3447_p2), %s3387_s7, 256, %s573_s6, [#allocation16], %s2823_s4, %s2823_s4, %s2824_s16  }
  0x97   : > { %s2827_s21 = smov [#allocation20]   ;;  %s2828_s25 = smov [#allocation21]  }
  0x98   : > { %s614_s18 = sshll.u32 %s2827_s21, 4  ;;  %s630_s14 = sshll.u32 %s2828_s25, 4  ;;  %s615_s18 = int_to_ptr.vmem [resolvable:$true] %s614_s18  ;;  %s631_s14 = int_to_ptr.vmem [resolvable:$true] %s630_s14 }
  0x99   : > { %s2638_s8 = scalar_lea.vmem %s615_s18, 256  ;;  %p2646_p5 = scmp.lt.s32.totalorder %s615_s18, %s615_s18 }
  0x9a   : > { %p2639_p11 = scmp.ne.s32.totalorder %s615_s18, %s2638_s8  ;;  %p2647_p10 = scmp.lt.s32.totalorder %s2638_s8, %s2638_s8 }
  0x9c   : > { %p2641_p3 = pnand %p2639_p11, %p2992_p7  ;;  %p2648_p12 = por %p2647_p10, %p2646_p5 }
  0x9e   : > { %p2642_p4 = pneg %p2641_p3 }
  0xa0   : > { %p2649_p13 = pnand %p2648_p12, %p2642_p4 }
  0xa2   : > { %2652 = shalt.err (!%p2649_p13)
}
  0xa3   : > { %2277 = dma.hbm_to_vmem [thread:$0]  (!%p3447_p2), %s3395_s15, 256, %s615_s18, [#allocation19], %s2823_s4, %s2823_s4, %s2824_s16  }
  0xa4   : > { %s2664_s10 = scalar_lea.vmem %s631_s14, 256  ;;  %p2672_p9 = scmp.lt.s32.totalorder %s631_s14, %s631_s14 }
  0xa5   : > { %p2665_p0 = scmp.ne.s32.totalorder %s631_s14, %s2664_s10  ;;  %p2673_p11 = scmp.lt.s32.totalorder %s2664_s10, %s2664_s10 }
  0xa7   : > { %p2667_p6 = pnand %p2665_p0, %p2992_p7  ;;  %p2674_p3 = por %p2673_p11, %p2672_p9 }
  0xa9   : > { %p2668_p8 = pneg %p2667_p6 }
  0xab   : > { %p2675_p4 = pnand %p2674_p3, %p2668_p8 }
  0xad   : > { %2678 = shalt.err (!%p2675_p4)
}
  0xae   : > { %2280 = dma.hbm_to_vmem [thread:$0]  (!%p3447_p2), %s3397_s17, 256, %s631_s14, [#allocation22], %s2823_s4, %s2823_s4, %s2824_s16  }
  0xaf   : > { %s2017_s24 = sshll.u32 %s2811_s1, 4  ;;  %s3449_s18 = sld [smem:[#allocation40_spill]] }
  0xb0   : > { %s3450_s8 = sand.u32 1, %s2803_s20   ;;  %p3451_p5 = pneg %p3075_p1 }
  0xb1   : > { %s668_s6 = scalar_lea.vmem [#allocation10], %s3450_s8  ;;  %s2829_s10 = smov [#allocation10]  }
  0xb2   : > { %s675_s28 = sshll.u32 %s668_s6, 4  ;;  %s2697_s0 = sshll.u32 %s2829_s10, 4  ;;  %s676_s28 = int_to_ptr.vmem [resolvable:$true] %s675_s28  ;;  %s2698_s0 = int_to_ptr.vmem [resolvable:$false] %s2697_s0 }
  0xb3   : > { %s2692_s27 = scalar_lea.vmem %s676_s28, 16  ;;  %s2699_s9 = scalar_lea.vmem %s2698_s0, 32 }
  0xb4   : > { %p2693_p7 = scmp.ne.s32.totalorder %s676_s28, %s2692_s27  ;;  %p2700_p2 = scmp.lt.s32.totalorder %s676_s28, %s2698_s0 }
  0xb5   : > { %s673_s25 = scalar_lea.hbm %s3449_s18, %s2017_s24  ;;  %p2701_p13 = scmp.lt.s32.totalorder %s2699_s9, %s2692_s27 }
  0xb6   : > { %p2695_p10 = pnand %p2693_p7, %p3451_p5 }
  0xb7   : > { %p2702_p0 = por %p2701_p13, %p2700_p2 }
  0xb8   : > { %p2696_p12 = pneg %p2695_p10 }
  0xba   : > { %p2703_p6 = pnand %p2702_p0, %p2696_p12 }
  0xbc   : > { %2706 = shalt.err (!%p2703_p6)
}
  0xbd   : > { %2287 = dma.hbm_to_vmem [thread:$0]  (!%p3075_p1), %s673_s25, 16, %s676_s28, %s3079_s22  }
  0xbe   : > { %p3452_p8 = scmp.ne.s32.totalorder %s3431_s23, 0 }
  0xbf   : > { %s686_s4 = sand.u32 (!%p3452_p8), 1, %s2970_s2   ;;  %s3155_s16 = sand.u32 (!%p3452_p8), 1, %s2799_s30  }
  0xc0   : > { %684 = sbr.rel (%p3452_p8) target bundleno = 2684 (0xa7c), region = 96  ;;  %s2019_s14 = sshll.u32 (!%p3452_p8), %s3155_s16, 3 }
  0xc1   : > { %s687_s24 = scalar_lea.sflag (!%p3452_p8), [#allocation6], %s686_s4  ;;  %s690_s13 = scalar_lea.vmem (!%p3452_p8), [#allocation5], %s2019_s14 }
  0xc2   : > { %p3453_p9 = scmp.ne.s32.totalorder (!%p3452_p8), %s3441_s26, 0 }
  0xc5   : > { %2758 = dma.done.wait (%p3453_p9), %s687_s24, 128  }
  0xc6   : > { %2760 = vsyncadd (%p3453_p9), %s687_s24, 4294967168  ;;  %p3454_p1 = scmp.eq.s32.totalorder %s2970_s2, 0 }
  0xc8   : > { %2762 = dma.done.wait (%p3454_p1), [#allocation9], 64   ;;  %p3455_p11 = pmov %p3454_p1 }
  0xc9   : > { %s702_s22 = scalar_lea.vmem [#allocation10], %s3155_s16 }
  0xca   : > { %2764 = vsyncadd (%p3455_p11), [#allocation9], 4294967232 }
  0xcb   : > { %2766 = dma.done.wait (%p3453_p9), %s687_s24, 16  }
  0xcc   : > { %2768 = vsyncadd (%p3453_p9), %s687_s24, 4294967280  ;;  %p3456_p3 = pmov %p3454_p1 }
  0xcd   : > { %p3457_p4 = pmov %p3454_p1 }
  0xce   : > { %2770 = dma.done.wait (%p3456_p3), [#allocation9], 256  }
  0xcf   : > { %2772 = vsyncadd (%p3457_p4), [#allocation9], 4294967040  ;;  %p3458_p7 = pmov %p3454_p1 }
  0xd0   : > { %p3459_p5 = pmov %p3454_p1 }
  0xd1   : > { %2774 = dma.done.wait (%p3458_p7), [#allocation13], 272  }
  0xd2   : > { %2776 = vsyncadd (%p3459_p5), [#allocation13], 4294967024  ;;  %p3460_p10 = pmov %p3454_p1 }
  0xd3   : > { %p3461_p12 = pmov %p3454_p1 }
  0xd4   : > { %2778 = dma.done.wait (%p3460_p10), [#allocation16], 272  }
  0xd5   : > { %2780 = vsyncadd (%p3461_p12), [#allocation16], 4294967024  ;;  %p3462_p2 = pmov %p3454_p1 }
  0xd6   : > { %p3463_p13 = pmov %p3454_p1 }
  0xd7   : > { %2782 = dma.done.wait (%p3462_p2), [#allocation19], 272  }
  0xd8   : > { %2784 = vsyncadd (%p3463_p13), [#allocation19], 4294967024  ;;  %p3464_p0 = pmov %p3454_p1 }
  0xda   : > { %2786 = dma.done.wait (%p3464_p0), [#allocation22], 256   ;;  %p3465_p6 = pmov %p3464_p0 }
  0xdb   : > { %vm805_vm0 = vcmask 261120   ;;  %v3193_v0 = vld [vmem:[%s690_s13] sm:$0xff]  ;;  %v2379_v12 = vld [vmem:[#allocation14 + $0x8] sm:$0xff]   ;;  %v2830_v14 = vmov 0.0   ;;  %vm2831_vm1 = vmmov 0   ;;  %vm965_vm2 = vcmask 257024  }
  0xdc   : > { %2788 = vsyncadd (%p3465_p6), [#allocation22], 4294967040  ;;  %v806_v1 = vsel %vm805_vm0, %v3193_v0, 0.0  ;;  %v2380_v13 = vld [vmem:[#allocation17 + $0x8] sm:$0xff]   ;;  %2115 = vmatprep.subr.bf16.mxu0 %v2830_v14  ;;  %2123 = vmatprep.subr.bf16.mxu1 %v2830_v14  ;;  %v2382_v16 = vld [vmem:[#allocation17] sm:$0xff]   ;;  %vm1085_vm3 = vcmask 64512  }
  0xdd   : > { %807 = vadd.xlane.f32.xlu0 %v806_v1  ;;  %2116 = vmatpush3.bf16.msra.mxu0 %v2379_v12  ;;  %v2381_v15 = vld [vmem:[#allocation14] sm:$0xff]   ;;  %v2030_v24 = vld [vmem:[%s3391_s11] ss:$0 sm:$0xff]  ;;  %v2383_v31 = vld [vmem:[#allocation11 + $0x8] sm:$0xff]   ;;  %vm1147_vm4 = vcmask 1043456   ;;  %s2832_s21 = smov 120  }
  0xde   : > { %2124 = vmatpush3.bf16.msra.mxu1 %v2380_v13  ;;  %2117 = vmatprep.subr.bf16.mxu0 %v2830_v14  ;;  %v2031_v26 = vld [vmem:[%s3392_s12] ss:$0 sm:$0xff]  ;;  %v2384_v34 = vld [vmem:[#allocation11] sm:$0xff]   ;;  %v2036_v38 = vld [vmem:[#allocation18] ss:$0 sm:$0xff]  ;;  %s2833_s18 = smov 104  }
  0xdf   : > { %2125 = vmatprep.subr.bf16.mxu1 %v2830_v14  ;;  %2119 = vmatprep.mubr.msk.bf16.mxu0 %vm2831_vm1, %v2830_v14  ;;  %v2032_v37 = vld [vmem:[#allocation15] ss:$0 sm:$0xff]  ;;  %v2042_v51 = vld [vmem:[#allocation12] ss:$0 sm:$0xff]  ;;  %s2834_s25 = smov 112   ;;  %vm1192_vm6 = vcmask 60416  }
  0xe0   : > { %2127 = vmatprep.mubr.msk.bf16.mxu1 %vm2831_vm1, %v2830_v14  ;;  %s2835_s8 = smov 8   ;;  %s2836_s6 = smov 16   ;;  %vm1318_vm7 = vcmask 126016   ;;  %vm1437_vm8 = vcmask 191616   ;;  %vm1556_vm9 = vcmask 257216  }
  0xe1   : > { %976 = vadd.xlane.f32.xlu0 %v806_v1  ;;  %2118 = vmatpush3.bf16.msra.mxu0 %v2381_v15  ;;  %s3466_s10 = sld [smem:[#allocation45_spill]]  ;;  %s2837_s4 = smov 24  }
  0xe2   : > { %2126 = vmatpush3.bf16.msra.mxu1 %v2382_v16  ;;  %2131 = vmatprep.subr.bf16.mxu0 %v2830_v14  ;;  %s3468_s26 = sld [smem:[#allocation47_spill]]  ;;  %s792_s24 = scalar_lea.vmem [#allocation23], %s2019_s14 }
  0xe3   : > { %2139 = vmatprep.subr.bf16.mxu1 %v2830_v14  ;;  %s3471_s28 = sld [smem:[#allocation34_spill]]  ;;  %s1816_s13 = sshll.u32 %s792_s24, 4  ;;  %s3333_s13 = int_to_ptr.vmem [resolvable:$true] %s1816_s13 }
  0xe4   : > { %s3472_s9 = sld [smem:[#allocation50_spill]]  ;;  %s1802_s29 = scalar_lea.sflag [#allocation7], %s3155_s16 }
  0xe5   : > { %s3473_s23 = sld [smem:[#allocation51_spill]]  ;;  %s2707_s14 = scalar_lea.vmem %s3333_s13, 128 }
  0xe6   : > { %p2708_p8 = scmp.ne.s32.totalorder %s3333_s13, %s2707_s14  ;;  %p3474_p9 = scmp.ne.s32.totalorder %s3442_s3, 0 }
  0xe8   : > { %p2709_p1 = pnand %p2708_p8, %p3474_p9 }
  0xea   : > { %p2710_p11 = pneg %p2709_p1 }
 0x166   : > { %v808_v2 = vpop.xlane.xlu0 %807 }
 0x167   : > { %v810_v3 = vmul.f32 0.03125, %v808_v2 }
 0x169   : > { %v811_v4 = vsub.f32 %v3193_v0, %v810_v3 }
 0x16a   : > { %v977_v5 = vpop.xlane.xlu0 %976 }
 0x16b   : > { %v979_v6 = vmul.f32 0.03125, %v977_v5  ;;  %v812_v7 = vmul.f32 %v811_v4, %v811_v4 }
 0x16d   : > { %v980_v8 = vsub.f32 %v3193_v0, %v979_v6  ;;  %v813_v9 = vsel %vm805_vm0, %v812_v7, 0.0 }
 0x16e   : > { %814 = vadd.xlane.f32.xlu1 %v813_v9 }
 0x16f   : > { %v981_v10 = vmul.f32 %v980_v8, %v980_v8 }
 0x171   : > { %v982_v11 = vsel %vm805_vm0, %v981_v10, 0.0  ;;  %v1082_v10 = vld [vmem:[#allocation8] sm:$0xf] }
 0x172   : > { %983 = vadd.xlane.f32.xlu1 %v982_v11  ;;  %v2046_v11 = vld [vmem:[%s702_s22] ss:$0 sm:$0xff]  ;;  %v1083_v12 = vunpack.c.l.bf16 %v1082_v10  ;;  %s3467_s22 = sld [smem:[#allocation46_spill]] }
 0x173   : > { %vm1081_vm5 = vcmp.gt.f32.partialorder %v2046_v11, 0.5 }
 0x174   : > { %v1084_v13 = vsel %vm1081_vm5, -4.2949673e+09, %v1083_v12 }
 0x1f7   : > { %v815_v17 = vpop.xlane.xlu1 %814 }
 0x1f8   : > { %v816_v18 = vmul.f32 0.03125, %v815_v17 }
 0x1fa   : > { %v817_v19 = vadd.f32 1e-05, %v816_v18 }
 0x1fb   : > { %v984_v20 = vpop.xlane.xlu1 %983 }
 0x1fc   : > { %2393 = vrsqrt.f32 %v817_v19  ;;  %v985_v21 = vmul.f32 0.03125, %v984_v20 }
 0x1fe   : > { %v986_v22 = vadd.f32 1e-05, %v985_v21 }
 0x200   : > { %2395 = vrsqrt.f32 %v986_v22 }
 0x209   : > { %v2394_v23 = vpop.eup %2393 }
 0x20a   : > { %v819_v25 = vmul.f32 %v2394_v23, %v811_v4 }
 0x20c   : > { %v826_v27 = vmul.f32 %v2030_v24, %v819_v25 }
 0x20d   : > { %v2396_v28 = vpop.eup %2395 }
 0x20e   : > { %v988_v29 = vmul.f32 %v2396_v28, %v980_v8  ;;  %v833_v30 = vadd.f32 %v2031_v26, %v826_v27 }
 0x210   : > { %v834_v32 = vpack.c.bf16 %v833_v30, %v833_v30  ;;  %v995_v33 = vmul.f32 %v2030_v24, %v988_v29 }
 0x212   : > { %2120 = vmatmul.mubr.msk.bf16.vlgmr.msra.gmra.mxu0 %vm805_vm0, %v834_v32  ;;  %2128 = vmatmul.mubr.msk.bf16.vlgmr.msra.gmra.mxu1 %vm805_vm0, %v834_v32  ;;  %v1002_v35 = vadd.f32 %v2031_v26, %v995_v33 }
 0x213   : > { %2132 = vmatpush3.bf16.msra.mxu0 %v2383_v31  ;;  %2135 = vmatprep.mubr.msk.bf16.mxu0 %vm2831_vm1, %v2830_v14 }
 0x214   : > { %2133 = vmatprep.subr.bf16.mxu0 %v2830_v14  ;;  %2141 = vmatprep.mubr.msk.bf16.mxu1 %vm2831_vm1, %v2830_v14  ;;  %v1003_v36 = vpack.c.bf16 %v1002_v35, %v1002_v35 }
 0x217   : > { %2134 = vmatpush3.bf16.msra.mxu0 %v2384_v34 }
 0x218   : > { %2145 = vmatprep.subr.bf16.mxu0 %v2830_v14 }
 0x21a   : > { %2136 = vmatmul.mubr.msk.bf16.vlgmr.msra.gmra.mxu0 %vm805_vm0, %v1003_v36 }
 0x21b   : > { %2147 = vmatprep.mubr.msk.bf16.mxu0 %vm2831_vm1, %v2830_v14 }
 0x2d2   : > { %v895_v39 = vpop.f32.mrf.mxu0  ;;  %v958_v40 = vpop.f32.mrf.mxu1 }
 0x2d3   : > { %v896_v41 = vadd.f32 %v2032_v37, %v895_v39  ;;  %v959_v42 = vadd.f32 %v2036_v38, %v958_v40 }
 0x2d4   : > { %v2121_v43 = vpop.f32.mrf.mxu0  ;;  %v2129_v44 = vpop.f32.mrf.mxu1 }
 0x2d5   : > { %v964_v45 = vpack.c.bf16 %v896_v41, %v896_v41  ;;  %v967_v46 = vpack.c.bf16 %v959_v42, %v959_v42 }
 0x2d6   : > { %v898_v47 = vpop.f32.mrf.mxu0  ;;  %v961_v48 = vpop.f32.mrf.mxu1 }
 0x2d7   : > { %966 = vst.msk [vmem:[#allocation2] sm:$0xf] %vm965_vm2, %v964_v45  ;;  %968 = vst.msk [vmem:[#allocation3] sm:$0xf] %vm965_vm2, %v967_v46 }
 0x2d8   : > { %v2122_v49 = vpop.f32.mrf.mxu0  ;;  %v2130_v50 = vpop.f32.mrf.mxu1 }
 0x2da   : > { %v1064_v52 = vpop.f32.mrf.mxu0 }
 0x2db   : > { %v1065_v53 = vadd.f32 %v2042_v51, %v1064_v52 }
 0x2dc   : > { %v2137_v54 = vpop.f32.mrf.mxu0 }
 0x2dd   : > { %v1070_v55 = vmul.f32 0.35355338, %v1065_v53 }
 0x2de   : > { %v1067_v56 = vpop.f32.mrf.mxu0  ;;  %v1072_v57 = vld [vmem:[#allocation2] sm:$0xf]  ;;  %v3228_v58 = vld [vmem:[#allocation3] sm:$0xf] }
 0x2df   : > { %v1071_v59 = vpack.c.bf16 %v1070_v55, %v1070_v55  ;;  %v1090_v60 = vsel %vm1085_vm3, %v1072_v57, 0  ;;  %v1149_v61 = vsel %vm1147_vm4, %v3228_v58, 0  ;;  %v2049_v62 = vcombine.low %v1072_v57, %v1072_v57 }
 0x2e0   : > { %v2138_v63 = vpop.f32.mrf.mxu0  ;;  %2140 = vmatpush3.bf16.xpose.msra.mxu1 %v1090_v60  ;;  %2146 = vmatpush3.bf16.msra.mxu0 %v1149_v61  ;;  %v2051_v54 = vcombine.low %v3228_v58, %v3228_v58 }
 0x2e1   : > { %1200 = vrot.lane.b32.xlu0 %v2049_v62, %s2832_s21  ;;  %1195 = vrot.lane.b32.xlu1 %v1071_v59, %s2832_s21 }
 0x2e2   : > { %2151 = vmatprep.subr.bf16.mxu1 %v2830_v14  ;;  %2157 = vmatprep.subr.bf16.mxu0 %v2830_v14 }
 0x2e5   : > { %1441 = vrot.lane.b32.xlu0 %v2049_v62, %s2833_s18  ;;  %1322 = vrot.lane.b32.xlu1 %v2049_v62, %s2834_s25 }
 0x2e7   : > { %2142 = vmatmul.mubr.msk.bf16.vlgmr.msra.gmra.mxu1 %vm1085_vm3, %v1071_v59 }
 0x2e8   : > { %2153 = vmatprep.mubr.msk.bf16.mxu1 %vm2831_vm1, %v2830_v14 }
 0x2e9   : > { %1320 = vrot.lane.b32.xlu1 %v1071_v59, %s2834_s25 }
 0x2ed   : > { %1439 = vrot.lane.b32.xlu1 %v1071_v59, %s2833_s18 }
 0x353   : > { %v1196_v1 = vpop.permute.xlu1 %1195  ;;  %v1201_v2 = vpop.permute.xlu0 %1200 }
 0x354   : > { %v1206_v3 = vsel %vm1085_vm3, %v1201_v2, 0 }
 0x355   : > { %2152 = vmatpush3.bf16.xpose.msra.mxu1 %v1206_v3 }
 0x356   : > { %2163 = vmatprep.subr.bf16.mxu1 %v2830_v14 }
 0x357   : > { %v1323_v4 = vpop.permute.xlu1 %1322  ;;  %v1442_v6 = vpop.permute.xlu0 %1441 }
 0x358   : > { %v1328_v5 = vsel %vm1085_vm3, %v1323_v4, 0  ;;  %v1447_v8 = vsel %vm1085_vm3, %v1442_v6, 0 }
 0x35b   : > { %v1321_v7 = vpop.permute.xlu1 %1320 }
 0x35c   : > { %2154 = vmatmul.mubr.msk.bf16.vlgmr.msra.gmra.mxu1 %vm1085_vm3, %v1196_v1 }
 0x35d   : > { %2164 = vmatpush3.bf16.xpose.msra.mxu1 %v1328_v5  ;;  %2165 = vmatprep.mubr.msk.bf16.mxu1 %vm2831_vm1, %v2830_v14 }
 0x35e   : > { %2175 = vmatprep.subr.bf16.mxu1 %v2830_v14 }
 0x35f   : > { %v1440_v9 = vpop.permute.xlu1 %1439 }
 0x364   : > { %2166 = vmatmul.mubr.msk.bf16.vlgmr.msra.gmra.mxu1 %vm1085_vm3, %v1321_v7 }
 0x365   : > { %2176 = vmatpush3.bf16.xpose.msra.mxu1 %v1447_v8  ;;  %2177 = vmatprep.mubr.msk.bf16.mxu1 %vm2831_vm1, %v2830_v14 }
 0x366   : > { %2187 = vmatprep.subr.bf16.mxu1 %v2830_v14 }
 0x36c   : > { %2178 = vmatmul.mubr.msk.bf16.vlgmr.msra.gmra.mxu1 %vm1085_vm3, %v1440_v9 }
 0x36d   : > { %2191 = vmatprep.mubr.msk.bf16.mxu1 %vm2831_vm1, %v2830_v14 }
 0x3a7   : > { %v1126_v15 = vpop.f32.mrf.mxu1 }
 0x3a8   : > { %v1127_v16 = vadd.f32 %v1126_v15, %v1084_v13 }
 0x3a9   : > { %v2143_v17 = vpop.f32.mrf.mxu1 }
 0x3aa   : > { %v1132_v18 = vsel %vm1085_vm3, %v1127_v16, -inf }
 0x3ab   : > { %1133 = vmax.xlane.f32.xlu0 %v1132_v18  ;;  %v1129_v19 = vpop.f32.mrf.mxu1 }
 0x3ad   : > { %v2144_v20 = vpop.f32.mrf.mxu1 }
 0x41c   : > { %v1242_v21 = vpop.f32.mrf.mxu1 }
 0x41d   : > { %v1243_v22 = vadd.f32 %v1242_v21, %v1084_v13 }
 0x41e   : > { %v2155_v23 = vpop.f32.mrf.mxu1 }
 0x41f   : > { %v1248_v24 = vsel %vm1085_vm3, %v1243_v22, -inf }
 0x420   : > { %1249 = vmax.xlane.f32.xlu1 %v1248_v24  ;;  %v1245_v25 = vpop.f32.mrf.mxu1 }
 0x422   : > { %v2156_v26 = vpop.f32.mrf.mxu1 }
 0x424   : > { %v1364_v27 = vpop.f32.mrf.mxu1 }
 0x425   : > { %v1365_v28 = vadd.f32 %v1364_v27, %v1084_v13 }
 0x426   : > { %v2167_v29 = vpop.f32.mrf.mxu1 }
 0x427   : > { %v1370_v30 = vsel %vm1085_vm3, %v1365_v28, -inf }
 0x428   : > { %1371 = vmax.xlane.f32.xlu0 %v1370_v30  ;;  %v1367_v31 = vpop.f32.mrf.mxu1 }
 0x42a   : > { %v2168_v32 = vpop.f32.mrf.mxu1 }
 0x42c   : > { %v1483_v33 = vpop.f32.mrf.mxu1 }
 0x42d   : > { %v1484_v34 = vadd.f32 %v1483_v33, %v1084_v13 }
 0x42e   : > { %v2179_v35 = vpop.f32.mrf.mxu1 }
 0x42f   : > { %v1489_v36 = vsel %vm1085_vm3, %v1484_v34, -inf  ;;  %v2387_v35 = vld [vmem:[%s3466_s10 + $0x8] sm:$0xff]  }
 0x430   : > { %1490 = vmax.xlane.f32.xlu0 %v1489_v36  ;;  %v1486_v37 = vpop.f32.mrf.mxu1  ;;  %2188 = vmatpush3.bf16.msra.mxu1 %v2387_v35  ;;  %v2388_v36 = vld [vmem:[%s3466_s10] sm:$0xff]  }
 0x431   : > { %2189 = vmatprep.subr.bf16.mxu1 %v2830_v14 }
 0x432   : > { %v2180_v38 = vpop.f32.mrf.mxu1 }
 0x434   : > { %v1134_v39 = vpop.xlane.xlu0 %1133  ;;  %2190 = vmatpush3.bf16.msra.mxu1 %v2388_v36 }
 0x435   : > { %v1135_v40 = vsub.f32 %v1127_v16, %v1134_v39  ;;  %2203 = vmatprep.subr.bf16.mxu1 %v2830_v14 }
 0x437   : > { %v1136_v41 = vmul.f32 1.442695, %v1135_v40 }
 0x439   : > { %2397 = vpow2.f32 %v1136_v41 }
 0x446   : > { %v2398_v42 = vpop.eup %2397 }
 0x447   : > { %v1138_v43 = vsel %vm1085_vm3, %v2398_v42, 0.0 }
 0x448   : > { %1139 = vadd.xlane.f32.xlu0 %v1138_v43 }
 0x4a9   : > { %v1250_v44 = vpop.xlane.xlu1 %1249 }
 0x4aa   : > { %v1251_v45 = vsub.f32 %v1243_v22, %v1250_v44 }
 0x4ac   : > { %v1252_v46 = vmul.f32 1.442695, %v1251_v45 }
 0x4ae   : > { %2399 = vpow2.f32 %v1252_v46 }
 0x4b1   : > { %v1372_v47 = vpop.xlane.xlu0 %1371 }
 0x4b2   : > { %v1373_v48 = vsub.f32 %v1365_v28, %v1372_v47  ;;  %v2063_v47 = vld [vmem:[%s3467_s22] ss:$0 sm:$0xff] }
 0x4b4   : > { %v1374_v49 = vmul.f32 1.442695, %v1373_v48 }
 0x4b6   : > { %2401 = vpow2.f32 %v1374_v49 }
 0x4b9   : > { %v1491_v55 = vpop.xlane.xlu0 %1490 }
 0x4ba   : > { %v1492_v57 = vsub.f32 %v1484_v34, %v1491_v55 }
 0x4bb   : > { %v2400_v50 = vpop.eup %2399 }
 0x4bc   : > { %v1254_v51 = vsel %vm1085_vm3, %v2400_v50, 0.0  ;;  %v1493_v59 = vmul.f32 1.442695, %v1492_v57 }
 0x4bd   : > { %1255 = vadd.xlane.f32.xlu1 %v1254_v51 }
 0x4c3   : > { %v2402_v52 = vpop.eup %2401 }
 0x4c4   : > { %v1376_v53 = vsel %vm1085_vm3, %v2402_v52, 0.0 }
 0x4c5   : > { %1377 = vadd.xlane.f32.xlu0 %v1376_v53 }
 0x4ce   : > { %1382 = vrot.lane.b32.xlu1 %v2051_v54, %s2834_s25 }
 0x4d1   : > { %v1140_v56 = vpop.xlane.xlu0 %1139 }
 0x4d2   : > { %2403 = vrcp.f32 %v1140_v56 }
 0x4d3   : > { %2405 = vpow2.f32 %v1493_v59 }
 0x4db   : > { %1263 = vrot.lane.b32.xlu0 %v2051_v54, %s2832_s21  ;;  %s2838_s21 = smov [#allocation23]  }
 0x4df   : > { %v2404_v60 = vpop.eup %2403 }
 0x4e0   : > { %v1142_v61 = vmul.f32 %v2404_v60, %v2398_v42  ;;  %v2406_v63 = vpop.eup %2405  ;;  %v2389_v60 = vld [vmem:[#allocation20 + $0x8] sm:$0xff]  }
 0x4e1   : > { %v1495_v58 = vsel %vm1085_vm3, %v2406_v63, 0.0 }
 0x4e2   : > { %v1143_v62 = vpack.c.bf16 %v1142_v61, %v1142_v61  ;;  %v2390_v61 = vld [vmem:[#allocation20] sm:$0xff]  }
 0x4e4   : > { %2148 = vmatmul.mubr.msk.bf16.vlgmr.msra.gmra.mxu0 %vm1085_vm3, %v1143_v62 }
 0x4e5   : > { %2159 = vmatprep.mubr.msk.bf16.mxu0 %vm2831_vm1, %v2830_v14 }
 0x4f2   : > { %1496 = vadd.xlane.f32.xlu1 %v1495_v58 }
 0x503   : > { %1501 = vrot.lane.b32.xlu1 %v2051_v54, %s2833_s18  ;;  %s3469_s18 = sld [smem:[#allocation48_spill]] }
 0x546   : > { %v1256_v1 = vpop.xlane.xlu1 %1255 }
 0x547   : > { %2407 = vrcp.f32 %v1256_v1  ;;  %v2064_v1 = vld [vmem:[%s3468_s26] ss:$0 sm:$0xff] }
 0x54a   : > { %v1383_v7 = vpop.permute.xlu1 %1382 }
 0x54b   : > { %v1388_v9 = vsel %vm1147_vm4, %v1383_v7, 0  ;;  %v2391_v7 = vld [vmem:[#allocation21 + $0x8] sm:$0xff]  }
 0x54e   : > { %v1378_v2 = vpop.xlane.xlu0 %1377 }
 0x54f   : > { %2409 = vrcp.f32 %v1378_v2 }
 0x552   : > { %v1264_v3 = vpop.permute.xlu0 %1263 }
 0x553   : > { %v1269_v4 = vsel %vm1147_vm4, %v1264_v3, 0  ;;  %v2065_v3 = vld [vmem:[%s3469_s18] ss:$0 sm:$0xff]  ;;  %s2711_s18 = sshll.u32 %s2838_s21, 4  ;;  %s2712_s18 = int_to_ptr.vmem [resolvable:$false] %s2711_s18 }
 0x554   : > { %v2408_v5 = vpop.eup %2407  ;;  %2158 = vmatpush3.bf16.msra.mxu0 %v1269_v4  ;;  %s2713_s25 = scalar_lea.vmem %s2712_s18, 256  ;;  %p2714_p3 = scmp.lt.s32.totalorder %s3333_s13, %s2712_s18 }
 0x555   : > { %2169 = vmatprep.subr.bf16.mxu0 %v2830_v14  ;;  %v1258_v6 = vmul.f32 %v2408_v5, %v2400_v50  ;;  %p2715_p4 = scmp.lt.s32.totalorder %s2713_s25, %s2707_s14 }
 0x557   : > { %v1259_v8 = vpack.c.bf16 %v1258_v6, %v1258_v6  ;;  %p2716_p7 = por %p2715_p4, %p2714_p3 }
 0x559   : > { %2160 = vmatmul.mubr.msk.bf16.vlgmr.msra.gmra.mxu0 %vm1085_vm3, %v1259_v8  ;;  %v2392_v8 = vld [vmem:[#allocation21] sm:$0xff]   ;;  %p2717_p5 = pnand %p2716_p7, %p2710_p11 }
 0x55a   : > { %2170 = vmatpush3.bf16.msra.mxu0 %v1388_v9  ;;  %2171 = vmatprep.mubr.msk.bf16.mxu0 %vm2831_vm1, %v2830_v14 }
 0x55b   : > { %2181 = vmatprep.subr.bf16.mxu0 %v2830_v14 }
 0x55c   : > { %v2410_v10 = vpop.eup %2409 }
 0x55d   : > { %v1380_v11 = vmul.f32 %v2410_v10, %v2402_v52 }
 0x55f   : > { %v1381_v12 = vpack.c.bf16 %v1380_v11, %v1380_v11 }
 0x561   : > { %2172 = vmatmul.mubr.msk.bf16.vlgmr.msra.gmra.mxu0 %vm1085_vm3, %v1381_v12 }
 0x562   : > { %2183 = vmatprep.mubr.msk.bf16.mxu0 %vm2831_vm1, %v2830_v14 }
 0x57b   : > { %v1497_v13 = vpop.xlane.xlu1 %1496 }
 0x57c   : > { %2411 = vrcp.f32 %v1497_v13 }
 0x57f   : > { %v1502_v15 = vpop.permute.xlu1 %1501 }
 0x580   : > { %v1507_v16 = vsel %vm1147_vm4, %v1502_v15, 0 }
 0x581   : > { %2182 = vmatpush3.bf16.msra.mxu0 %v1507_v16 }
 0x582   : > { %2195 = vmatprep.subr.bf16.mxu0 %v2830_v14 }
 0x589   : > { %v2412_v17 = vpop.eup %2411 }
 0x58a   : > { %v1499_v18 = vmul.f32 %v2412_v17, %v2406_v63 }
 0x58c   : > { %v1500_v19 = vpack.c.bf16 %v1499_v18, %v1499_v18 }
 0x58e   : > { %2184 = vmatmul.mubr.msk.bf16.vlgmr.msra.gmra.mxu0 %vm1085_vm3, %v1500_v19 }
 0x58f   : > { %2199 = vmatprep.mubr.msk.bf16.mxu0 %vm2831_vm1, %v2830_v14  ;;  %2196 = vmatpush3.bf16.msra.mxu0 %v2389_v60 }
 0x590   : > { %2197 = vmatprep.subr.bf16.mxu0 %v2830_v14 }
 0x593   : > { %2198 = vmatpush3.bf16.msra.mxu0 %v2390_v61 }
 0x5a4   : > { %v1185_v20 = vpop.f32.mrf.mxu0 }
 0x5a5   : > { %v1191_v21 = vpack.c.bf16 %v1185_v20, %v1185_v20 }
 0x5a6   : > { %v2149_v22 = vpop.f32.mrf.mxu0 }
 0x5a7   : > { %1193 = vst.msk [vmem:[#allocation4] sm:$0xf] %vm1192_vm6, %v1191_v21 }
 0x5a8   : > { %v1188_v23 = vpop.f32.mrf.mxu0 }
 0x5aa   : > { %v2150_v24 = vpop.f32.mrf.mxu0 }
 0x619   : > { %v1305_v25 = vpop.f32.mrf.mxu0 }
 0x61a   : > { %v2078_v26 = vpack.c.bf16 %v1305_v25, %v1305_v25  ;;  %v2070_v25 = vld [vmem:[%s3472_s9] ss:$0 sm:$0xff] }
 0x61b   : > { %v2161_v27 = vpop.f32.mrf.mxu0 }
 0x61c   : > { %1315 = vrot.lane.b32.xlu1 %v2078_v26, %s2835_s8 }
 0x61d   : > { %v1308_v28 = vpop.f32.mrf.mxu0 }
 0x61f   : > { %v2162_v29 = vpop.f32.mrf.mxu0 }
 0x621   : > { %v1424_v30 = vpop.f32.mrf.mxu0 }
 0x622   : > { %v2079_v31 = vpack.c.bf16 %v1424_v30, %v1424_v30 }
 0x623   : > { %v2173_v32 = vpop.f32.mrf.mxu0 }
 0x624   : > { %1434 = vrot.lane.b32.xlu0 %v2079_v31, %s2836_s6  ;;  %s3470_s6 = sld [smem:[#allocation49_spill]] }
 0x625   : > { %v1427_v33 = vpop.f32.mrf.mxu0 }
 0x627   : > { %v2174_v34 = vpop.f32.mrf.mxu0 }
 0x62a   : > { %v2066_v9 = vld [vmem:[%s3470_s6] ss:$0 sm:$0xff] }
 0x64e   : > { %v1543_v37 = vpop.f32.mrf.mxu0 }
 0x64f   : > { %v2080_v38 = vpack.c.bf16 %v1543_v37, %v1543_v37 }
 0x650   : > { %v2185_v39 = vpop.f32.mrf.mxu0 }
 0x651   : > { %1553 = vrot.lane.b32.xlu1 %v2080_v38, %s2837_s4  ;;  %s2075_s4 = sshll.u32 %s3471_s28, 7 }
 0x652   : > { %v1546_v40 = vpop.f32.mrf.mxu0  ;;  %s3331_s26 = scalar_lea.hbm %s3473_s23, %s2075_s4 }
 0x654   : > { %v2186_v41 = vpop.f32.mrf.mxu0 }
 0x68e   : > { %v1316_v42 = vpop.permute.xlu1 %1315 }
 0x68f   : > { %1319 = vst.msk [vmem:[#allocation4] sm:$0xf] %vm1318_vm7, %v1316_v42 }
 0x696   : > { %v1435_v43 = vpop.permute.xlu0 %1434 }
 0x697   : > { %1438 = vst.msk [vmem:[#allocation4] sm:$0xf] %vm1437_vm8, %v1435_v43 }
 0x6c3   : > { %v1554_v44 = vpop.permute.xlu1 %1553 }
 0x6c4   : > { %1557 = vst.msk [vmem:[#allocation4] sm:$0xf] %vm1556_vm9, %v1554_v44 }
 0x6cb   : > { %v1558_v45 = vld [vmem:[#allocation4] sm:$0xf] }
 0x6cc   : > { %2192 = vmatmul.mubr.msk.bf16.vlgmr.msra.gmra.mxu1 %vm805_vm0, %v1558_v45 }
 0x6cd   : > { %2207 = vmatprep.mubr.msk.bf16.mxu1 %vm2831_vm1, %v2830_v14  ;;  %2204 = vmatpush3.bf16.msra.mxu1 %v2391_v7 }
 0x6ce   : > { %2205 = vmatprep.subr.bf16.mxu1 %v2830_v14 }
 0x6d1   : > { %2206 = vmatpush3.bf16.msra.mxu1 %v2392_v8 }
 0x78c   : > { %v1612_v46 = vpop.f32.mrf.mxu1 }
 0x78d   : > { %v1618_v48 = vadd.f32 %v1612_v46, %v3193_v0 }
 0x78e   : > { %v2193_v49 = vpop.f32.mrf.mxu1 }
 0x78f   : > { %v1626_v50 = vadd.f32 %v2063_v47, %v1618_v48 }
 0x790   : > { %v1615_v51 = vpop.f32.mrf.mxu1 }
 0x791   : > { %v1629_v52 = vsel %vm805_vm0, %v1626_v50, 0.0 }
 0x792   : > { %1630 = vadd.xlane.f32.xlu0 %v1629_v52  ;;  %v2194_v53 = vpop.f32.mrf.mxu1 }
 0x81b   : > { %v1631_v54 = vpop.xlane.xlu0 %1630 }
 0x81c   : > { %v1632_v55 = vmul.f32 0.03125, %v1631_v54 }
 0x81e   : > { %v1633_v56 = vsub.f32 %v1626_v50, %v1632_v55 }
 0x820   : > { %v1634_v57 = vmul.f32 %v1633_v56, %v1633_v56 }
 0x822   : > { %v1635_v59 = vsel %vm805_vm0, %v1634_v57, 0.0 }
 0x823   : > { %1636 = vadd.xlane.f32.xlu1 %v1635_v59 }
 0x8ac   : > { %v1637_v0 = vpop.xlane.xlu1 %1636 }
 0x8ad   : > { %v1638_v62 = vmul.f32 0.03125, %v1637_v0 }
 0x8af   : > { %v1639_v63 = vadd.f32 1e-05, %v1638_v62 }
 0x8b1   : > { %2413 = vrsqrt.f32 %v1639_v63 }
 0x8be   : > { %v2414_v58 = vpop.eup %2413 }
 0x8bf   : > { %v1641_v2 = vmul.f32 %v2414_v58, %v1633_v56 }
 0x8c1   : > { %v1648_v4 = vmul.f32 %v2064_v1, %v1641_v2 }
 0x8c3   : > { %v1655_v5 = vadd.f32 %v2065_v3, %v1648_v4 }
 0x8c5   : > { %v1656_v6 = vpack.c.bf16 %v1655_v5, %v1655_v5 }
 0x8c7   : > { %2200 = vmatmul.mubr.msk.bf16.vlgmr.msra.gmra.mxu0 %vm805_vm0, %v1656_v6 }
 0x987   : > { %v1717_v10 = vpop.f32.mrf.mxu0 }
 0x988   : > { %v1718_v11 = vadd.f32 %v2066_v9, %v1717_v10 }
 0x989   : > { %v2201_v12 = vpop.f32.mrf.mxu0 }
 0x98a   : > { %v1723_v13 = vpack.c.bf16 %v1718_v11, %v1718_v11 }
 0x98b   : > { %v1720_v15 = vpop.f32.mrf.mxu0 }
 0x98c   : > { %v1725_v16 = vmul.bf16 1027030327, %v1723_v13  ;;  %v1724_v22 = vmul.bf16 1056980736, %v1723_v13 }
 0x98d   : > { %v2202_v17 = vpop.f32.mrf.mxu0 }
 0x98e   : > { %v1726_v18 = vmul.bf16 %v1725_v16, %v1723_v13 }
 0x990   : > { %v1727_v19 = vmul.bf16 %v1726_v18, %v1723_v13 }
 0x992   : > { %v1728_v20 = vadd.bf16 %v1727_v19, %v1723_v13 }
 0x994   : > { %v1729_v21 = vmul.bf16 1061961548, %v1728_v20 }
 0x996   : > { %2415 = vtanh.bf16 %v1729_v21 }
 0x9a4   : > { %v2416_v14 = vpop.eup %2415 }
 0x9a5   : > { %v1731_v23 = vadd.bf16 1065369472, %v2416_v14 }
 0x9a7   : > { %v1732_v24 = vmul.bf16 %v1731_v23, %v1724_v22 }
 0x9a9   : > { %2208 = vmatmul.mubr.msk.bf16.vlgmr.msra.gmra.mxu1 %vm805_vm0, %v1732_v24 }
 0xa69   : > { %v1793_v26 = vpop.f32.mrf.mxu1 }
 0xa6a   : > { %v1794_v27 = vadd.f32 %v2070_v25, %v1793_v26 }
 0xa6b   : > { %v2209_v28 = vpop.f32.mrf.mxu1 }
 0xa6c   : > { %v1799_v29 = vadd.f32 %v1794_v27, %v1626_v50 }
 0xa6d   : > { %v1796_v30 = vpop.f32.mrf.mxu1 }
 0xa6e   : > { %1800 = vst.msk [vmem:[%s792_s24] sm:$0xff] %vm805_vm0, %v1799_v29 }
 0xa6f   : > { %v2210_v31 = vpop.f32.mrf.mxu1 }
 0xa70   : > { %2720 = shalt.err (!%p2717_p5)
}
 0xa71   : > { %s2721_s8 = scalar_lea.hbm %s3331_s26, 128  ;;  %s2725_s28 = scalar_lea.hbm %s3473_s23, 256 }
 0xa72   : > { %p2722_p10 = scmp.ne.s32.totalorder %s3331_s26, %s2721_s8  ;;  %p2726_p13 = scmp.lt.s32.totalorder %s3331_s26, %s3473_s23 }
 0xa73   : > { %p2727_p0 = scmp.lt.s32.totalorder %s2725_s28, %s2721_s8 }
 0xa74   : > { %p2723_p12 = pnand %p2722_p10, %p3474_p9 }
 0xa75   : > { %p2728_p6 = por %p2727_p0, %p2726_p13 }
 0xa76   : > { %p2724_p2 = pneg %p2723_p12 }
 0xa78   : > { %p2729_p8 = pnand %p2728_p6, %p2724_p2 }
 0xa7a   : > { %2732 = shalt.err (!%p2729_p8)
}
 0xa7b   : > { %2251 = dma.vmem_to_hbm [thread:$0]  (%p3474_p9), %s3333_s13, 128, %s3331_s26, %s1802_s29  }
 0xa7c PF: > { %s3475_s9 = sld [smem:[#allocation33_spill]]  ;;  %p3477_p1 = scmp.ne.s32.totalorder %s3444_s19, 0 }
 0xa7d   : > { %s3476_s4 = sld [smem:[#allocation35_spill]] }
 0xa82   : > { %s1828_s24 = sand.u32 1, %s3475_s9  }
 0xa83   : > { %p3478_p11 = scmp.ge.s32.totalorder %s3476_s4, 2  ;;  %s1829_s22 = scalar_lea.sflag [#allocation7], %s1828_s24 }
 0xa85   : > { %p2289_p3 = pnand %p3478_p11, %p3477_p1 }
 0xa87   : > { %p2290_p4 = pneg %p2289_p3 }
 0xa89   : > { %2790 = dma.done.wait (%p2290_p4), %s1829_s22, 128  }
 0xa8a   : > { %2792 = vsyncadd (%p2290_p4), %s1829_s22, 4294967168  ;;  %s40_s22 = sadd.s32 1, %s3476_s4   ;;  %s3479_s3 = sld [smem:[#allocation37_spill]] }
 0xa8b   : > { %p37_p7 = scmp.ge.s32.totalorder %s40_s22, 4   ;;  %s3480_s13 = sld [smem:[#allocation36_spill]] }
 0xa8c   : > { %s3481_s0 = smov %s2799_s30  ;;  %s3482_s30 = smov %s2803_s20 }
 0xa8d   : > { %s3484_s21 = smov %s2811_s1  ;;  %39 = sbr.rel (!%p37_p7) target bundleno = 26 (0x1a), region = 194 }
 0xa90   : > { %s3483_s20 = smov %s3479_s3 }
 0xa91   : > { %s3485_s1 = smov %s3480_s13 }
 0xa92   :  { %1834 = vsyncpa [#allocation6], 1 }
 0xa93   :  { %1836 = vsyncpa [#allocation6 + $0x1], 1 }
 0xa94   :  { %1837 = vsyncpa [#allocation9], 1 }
 0xa95   :  { %1838 = vsyncpa [#allocation13], 1 }
 0xa96   :  { %1839 = vsyncpa [#allocation16], 1 }
 0xa97   :  { %1840 = vsyncpa [#allocation19], 1 }
 0xa98   :  { %1841 = vsyncpa [#allocation22], 1 }
 0xa99   :  { %1842 = vsyncpa [#allocation7], 1 }
 0xa9a   :  { %1844 = vsyncpa [#allocation7 + $0x1], 1 }

// kernel: tpu_custom_call.1
= control target key start
LH: loop header
LB: loop body
LE: loop exit
PB: predicated region body
PF: predicated region fallthrough
CT: control target
= control target key end

     0   :  { %s3380_s0 = inlined_call_operand.hbm [shape: f32[2,8,32], index: 0, kind: input, shape index: {}]   ;;  %s3381_s1 = inlined_call_operand.hbm [shape: bf16[8,8], index: 1, kind: input, shape index: {}]   ;;  %s3382_s2 = inlined_call_operand.hbm [shape: f32[2,1,8], index: 2, kind: input, shape index: {}]   ;;  %s3383_s3 = inlined_call_operand.hbm [shape: bf16[32,32], index: 3, kind: input, shape index: {}]   ;;  %s3384_s4 = inlined_call_operand.hbm [shape: f32[1,32], index: 4, kind: input, shape index: {}]   ;;  %s3385_s5 = inlined_call_operand.hbm [shape: bf16[32,32], index: 5, kind: input, shape index: {}]   ;;  %s3386_s6 = inlined_call_operand.hbm [shape: f32[1,32], index: 6, kind: input, shape index: {}]   ;;  %s3387_s7 = inlined_call_operand.hbm [shape: bf16[32,32], index: 7, kind: input, shape index: {}]   ;;  %s3388_s8 = inlined_call_operand.hbm [shape: f32[1,32], index: 8, kind: input, shape index: {}]   ;;  %s3389_s9 = inlined_call_operand.vmem [shape: bf16[32,32], index: 9, kind: input, shape index: {}]   ;;  %s3390_s10 = inlined_call_operand.vmem [shape: f32[1,32], index: 10, kind: input, shape index: {}]   ;;  %s3391_s11 = inlined_call_operand.vmem [shape: f32[1,32], index: 11, kind: input, shape index: {}]   ;;  %s3392_s12 = inlined_call_operand.vmem [shape: f32[1,32], index: 12, kind: input, shape index: {}]   ;;  %s3393_s13 = inlined_call_operand.vmem [shape: f32[1,32], index: 13, kind: input, shape index: {}]   ;;  %s3394_s14 = inlined_call_operand.vmem [shape: f32[1,32], index: 14, kind: input, shape index: {}]   ;;  %s3395_s15 = inlined_call_operand.hbm [shape: bf16[32,32], index: 15, kind: input, shape index: {}]   ;;  %s3396_s16 = inlined_call_operand.vmem [shape: f32[1,32], index: 16, kind: input, shape index: {}]   ;;  %s3397_s17 = inlined_call_operand.hbm [shape: bf16[32,32], index: 17, kind: input, shape index: {}]   ;;  %s3398_s18 = inlined_call_operand.vmem [shape: f32[1,32], index: 18, kind: input, shape index: {}]   ;;  %s3399_s19 = inlined_call_operand.hbm [shape: f32[2,8,32], index: 19, kind: output, shape index: {}]  }
   0x1   :  { %3414 = sst [smem:[#allocation38_spill]] %s3380_s0 }
   0x2   :  { %3415 = sst [smem:[#allocation39_spill]] %s3381_s1 }
   0x3   :  { %3416 = sst [smem:[#allocation40_spill]] %s3382_s2 }
   0x4   :  { %3417 = sst [smem:[#allocation41_spill]] %s3383_s3 }
   0x5   :  { %3418 = sst [smem:[#allocation42_spill]] %s3384_s4 }
   0x6   :  { %3419 = sst [smem:[#allocation43_spill]] %s3386_s6 }
   0x7   :  { %3420 = sst [smem:[#allocation44_spill]] %s3388_s8 }
   0x8   :  { %3421 = sst [smem:[#allocation45_spill]] %s3389_s9 }
   0x9   :  { %3422 = sst [smem:[#allocation46_spill]] %s3390_s10 }
   0xa   :  { %3423 = sst [smem:[#allocation47_spill]] %s3393_s13 }
   0xb   :  { %3424 = sst [smem:[#allocation48_spill]] %s3394_s14 }
   0xc   :  { %3425 = sst [smem:[#allocation49_spill]] %s3396_s16 }
   0xd   :  { %3426 = sst [smem:[#allocation50_spill]] %s3398_s18 }
   0xe   :  { %3427 = sst [smem:[#allocation51_spill]] %s3399_s19 }
   0xf   :  { %24 = vsyncpa [#allocation6], 0 }
  0x10   :  { %26 = vsyncpa [#allocation6 + $0x1], 0 }
  0x11   :  { %27 = vsyncpa [#allocation9], 0 }
  0x12   :  { %28 = vsyncpa [#allocation13], 0 }
  0x13   :  { %29 = vsyncpa [#allocation16], 0 }
  0x14   :  { %30 = vsyncpa [#allocation19], 0 }
  0x15   :  { %31 = vsyncpa [#allocation22], 0 }
  0x16   :  { %32 = vsyncpa [#allocation7], 0 }
  0x17   :  { %34 = vsyncpa [#allocation7 + $0x1], 0  ;;  %s2939_s0 = smov 0   ;;  %s2941_s30 = smov 0  }
  0x18   :  { %s2943_s20 = smov 0   ;;  %s2945_s21 = smov 0  }
  0x19   :  { %s2947_s1 = smov 0   ;;  %s2949_s22 = smov 0  }
  0x1a LB: > { %3428 = sst [smem:[#allocation33_spill]] %s2795_s0  ;;  %s2970_s2 = sadd.s32 4294967295, %s2815_s22   ;;  %s2815_s22 = sphi %s2949_s22, %s40_s22   ;;  %s2811_s1 = sphi %s2947_s1, %s3485_s1   ;;  %s2807_s21 = sphi %s2945_s21, %s3484_s21   ;;  %s2803_s20 = sphi %s2943_s20, %s3483_s20   ;;  %s2799_s30 = sphi %s2941_s30, %s3482_s30   ;;  %s2795_s0 = sphi %s2939_s0, %s3481_s0  }
  0x1b   : > { %3429 = sst [smem:[#allocation34_spill]] %s2807_s21  ;;  %p2004_p0 = scmp.ge.s32.totalorder %s2815_s22, 1 }
  0x1c   : > { %3430 = sst [smem:[#allocation35_spill]] %s2815_s22  ;;  %p3401_p1 = scmp.eq.s32.totalorder %s2970_s2, 0 }
  0x1d   : > { %p499_p2 = scmp.lt.s32.totalorder %s2815_s22, 3  ;;  %s2817_s24 = smov [#allocation8]  }
  0x1e   : > { %s514_s25 = sshll.u32 %s2817_s24, 4  ;;  %s2818_s3 = smov [#allocation12]   ;;  %s515_s25 = int_to_ptr.vmem [resolvable:$true] %s514_s25 }
  0x1f   : > { %p2975_p3 = pnand %p2004_p0, %p499_p2  ;;  %s538_s26 = sshll.u32 %s2818_s3, 4  ;;  %s539_s26 = int_to_ptr.vmem [resolvable:$true] %s538_s26 }
  0x20   : > { %s2819_s28 = smov [#allocation15]   ;;  %s2428_s19 = scalar_lea.vmem %s515_s25, 64 }
  0x21   : > { %s3431_s23 = scalar_select %p2975_p3, 1, 0 }
  0x22   : > { %p2253_p5 = pneg %p2975_p3  ;;  %s562_s29 = sshll.u32 %s2819_s28, 4  ;;  %s2988_s29 = int_to_ptr.vmem [resolvable:$true] %s562_s29 }
  0x23   : > { %p2429_p8 = scmp.ne.s32.totalorder %s515_s25, %s2428_s19  ;;  %p2436_p11 = scmp.lt.s32.totalorder %s515_s25, %s515_s25 }
  0x24   : > { %p2984_p6 = pnand %p2253_p5, %p3401_p1  ;;  %p2437_p12 = scmp.lt.s32.totalorder %s2428_s19, %s2428_s19 }
  0x26   : > { %s3432_s27 = scalar_select %p2984_p6, 1, 0 }
  0x27   : > { %p2992_p7 = pneg %p2984_p6  ;;  %p2438_p13 = por %p2437_p12, %p2436_p11 }
  0x29   : > { %p2431_p9 = pnand %p2429_p8, %p2992_p7 }
  0x2b   : > { %p2432_p10 = pneg %p2431_p9 }
  0x2d   : > { %p2439_p0 = pnand %p2438_p13, %p2432_p10 }
  0x2f   : > { %2442 = shalt.err (!%p2439_p0)
}
  0x30   : > { %s3434_s18 = sld [smem:[#allocation39_spill]]  ;;  %s2454_s21 = scalar_lea.vmem %s539_s26, 16 }
  0x31   : > { %p2455_p2 = scmp.ne.s32.totalorder %s539_s26, %s2454_s21  ;;  %s2461_s16 = scalar_lea.vmem %s539_s26, 32 }
  0x32   : > { %p2462_p8 = scmp.lt.s32.totalorder %s539_s26, %s539_s26  ;;  %p2463_p9 = scmp.lt.s32.totalorder %s2461_s16, %s2454_s21 }
  0x33   : > { %p2457_p5 = pnand %p2455_p2, %p2992_p7 }
  0x34   : > { %p2464_p1 = por %p2463_p9, %p2462_p8 }
  0x35   : > { %p2458_p4 = pneg %p2457_p5 }
  0x36   : > { %2256 = dma.hbm_to_vmem [thread:$0]  (!%p2984_p6), %s3434_s18, 64, %s515_s25, [#allocation9]  }
  0x37   : > { %p2465_p3 = pnand %p2464_p1, %p2458_p4 }
  0x39   : > { %2468 = shalt.err (!%p2465_p3)
}
  0x3a   : > { %s3435_s4 = sld [smem:[#allocation42_spill]]  ;;  %s2480_s18 = scalar_lea.vmem %s2988_s29, 16 }
  0x3b   : > { %p2481_p10 = scmp.ne.s32.totalorder %s2988_s29, %s2480_s18  ;;  %s2487_s16 = scalar_lea.vmem %s2988_s29, 32 }
  0x3c   : > { %p2488_p1 = scmp.lt.s32.totalorder %s2988_s29, %s2988_s29  ;;  %p2489_p3 = scmp.lt.s32.totalorder %s2487_s16, %s2480_s18 }
  0x3d   : > { %p2483_p11 = pnand %p2481_p10, %p2992_p7 }
  0x3e   : > { %p2490_p4 = por %p2489_p3, %p2488_p1 }
  0x3f   : > { %p2484_p12 = pneg %p2483_p11 }
  0x40   : > { %2262 = dma.hbm_to_vmem [thread:$0]  (!%p2984_p6), %s3435_s4, 16, %s539_s26, [#allocation13]  }
  0x41   : > { %p2491_p13 = pnand %p2490_p4, %p2484_p12 }
  0x43   : > { %2494 = shalt.err (!%p2491_p13)
}
  0x44   : > { %s3436_s6 = sld [smem:[#allocation43_spill]]  ;;  %s2820_s25 = smov [#allocation18]  }
  0x45   : > { %s586_s26 = sshll.u32 %s2820_s25, 4  ;;  %s587_s26 = int_to_ptr.vmem [resolvable:$true] %s586_s26 }
  0x46   : > { %s2506_s3 = scalar_lea.vmem %s587_s26, 16  ;;  %s2513_s28 = scalar_lea.vmem %s587_s26, 32 }
  0x47   : > { %p2507_p0 = scmp.ne.s32.totalorder %s587_s26, %s2506_s3  ;;  %p2514_p8 = scmp.lt.s32.totalorder %s587_s26, %s587_s26 }
  0x48   : > { %p2515_p9 = scmp.lt.s32.totalorder %s2513_s28, %s2506_s3 }
  0x49   : > { %p2509_p2 = pnand %p2507_p0, %p2992_p7 }
  0x4a   : > { %2268 = dma.hbm_to_vmem [thread:$0]  (!%p2984_p6), %s3436_s6, 16, %s2988_s29, [#allocation16]  }
  0x4b   : > { %p2510_p5 = pneg %p2509_p2  ;;  %p2516_p10 = por %p2515_p9, %p2514_p8 }
  0x4d   : > { %p2517_p11 = pnand %p2516_p10, %p2510_p5 }
  0x4f   : > { %2520 = shalt.err (!%p2517_p11)
}
  0x50   : > { %s3437_s8 = sld [smem:[#allocation44_spill]]  ;;  %s2003_s29 = sadd.s32 4294967294, %s2815_s22  }
  0x51   : > { %s52_s16 = sadd.s32 1, %s2811_s1  ;;  %s59_s14 = sadd.s32 1, %s2803_s20 }
  0x52   : > { %p54_p12 = scmp.ge.s32.totalorder %s52_s16, 2  ;;  %p66_p1 = scmp.ne.s32.totalorder %s2803_s20, %s2799_s30 }
  0x53   : > { %p67_p3 = scmp.eq.s32.totalorder %s2815_s22, 0  ;;  %p72_p13 = scmp.ne.s32.totalorder %s2799_s30, %s2795_s0 }
  0x54   : > { %s3487_s16 = smov (%p54_p12, %s52_s16), 0  ;;  %p486_p0 = scmp.eq.s32.totalorder %s2970_s2, 1 }
  0x55   : > { %3438 = sst [smem:[#allocation36_spill]] %s3487_s16  ;;  %p3038_p4 = por %p67_p3, %p66_p1 }
  0x56   : > { %2274 = dma.hbm_to_vmem [thread:$0]  (!%p2984_p6), %s3437_s8, 16, %s587_s26, [#allocation19]  }
  0x57   : > { %s56_s25 = ssub.s32 %s2811_s1, %s3487_s16  ;;  %p3440_p5 = scmp.eq.s32.totalorder %s2970_s2, 0 }
  0x58   : > { %p57_p2 = scmp.eq.s32.totalorder %s56_s25, 0  ;;  %p3053_p9 = por %p486_p0, %p66_p1 }
  0x59   : > { %p3049_p8 = por %p3440_p5, %p72_p13  ;;  %p492_p10 = scmp.eq.s32.totalorder %s2003_s29, 1 }
  0x5a   : > { %s3442_s3 = scalar_select %p3053_p9, 1, 0 }
  0x5b   : > { %s3441_s26 = scalar_select %p3049_p8, 1, 0 }
  0x5c   : > { %s3058_s28 = scalar_select %p57_p2, %s2803_s20, %s59_s14  }
  0x5d   : > { %p3060_p11 = por %p492_p10, %p72_p13  ;;  %p2301_p12 = scmp.lt.s32.totalorder %s2815_s22, 2 }
  0x5e   : > { %3443 = sst [smem:[#allocation37_spill]] %s3058_s28  ;;  %s647_s18 = sand.u32 1, %s2815_s22  }
  0x5f   : > { %s3444_s19 = scalar_select %p3060_p11, 1, 0 }
  0x60   : > { %s3408_s4 = sand.u32 1, %s2803_s20   ;;  %s2016_s6 = sshll.u32 %s2811_s1, 7 }
  0x61   : > { %s2015_s25 = sshll.u32 %s3408_s4, 3  ;;  %s3445_s0 = sld [smem:[#allocation38_spill]] }
  0x62   : > { %s651_s10 = scalar_lea.vmem [#allocation5], %s2015_s25  ;;  %p3075_p1 = pnand %p2301_p12, %p3038_p4 }
  0x63   : > { %s658_s9 = sshll.u32 %s651_s10, 4  ;;  %s2821_s14 = smov [#allocation11]   ;;  %s659_s9 = int_to_ptr.vmem [resolvable:$true] %s658_s9 }
  0x64   : > { %s524_s28 = sshll.u32 %s2821_s14, 4  ;;  %s3079_s22 = scalar_lea.sflag [#allocation6], %s647_s18  ;;  %s525_s28 = int_to_ptr.vmem [resolvable:$true] %s524_s28 }
  0x65   : > { %p3409_p3 = pneg %p3075_p1  ;;  %s2534_s4 = scalar_lea.vmem %s659_s9, 128 }
  0x66   : > { %p2535_p13 = scmp.ne.s32.totalorder %s659_s9, %s2534_s4 }
  0x67   : > { %s656_s13 = scalar_lea.hbm %s3445_s0, %s2016_s6  ;;  %s2822_s6 = smov [#allocation5]  }
  0x68   : > { %p2537_p0 = pnand %p2535_p13, %p3409_p3  ;;  %s2539_s8 = sshll.u32 %s2822_s6, 4  ;;  %s2540_s8 = int_to_ptr.vmem [resolvable:$false] %s2539_s8 }
  0x69   : > { %s2541_s10 = scalar_lea.vmem %s2540_s8, 256  ;;  %p2542_p4 = scmp.lt.s32.totalorder %s659_s9, %s2540_s8 }
  0x6a   : > { %p2538_p2 = pneg %p2537_p0  ;;  %p2543_p5 = scmp.lt.s32.totalorder %s2541_s10, %s2534_s4 }
  0x6c   : > { %p2544_p10 = por %p2543_p5, %p2542_p4 }
  0x6e   : > { %p2545_p12 = pnand %p2544_p10, %p2538_p2 }
  0x70   : > { %2548 = shalt.err (!%p2545_p12)
}
  0x71   : > { %2284 = dma.hbm_to_vmem [thread:$0]  (!%p3075_p1), %s656_s13, 128, %s659_s9, %s3079_s22  }
  0x72   : > { %s2560_s0 = scalar_lea.vmem %s525_s28, 256  ;;  %p2568_p3 = scmp.lt.s32.totalorder %s525_s28, %s525_s28 }
  0x73   : > { %p2561_p11 = scmp.ne.s32.totalorder %s525_s28, %s2560_s0  ;;  %p2569_p9 = scmp.lt.s32.totalorder %s2560_s0, %s2560_s0 }
  0x75   : > { %p2563_p13 = pnand %p2561_p11, %p2992_p7  ;;  %p2570_p8 = por %p2569_p9, %p2568_p3 }
  0x77   : > { %p2564_p0 = pneg %p2563_p13 }
  0x79   : > { %p2571_p6 = pnand %p2570_p8, %p2564_p0 }
  0x7b   : > { %2574 = shalt.err (!%p2571_p6)
}
  0x7c   : > { %s2823_s4 = smov 64   ;;  %s2824_s16 = smov 4  }
  0x7d   : > { %p3447_p2 = scmp.ne.s32.totalorder %s3432_s27, 0  ;;  %s3448_s21 = sld [smem:[#allocation41_spill]] }
  0x7e   : > { %s2825_s18 = smov [#allocation14]   ;;  %s2826_s14 = smov [#allocation17]  }
  0x7f   : > { %s548_s25 = sshll.u32 %s2825_s18, 4  ;;  %s572_s6 = sshll.u32 %s2826_s14, 4  ;;  %s549_s25 = int_to_ptr.vmem [resolvable:$true] %s548_s25  ;;  %s573_s6 = int_to_ptr.vmem [resolvable:$true] %s572_s6 }
  0x80   : > { %s2586_s8 = scalar_lea.vmem %s549_s25, 256  ;;  %p2594_p11 = scmp.lt.s32.totalorder %s549_s25, %s549_s25 }
  0x81   : > { %p2587_p6 = scmp.ne.s32.totalorder %s549_s25, %s2586_s8  ;;  %p2595_p3 = scmp.lt.s32.totalorder %s2586_s8, %s2586_s8 }
  0x83   : > { %2259 = dma.hbm_to_vmem [thread:$0]  (!%p3447_p2), %s3448_s21, 256, %s525_s28, [#allocation9], %s2823_s4, %s2823_s4, %s2824_s16  }
  0x84   : > { %p2589_p8 = pnand %p2587_p6, %p2992_p7  ;;  %p2596_p4 = por %p2595_p3, %p2594_p11 }
  0x86   : > { %p2590_p9 = pneg %p2589_p8 }
  0x88   : > { %p2597_p5 = pnand %p2596_p4, %p2590_p9 }
  0x8a   : > { %2600 = shalt.err (!%p2597_p5)
}
  0x8b   : > { %2265 = dma.hbm_to_vmem [thread:$0]  (!%p3447_p2), %s3385_s5, 256, %s549_s25, [#allocation13], %s2823_s4, %s2823_s4, %s2824_s16  }
  0x8c   : > { %s2612_s0 = scalar_lea.vmem %s573_s6, 256  ;;  %p2620_p0 = scmp.lt.s32.totalorder %s573_s6, %s573_s6 }
  0x8d   : > { %p2613_p10 = scmp.ne.s32.totalorder %s573_s6, %s2612_s0  ;;  %p2621_p6 = scmp.lt.s32.totalorder %s2612_s0, %s2612_s0 }
  0x8f   : > { %p2615_p12 = pnand %p2613_p10, %p2992_p7  ;;  %p2622_p8 = por %p2621_p6, %p2620_p0 }
  0x91   : > { %p2616_p13 = pneg %p2615_p12 }
  0x93   : > { %p2623_p9 = pnand %p2622_p8, %p2616_p13 }
  0x95   : > { %2626 = shalt.err (!%p2623_p9)
}
  0x96   : > { %2271 = dma.hbm_to_vmem [thread:$0]  (!%p3447_p2), %s3387_s7, 256, %s573_s6, [#allocation16], %s2823_s4, %s2823_s4, %s2824_s16  }
  0x97   : > { %s2827_s21 = smov [#allocation20]   ;;  %s2828_s25 = smov [#allocation21]  }
  0x98   : > { %s614_s18 = sshll.u32 %s2827_s21, 4  ;;  %s630_s14 = sshll.u32 %s2828_s25, 4  ;;  %s615_s18 = int_to_ptr.vmem [resolvable:$true] %s614_s18  ;;  %s631_s14 = int_to_ptr.vmem [resolvable:$true] %s630_s14 }
  0x99   : > { %s2638_s8 = scalar_lea.vmem %s615_s18, 256  ;;  %p2646_p5 = scmp.lt.s32.totalorder %s615_s18, %s615_s18 }
  0x9a   : > { %p2639_p11 = scmp.ne.s32.totalorder %s615_s18, %s2638_s8  ;;  %p2647_p10 = scmp.lt.s32.totalorder %s2638_s8, %s2638_s8 }
  0x9c   : > { %p2641_p3 = pnand %p2639_p11, %p2992_p7  ;;  %p2648_p12 = por %p2647_p10, %p2646_p5 }
  0x9e   : > { %p2642_p4 = pneg %p2641_p3 }
  0xa0   : > { %p2649_p13 = pnand %p2648_p12, %p2642_p4 }
  0xa2   : > { %2652 = shalt.err (!%p2649_p13)
}
  0xa3   : > { %2277 = dma.hbm_to_vmem [thread:$0]  (!%p3447_p2), %s3395_s15, 256, %s615_s18, [#allocation19], %s2823_s4, %s2823_s4, %s2824_s16  }
  0xa4   : > { %s2664_s10 = scalar_lea.vmem %s631_s14, 256  ;;  %p2672_p9 = scmp.lt.s32.totalorder %s631_s14, %s631_s14 }
  0xa5   : > { %p2665_p0 = scmp.ne.s32.totalorder %s631_s14, %s2664_s10  ;;  %p2673_p11 = scmp.lt.s32.totalorder %s2664_s10, %s2664_s10 }
  0xa7   : > { %p2667_p6 = pnand %p2665_p0, %p2992_p7  ;;  %p2674_p3 = por %p2673_p11, %p2672_p9 }
  0xa9   : > { %p2668_p8 = pneg %p2667_p6 }
  0xab   : > { %p2675_p4 = pnand %p2674_p3, %p2668_p8 }
  0xad   : > { %2678 = shalt.err (!%p2675_p4)
}
  0xae   : > { %2280 = dma.hbm_to_vmem [thread:$0]  (!%p3447_p2), %s3397_s17, 256, %s631_s14, [#allocation22], %s2823_s4, %s2823_s4, %s2824_s16  }
  0xaf   : > { %s2017_s24 = sshll.u32 %s2811_s1, 4  ;;  %s3449_s18 = sld [smem:[#allocation40_spill]] }
  0xb0   : > { %s3450_s8 = sand.u32 1, %s2803_s20   ;;  %p3451_p5 = pneg %p3075_p1 }
  0xb1   : > { %s668_s6 = scalar_lea.vmem [#allocation10], %s3450_s8  ;;  %s2829_s10 = smov [#allocation10]  }
  0xb2   : > { %s675_s28 = sshll.u32 %s668_s6, 4  ;;  %s2697_s0 = sshll.u32 %s2829_s10, 4  ;;  %s676_s28 = int_to_ptr.vmem [resolvable:$true] %s675_s28  ;;  %s2698_s0 = int_to_ptr.vmem [resolvable:$false] %s2697_s0 }
  0xb3   : > { %s2692_s27 = scalar_lea.vmem %s676_s28, 16  ;;  %s2699_s9 = scalar_lea.vmem %s2698_s0, 32 }
  0xb4   : > { %p2693_p7 = scmp.ne.s32.totalorder %s676_s28, %s2692_s27  ;;  %p2700_p2 = scmp.lt.s32.totalorder %s676_s28, %s2698_s0 }
  0xb5   : > { %s673_s25 = scalar_lea.hbm %s3449_s18, %s2017_s24  ;;  %p2701_p13 = scmp.lt.s32.totalorder %s2699_s9, %s2692_s27 }
  0xb6   : > { %p2695_p10 = pnand %p2693_p7, %p3451_p5 }
  0xb7   : > { %p2702_p0 = por %p2701_p13, %p2700_p2 }
  0xb8   : > { %p2696_p12 = pneg %p2695_p10 }
  0xba   : > { %p2703_p6 = pnand %p2702_p0, %p2696_p12 }
  0xbc   : > { %2706 = shalt.err (!%p2703_p6)
}
  0xbd   : > { %2287 = dma.hbm_to_vmem [thread:$0]  (!%p3075_p1), %s673_s25, 16, %s676_s28, %s3079_s22  }
  0xbe   : > { %p3452_p8 = scmp.ne.s32.totalorder %s3431_s23, 0 }
  0xbf   : > { %s686_s4 = sand.u32 (!%p3452_p8), 1, %s2970_s2   ;;  %s3155_s16 = sand.u32 (!%p3452_p8), 1, %s2799_s30  }
  0xc0   : > { %684 = sbr.rel (%p3452_p8) target bundleno = 2684 (0xa7c), region = 96  ;;  %s2019_s14 = sshll.u32 (!%p3452_p8), %s3155_s16, 3 }
  0xc1   : > { %s687_s24 = scalar_lea.sflag (!%p3452_p8), [#allocation6], %s686_s4  ;;  %s690_s13 = scalar_lea.vmem (!%p3452_p8), [#allocation5], %s2019_s14 }
  0xc2   : > { %p3453_p9 = scmp.ne.s32.totalorder (!%p3452_p8), %s3441_s26, 0 }
  0xc5   : > { %2758 = dma.done.wait (%p3453_p9), %s687_s24, 128  }
  0xc6   : > { %2760 = vsyncadd (%p3453_p9), %s687_s24, 4294967168  ;;  %p3454_p1 = scmp.eq.s32.totalorder %s2970_s2, 0 }
  0xc8   : > { %2762 = dma.done.wait (%p3454_p1), [#allocation9], 64   ;;  %p3455_p11 = pmov %p3454_p1 }
  0xc9   : > { %s702_s22 = scalar_lea.vmem [#allocation10], %s3155_s16 }
  0xca   : > { %2764 = vsyncadd (%p3455_p11), [#allocation9], 4294967232 }
  0xcb   : > { %2766 = dma.done.wait (%p3453_p9), %s687_s24, 16  }
  0xcc   : > { %2768 = vsyncadd (%p3453_p9), %s687_s24, 4294967280  ;;  %p3456_p3 = pmov %p3454_p1 }
  0xcd   : > { %p3457_p4 = pmov %p3454_p1 }
  0xce   : > { %2770 = dma.done.wait (%p3456_p3), [#allocation9], 256  }
  0xcf   : > { %2772 = vsyncadd (%p3457_p4), [#allocation9], 4294967040  ;;  %p3458_p7 = pmov %p3454_p1 }
  0xd0   : > { %p3459_p5 = pmov %p3454_p1 }
  0xd1   : > { %2774 = dma.done.wait (%p3458_p7), [#allocation13], 272  }
  0xd2   : > { %2776 = vsyncadd (%p3459_p5), [#allocation13], 4294967024  ;;  %p3460_p10 = pmov %p3454_p1 }
  0xd3   : > { %p3461_p12 = pmov %p3454_p1 }
  0xd4   : > { %2778 = dma.done.wait (%p3460_p10), [#allocation16], 272  }
  0xd5   : > { %2780 = vsyncadd (%p3461_p12), [#allocation16], 4294967024  ;;  %p3462_p2 = pmov %p3454_p1 }
  0xd6   : > { %p3463_p13 = pmov %p3454_p1 }
  0xd7   : > { %2782 = dma.done.wait (%p3462_p2), [#allocation19], 272  }
  0xd8   : > { %2784 = vsyncadd (%p3463_p13), [#allocation19], 4294967024  ;;  %p3464_p0 = pmov %p3454_p1 }
  0xda   : > { %2786 = dma.done.wait (%p3464_p0), [#allocation22], 256   ;;  %p3465_p6 = pmov %p3464_p0 }
  0xdb   : > { %vm805_vm0 = vcmask 261120   ;;  %v3193_v0 = vld [vmem:[%s690_s13] sm:$0xff]  ;;  %v2379_v12 = vld [vmem:[#allocation14 + $0x8] sm:$0xff]   ;;  %v2830_v14 = vmov 0.0   ;;  %vm2831_vm1 = vmmov 0   ;;  %vm965_vm2 = vcmask 257024  }
  0xdc   : > { %2788 = vsyncadd (%p3465_p6), [#allocation22], 4294967040  ;;  %v806_v1 = vsel %vm805_vm0, %v3193_v0, 0.0  ;;  %v2380_v13 = vld [vmem:[#allocation17 + $0x8] sm:$0xff]   ;;  %2115 = vmatprep.subr.bf16.mxu0 %v2830_v14  ;;  %2123 = vmatprep.subr.bf16.mxu1 %v2830_v14  ;;  %v2382_v16 = vld [vmem:[#allocation17] sm:$0xff]   ;;  %vm1085_vm3 = vcmask 64512  }
  0xdd   : > { %807 = vadd.xlane.f32.xlu0 %v806_v1  ;;  %2116 = vmatpush3.bf16.msra.mxu0 %v2379_v12  ;;  %v2381_v15 = vld [vmem:[#allocation14] sm:$0xff]   ;;  %v2030_v24 = vld [vmem:[%s3391_s11] ss:$0 sm:$0xff]  ;;  %v2383_v31 = vld [vmem:[#allocation11 + $0x8] sm:$0xff]   ;;  %vm1147_vm4 = vcmask 1043456   ;;  %s2832_s21 = smov 120  }
  0xde   : > { %2124 = vmatpush3.bf16.msra.mxu1 %v2380_v13  ;;  %2117 = vmatprep.subr.bf16.mxu0 %v2830_v14  ;;  %v2031_v26 = vld [vmem:[%s3392_s12] ss:$0 sm:$0xff]  ;;  %v2384_v34 = vld [vmem:[#allocation11] sm:$0xff]   ;;  %v2036_v38 = vld [vmem:[#allocation18] ss:$0 sm:$0xff]  ;;  %s2833_s18 = smov 104  }
  0xdf   : > { %2125 = vmatprep.subr.bf16.mxu1 %v2830_v14  ;;  %2119 = vmatprep.mubr.msk.bf16.mxu0 %vm2831_vm1, %v2830_v14  ;;  %v2032_v37 = vld [vmem:[#allocation15] ss:$0 sm:$0xff]  ;;  %v2042_v51 = vld [vmem:[#allocation12] ss:$0 sm:$0xff]  ;;  %s2834_s25 = smov 112   ;;  %vm1192_vm6 = vcmask 60416  }
  0xe0   : > { %2127 = vmatprep.mubr.msk.bf16.mxu1 %vm2831_vm1, %v2830_v14  ;;  %s2835_s8 = smov 8   ;;  %s2836_s6 = smov 16   ;;  %vm1318_vm7 = vcmask 126016   ;;  %vm1437_vm8 = vcmask 191616   ;;  %vm1556_vm9 = vcmask 257216  }
  0xe1   : > { %976 = vadd.xlane.f32.xlu0 %v806_v1  ;;  %2118 = vmatpush3.bf16.msra.mxu0 %v2381_v15  ;;  %s3466_s10 = sld [smem:[#allocation45_spill]]  ;;  %s2837_s4 = smov 24  }
  0xe2   : > { %2126 = vmatpush3.bf16.msra.mxu1 %v2382_v16  ;;  %2131 = vmatprep.subr.bf16.mxu0 %v2830_v14  ;;  %s3468_s26 = sld [smem:[#allocation47_spill]]  ;;  %s792_s24 = scalar_lea.vmem [#allocation23], %s2019_s14 }
  0xe3   : > { %2139 = vmatprep.subr.bf16.mxu1 %v2830_v14  ;;  %s3471_s28 = sld [smem:[#allocation34_spill]]  ;;  %s1816_s13 = sshll.u32 %s792_s24, 4  ;;  %s3333_s13 = int_to_ptr.vmem [resolvable:$true] %s1816_s13 }
  0xe4   : > { %s3472_s9 = sld [smem:[#allocation50_spill]]  ;;  %s1802_s29 = scalar_lea.sflag [#allocation7], %s3155_s16 }
  0xe5   : > { %s3473_s23 = sld [smem:[#allocation51_spill]]  ;;  %s2707_s14 = scalar_lea.vmem %s3333_s13, 128 }
  0xe6   : > { %p2708_p8 = scmp.ne.s32.totalorder %s3333_s13, %s2707_s14  ;;  %p3474_p9 = scmp.ne.s32.totalorder %s3442_s3, 0 }
  0xe8   : > { %p2709_p1 = pnand %p2708_p8, %p3474_p9 }
  0xea   : > { %p2710_p11 = pneg %p2709_p1 }
 0x166   : > { %v808_v2 = vpop.xlane.xlu0 %807 }
 0x167   : > { %v810_v3 = vmul.f32 0.03125, %v808_v2 }
 0x169   : > { %v811_v4 = vsub.f32 %v3193_v0, %v810_v3 }
 0x16a   : > { %v977_v5 = vpop.xlane.xlu0 %976 }
 0x16b   : > { %v979_v6 = vmul.f32 0.03125, %v977_v5  ;;  %v812_v7 = vmul.f32 %v811_v4, %v811_v4 }
 0x16d   : > { %v980_v8 = vsub.f32 %v3193_v0, %v979_v6  ;;  %v813_v9 = vsel %vm805_vm0, %v812_v7, 0.0 }
 0x16e   : > { %814 = vadd.xlane.f32.xlu1 %v813_v9 }
 0x16f   : > { %v981_v10 = vmul.f32 %v980_v8, %v980_v8 }
 0x171   : > { %v982_v11 = vsel %vm805_vm0, %v981_v10, 0.0  ;;  %v1082_v10 = vld [vmem:[#allocation8] sm:$0xf] }
 0x172   : > { %983 = vadd.xlane.f32.xlu1 %v982_v11  ;;  %v2046_v11 = vld [vmem:[%s702_s22] ss:$0 sm:$0xff]  ;;  %v1083_v12 = vunpack.c.l.bf16 %v1082_v10  ;;  %s3467_s22 = sld [smem:[#allocation46_spill]] }
 0x173   : > { %vm1081_vm5 = vcmp.gt.f32.partialorder %v2046_v11, 0.5 }
 0x174   : > { %v1084_v13 = vsel %vm1081_vm5, -4.2949673e+09, %v1083_v12 }
 0x1f7   : > { %v815_v17 = vpop.xlane.xlu1 %814 }
 0x1f8   : > { %v816_v18 = vmul.f32 0.03125, %v815_v17 }
 0x1fa   : > { %v817_v19 = vadd.f32 1e-05, %v816_v18 }
 0x1fb   : > { %v984_v20 = vpop.xlane.xlu1 %983 }
 0x1fc   : > { %2393 = vrsqrt.f32 %v817_v19  ;;  %v985_v21 = vmul.f32 0.03125, %v984_v20 }
 0x1fe   : > { %v986_v22 = vadd.f32 1e-05, %v985_v21 }
 0x200   : > { %2395 = vrsqrt.f32 %v986_v22 }
 0x209   : > { %v2394_v23 = vpop.eup %2393 }
 0x20a   : > { %v819_v25 = vmul.f32 %v2394_v23, %v811_v4 }
 0x20c   : > { %v826_v27 = vmul.f32 %v2030_v24, %v819_v25 }
 0x20d   : > { %v2396_v28 = vpop.eup %2395 }
 0x20e   : > { %v988_v29 = vmul.f32 %v2396_v28, %v980_v8  ;;  %v833_v30 = vadd.f32 %v2031_v26, %v826_v27 }
 0x210   : > { %v834_v32 = vpack.c.bf16 %v833_v30, %v833_v30  ;;  %v995_v33 = vmul.f32 %v2030_v24, %v988_v29 }
 0x212   : > { %2120 = vmatmul.mubr.msk.bf16.vlgmr.msra.gmra.mxu0 %vm805_vm0, %v834_v32  ;;  %2128 = vmatmul.mubr.msk.bf16.vlgmr.msra.gmra.mxu1 %vm805_vm0, %v834_v32  ;;  %v1002_v35 = vadd.f32 %v2031_v26, %v995_v33 }
 0x213   : > { %2132 = vmatpush3.bf16.msra.mxu0 %v2383_v31  ;;  %2135 = vmatprep.mubr.msk.bf16.mxu0 %vm2831_vm1, %v2830_v14 }
 0x214   : > { %2133 = vmatprep.subr.bf16.mxu0 %v2830_v14  ;;  %2141 = vmatprep.mubr.msk.bf16.mxu1 %vm2831_vm1, %v2830_v14  ;;  %v1003_v36 = vpack.c.bf16 %v1002_v35, %v1002_v35 }
 0x217   : > { %2134 = vmatpush3.bf16.msra.mxu0 %v2384_v34 }
 0x218   : > { %2145 = vmatprep.subr.bf16.mxu0 %v2830_v14 }
 0x21a   : > { %2136 = vmatmul.mubr.msk.bf16.vlgmr.msra.gmra.mxu0 %vm805_vm0, %v1003_v36 }
 0x21b   : > { %2147 = vmatprep.mubr.msk.bf16.mxu0 %vm2831_vm1, %v2830_v14 }
 0x2d2   : > { %v895_v39 = vpop.f32.mrf.mxu0  ;;  %v958_v40 = vpop.f32.mrf.mxu1 }
 0x2d3   : > { %v896_v41 = vadd.f32 %v2032_v37, %v895_v39  ;;  %v959_v42 = vadd.f32 %v2036_v38, %v958_v40 }
 0x2d4   : > { %v2121_v43 = vpop.f32.mrf.mxu0  ;;  %v2129_v44 = vpop.f32.mrf.mxu1 }
 0x2d5   : > { %v964_v45 = vpack.c.bf16 %v896_v41, %v896_v41  ;;  %v967_v46 = vpack.c.bf16 %v959_v42, %v959_v42 }
 0x2d6   : > { %v898_v47 = vpop.f32.mrf.mxu0  ;;  %v961_v48 = vpop.f32.mrf.mxu1 }
 0x2d7   : > { %966 = vst.msk [vmem:[#allocation2] sm:$0xf] %vm965_vm2, %v964_v45  ;;  %968 = vst.msk [vmem:[#allocation3] sm:$0xf] %vm965_vm2, %v967_v46 }
 0x2d8   : > { %v2122_v49 = vpop.f32.mrf.mxu0  ;;  %v2130_v50 = vpop.f32.mrf.mxu1 }
 0x2da   : > { %v1064_v52 = vpop.f32.mrf.mxu0 }
 0x2db   : > { %v1065_v53 = vadd.f32 %v2042_v51, %v1064_v52 }
 0x2dc   : > { %v2137_v54 = vpop.f32.mrf.mxu0 }
 0x2dd   : > { %v1070_v55 = vmul.f32 0.35355338, %v1065_v53 }
 0x2de   : > { %v1067_v56 = vpop.f32.mrf.mxu0  ;;  %v1072_v57 = vld [vmem:[#allocation2] sm:$0xf]  ;;  %v3228_v58 = vld [vmem:[#allocation3] sm:$0xf] }
 0x2df   : > { %v1071_v59 = vpack.c.bf16 %v1070_v55, %v1070_v55  ;;  %v1090_v60 = vsel %vm1085_vm3, %v1072_v57, 0  ;;  %v1149_v61 = vsel %vm1147_vm4, %v3228_v58, 0  ;;  %v2049_v62 = vcombine.low %v1072_v57, %v1072_v57 }
 0x2e0   : > { %v2138_v63 = vpop.f32.mrf.mxu0  ;;  %2140 = vmatpush3.bf16.xpose.msra.mxu1 %v1090_v60  ;;  %2146 = vmatpush3.bf16.msra.mxu0 %v1149_v61  ;;  %v2051_v54 = vcombine.low %v3228_v58, %v3228_v58 }
 0x2e1   : > { %1200 = vrot.lane.b32.xlu0 %v2049_v62, %s2832_s21  ;;  %1195 = vrot.lane.b32.xlu1 %v1071_v59, %s2832_s21 }
 0x2e2   : > { %2151 = vmatprep.subr.bf16.mxu1 %v2830_v14  ;;  %2157 = vmatprep.subr.bf16.mxu0 %v2830_v14 }
 0x2e5   : > { %1441 = vrot.lane.b32.xlu0 %v2049_v62, %s2833_s18  ;;  %1322 = vrot.lane.b32.xlu1 %v2049_v62, %s2834_s25 }
 0x2e7   : > { %2142 = vmatmul.mubr.msk.bf16.vlgmr.msra.gmra.mxu1 %vm1085_vm3, %v1071_v59 }
 0x2e8   : > { %2153 = vmatprep.mubr.msk.bf16.mxu1 %vm2831_vm1, %v2830_v14 }
 0x2e9   : > { %1320 = vrot.lane.b32.xlu1 %v1071_v59, %s2834_s25 }
 0x2ed   : > { %1439 = vrot.lane.b32.xlu1 %v1071_v59, %s2833_s18 }
 0x353   : > { %v1196_v1 = vpop.permute.xlu1 %1195  ;;  %v1201_v2 = vpop.permute.xlu0 %1200 }
 0x354   : > { %v1206_v3 = vsel %vm1085_vm3, %v1201_v2, 0 }
 0x355   : > { %2152 = vmatpush3.bf16.xpose.msra.mxu1 %v1206_v3 }
 0x356   : > { %2163 = vmatprep.subr.bf16.mxu1 %v2830_v14 }
 0x357   : > { %v1323_v4 = vpop.permute.xlu1 %1322  ;;  %v1442_v6 = vpop.permute.xlu0 %1441 }
 0x358   : > { %v1328_v5 = vsel %vm1085_vm3, %v1323_v4, 0  ;;  %v1447_v8 = vsel %vm1085_vm3, %v1442_v6, 0 }
 0x35b   : > { %v1321_v7 = vpop.permute.xlu1 %1320 }
 0x35c   : > { %2154 = vmatmul.mubr.msk.bf16.vlgmr.msra.gmra.mxu1 %vm1085_vm3, %v1196_v1 }
 0x35d   : > { %2164 = vmatpush3.bf16.xpose.msra.mxu1 %v1328_v5  ;;  %2165 = vmatprep.mubr.msk.bf16.mxu1 %vm2831_vm1, %v2830_v14 }
 0x35e   : > { %2175 = vmatprep.subr.bf16.mxu1 %v2830_v14 }
 0x35f   : > { %v1440_v9 = vpop.permute.xlu1 %1439 }
 0x364   : > { %2166 = vmatmul.mubr.msk.bf16.vlgmr.msra.gmra.mxu1 %vm1085_vm3, %v1321_v7 }
 0x365   : > { %2176 = vmatpush3.bf16.xpose.msra.mxu1 %v1447_v8  ;;  %2177 = vmatprep.mubr.msk.bf16.mxu1 %vm2831_vm1, %v2830_v14 }
 0x366   : > { %2187 = vmatprep.subr.bf16.mxu1 %v2830_v14 }
 0x36c   : > { %2178 = vmatmul.mubr.msk.bf16.vlgmr.msra.gmra.mxu1 %vm1085_vm3, %v1440_v9 }
 0x36d   : > { %2191 = vmatprep.mubr.msk.bf16.mxu1 %vm2831_vm1, %v2830_v14 }
 0x3a7   : > { %v1126_v15 = vpop.f32.mrf.mxu1 }
 0x3a8   : > { %v1127_v16 = vadd.f32 %v1126_v15, %v1084_v13 }
 0x3a9   : > { %v2143_v17 = vpop.f32.mrf.mxu1 }
 0x3aa   : > { %v1132_v18 = vsel %vm1085_vm3, %v1127_v16, -inf }
 0x3ab   : > { %1133 = vmax.xlane.f32.xlu0 %v1132_v18  ;;  %v1129_v19 = vpop.f32.mrf.mxu1 }
 0x3ad   : > { %v2144_v20 = vpop.f32.mrf.mxu1 }
 0x41c   : > { %v1242_v21 = vpop.f32.mrf.mxu1 }
 0x41d   : > { %v1243_v22 = vadd.f32 %v1242_v21, %v1084_v13 }
 0x41e   : > { %v2155_v23 = vpop.f32.mrf.mxu1 }
 0x41f   : > { %v1248_v24 = vsel %vm1085_vm3, %v1243_v22, -inf }
 0x420   : > { %1249 = vmax.xlane.f32.xlu1 %v1248_v24  ;;  %v1245_v25 = vpop.f32.mrf.mxu1 }
 0x422   : > { %v2156_v26 = vpop.f32.mrf.mxu1 }
 0x424   : > { %v1364_v27 = vpop.f32.mrf.mxu1 }
 0x425   : > { %v1365_v28 = vadd.f32 %v1364_v27, %v1084_v13 }
 0x426   : > { %v2167_v29 = vpop.f32.mrf.mxu1 }
 0x427   : > { %v1370_v30 = vsel %vm1085_vm3, %v1365_v28, -inf }
 0x428   : > { %1371 = vmax.xlane.f32.xlu0 %v1370_v30  ;;  %v1367_v31 = vpop.f32.mrf.mxu1 }
 0x42a   : > { %v2168_v32 = vpop.f32.mrf.mxu1 }
 0x42c   : > { %v1483_v33 = vpop.f32.mrf.mxu1 }
 0x42d   : > { %v1484_v34 = vadd.f32 %v1483_v33, %v1084_v13 }
 0x42e   : > { %v2179_v35 = vpop.f32.mrf.mxu1 }
 0x42f   : > { %v1489_v36 = vsel %vm1085_vm3, %v1484_v34, -inf  ;;  %v2387_v35 = vld [vmem:[%s3466_s10 + $0x8] sm:$0xff]  }
 0x430   : > { %1490 = vmax.xlane.f32.xlu0 %v1489_v36  ;;  %v1486_v37 = vpop.f32.mrf.mxu1  ;;  %2188 = vmatpush3.bf16.msra.mxu1 %v2387_v35  ;;  %v2388_v36 = vld [vmem:[%s3466_s10] sm:$0xff]  }
 0x431   : > { %2189 = vmatprep.subr.bf16.mxu1 %v2830_v14 }
 0x432   : > { %v2180_v38 = vpop.f32.mrf.mxu1 }
 0x434   : > { %v1134_v39 = vpop.xlane.xlu0 %1133  ;;  %2190 = vmatpush3.bf16.msra.mxu1 %v2388_v36 }
 0x435   : > { %v1135_v40 = vsub.f32 %v1127_v16, %v1134_v39  ;;  %2203 = vmatprep.subr.bf16.mxu1 %v2830_v14 }
 0x437   : > { %v1136_v41 = vmul.f32 1.442695, %v1135_v40 }
 0x439   : > { %2397 = vpow2.f32 %v1136_v41 }
 0x446   : > { %v2398_v42 = vpop.eup %2397 }
 0x447   : > { %v1138_v43 = vsel %vm1085_vm3, %v2398_v42, 0.0 }
 0x448   : > { %1139 = vadd.xlane.f32.xlu0 %v1138_v43 }
 0x4a9   : > { %v1250_v44 = vpop.xlane.xlu1 %1249 }
 0x4aa   : > { %v1251_v45 = vsub.f32 %v1243_v22, %v1250_v44 }
 0x4ac   : > { %v1252_v46 = vmul.f32 1.442695, %v1251_v45 }
 0x4ae   : > { %2399 = vpow2.f32 %v1252_v46 }
 0x4b1   : > { %v1372_v47 = vpop.xlane.xlu0 %1371 }
 0x4b2   : > { %v1373_v48 = vsub.f32 %v1365_v28, %v1372_v47  ;;  %v2063_v47 = vld [vmem:[%s3467_s22] ss:$0 sm:$0xff] }
 0x4b4   : > { %v1374_v49 = vmul.f32 1.442695, %v1373_v48 }
 0x4b6   : > { %2401 = vpow2.f32 %v1374_v49 }
 0x4b9   : > { %v1491_v55 = vpop.xlane.xlu0 %1490 }
 0x4ba   : > { %v1492_v57 = vsub.f32 %v1484_v34, %v1491_v55 }
 0x4bb   : > { %v2400_v50 = vpop.eup %2399 }
 0x4bc   : > { %v1254_v51 = vsel %vm1085_vm3, %v2400_v50, 0.0  ;;  %v1493_v59 = vmul.f32 1.442695, %v1492_v57 }
 0x4bd   : > { %1255 = vadd.xlane.f32.xlu1 %v1254_v51 }
 0x4c3   : > { %v2402_v52 = vpop.eup %2401 }
 0x4c4   : > { %v1376_v53 = vsel %vm1085_vm3, %v2402_v52, 0.0 }
 0x4c5   : > { %1377 = vadd.xlane.f32.xlu0 %v1376_v53 }
 0x4ce   : > { %1382 = vrot.lane.b32.xlu1 %v2051_v54, %s2834_s25 }
 0x4d1   : > { %v1140_v56 = vpop.xlane.xlu0 %1139 }
 0x4d2   : > { %2403 = vrcp.f32 %v1140_v56 }
 0x4d3   : > { %2405 = vpow2.f32 %v1493_v59 }
 0x4db   : > { %1263 = vrot.lane.b32.xlu0 %v2051_v54, %s2832_s21  ;;  %s2838_s21 = smov [#allocation23]  }
 0x4df   : > { %v2404_v60 = vpop.eup %2403 }
 0x4e0   : > { %v1142_v61 = vmul.f32 %v2404_v60, %v2398_v42  ;;  %v2406_v63 = vpop.eup %2405  ;;  %v2389_v60 = vld [vmem:[#allocation20 + $0x8] sm:$0xff]  }
 0x4e1   : > { %v1495_v58 = vsel %vm1085_vm3, %v2406_v63, 0.0 }
 0x4e2   : > { %v1143_v62 = vpack.c.bf16 %v1142_v61, %v1142_v61  ;;  %v2390_v61 = vld [vmem:[#allocation20] sm:$0xff]  }
 0x4e4   : > { %2148 = vmatmul.mubr.msk.bf16.vlgmr.msra.gmra.mxu0 %vm1085_vm3, %v1143_v62 }
 0x4e5   : > { %2159 = vmatprep.mubr.msk.bf16.mxu0 %vm2831_vm1, %v2830_v14 }
 0x4f2   : > { %1496 = vadd.xlane.f32.xlu1 %v1495_v58 }
 0x503   : > { %1501 = vrot.lane.b32.xlu1 %v2051_v54, %s2833_s18  ;;  %s3469_s18 = sld [smem:[#allocation48_spill]] }
 0x546   : > { %v1256_v1 = vpop.xlane.xlu1 %1255 }
 0x547   : > { %2407 = vrcp.f32 %v1256_v1  ;;  %v2064_v1 = vld [vmem:[%s3468_s26] ss:$0 sm:$0xff] }
 0x54a   : > { %v1383_v7 = vpop.permute.xlu1 %1382 }
 0x54b   : > { %v1388_v9 = vsel %vm1147_vm4, %v1383_v7, 0  ;;  %v2391_v7 = vld [vmem:[#allocation21 + $0x8] sm:$0xff]  }
 0x54e   : > { %v1378_v2 = vpop.xlane.xlu0 %1377 }
 0x54f   : > { %2409 = vrcp.f32 %v1378_v2 }
 0x552   : > { %v1264_v3 = vpop.permute.xlu0 %1263 }
 0x553   : > { %v1269_v4 = vsel %vm1147_vm4, %v1264_v3, 0  ;;  %v2065_v3 = vld [vmem:[%s3469_s18] ss:$0 sm:$0xff]  ;;  %s2711_s18 = sshll.u32 %s2838_s21, 4  ;;  %s2712_s18 = int_to_ptr.vmem [resolvable:$false] %s2711_s18 }
 0x554   : > { %v2408_v5 = vpop.eup %2407  ;;  %2158 = vmatpush3.bf16.msra.mxu0 %v1269_v4  ;;  %s2713_s25 = scalar_lea.vmem %s2712_s18, 256  ;;  %p2714_p3 = scmp.lt.s32.totalorder %s3333_s13, %s2712_s18 }
 0x555   : > { %2169 = vmatprep.subr.bf16.mxu0 %v2830_v14  ;;  %v1258_v6 = vmul.f32 %v2408_v5, %v2400_v50  ;;  %p2715_p4 = scmp.lt.s32.totalorder %s2713_s25, %s2707_s14 }
 0x557   : > { %v1259_v8 = vpack.c.bf16 %v1258_v6, %v1258_v6  ;;  %p2716_p7 = por %p2715_p4, %p2714_p3 }
 0x559   : > { %2160 = vmatmul.mubr.msk.bf16.vlgmr.msra.gmra.mxu0 %vm1085_vm3, %v1259_v8  ;;  %v2392_v8 = vld [vmem:[#allocation21] sm:$0xff]   ;;  %p2717_p5 = pnand %p2716_p7, %p2710_p11 }
 0x55a   : > { %2170 = vmatpush3.bf16.msra.mxu0 %v1388_v9  ;;  %2171 = vmatprep.mubr.msk.bf16.mxu0 %vm2831_vm1, %v2830_v14 }
 0x55b   : > { %2181 = vmatprep.subr.bf16.mxu0 %v2830_v14 }
 0x55c   : > { %v2410_v10 = vpop.eup %2409 }
 0x55d   : > { %v1380_v11 = vmul.f32 %v2410_v10, %v2402_v52 }
 0x55f   : > { %v1381_v12 = vpack.c.bf16 %v1380_v11, %v1380_v11 }
 0x561   : > { %2172 = vmatmul.mubr.msk.bf16.vlgmr.msra.gmra.mxu0 %vm1085_vm3, %v1381_v12 }
 0x562   : > { %2183 = vmatprep.mubr.msk.bf16.mxu0 %vm2831_vm1, %v2830_v14 }
 0x57b   : > { %v1497_v13 = vpop.xlane.xlu1 %1496 }
 0x57c   : > { %2411 = vrcp.f32 %v1497_v13 }
 0x57f   : > { %v1502_v15 = vpop.permute.xlu1 %1501 }
 0x580   : > { %v1507_v16 = vsel %vm1147_vm4, %v1502_v15, 0 }
 0x581   : > { %2182 = vmatpush3.bf16.msra.mxu0 %v1507_v16 }
 0x582   : > { %2195 = vmatprep.subr.bf16.mxu0 %v2830_v14 }
 0x589   : > { %v2412_v17 = vpop.eup %2411 }
 0x58a   : > { %v1499_v18 = vmul.f32 %v2412_v17, %v2406_v63 }
 0x58c   : > { %v1500_v19 = vpack.c.bf16 %v1499_v18, %v1499_v18 }
 0x58e   : > { %2184 = vmatmul.mubr.msk.bf16.vlgmr.msra.gmra.mxu0 %vm1085_vm3, %v1500_v19 }
 0x58f   : > { %2199 = vmatprep.mubr.msk.bf16.mxu0 %vm2831_vm1, %v2830_v14  ;;  %2196 = vmatpush3.bf16.msra.mxu0 %v2389_v60 }
 0x590   : > { %2197 = vmatprep.subr.bf16.mxu0 %v2830_v14 }
 0x593   : > { %2198 = vmatpush3.bf16.msra.mxu0 %v2390_v61 }
 0x5a4   : > { %v1185_v20 = vpop.f32.mrf.mxu0 }
 0x5a5   : > { %v1191_v21 = vpack.c.bf16 %v1185_v20, %v1185_v20 }
 0x5a6   : > { %v2149_v22 = vpop.f32.mrf.mxu0 }
 0x5a7   : > { %1193 = vst.msk [vmem:[#allocation4] sm:$0xf] %vm1192_vm6, %v1191_v21 }
 0x5a8   : > { %v1188_v23 = vpop.f32.mrf.mxu0 }
 0x5aa   : > { %v2150_v24 = vpop.f32.mrf.mxu0 }
 0x619   : > { %v1305_v25 = vpop.f32.mrf.mxu0 }
 0x61a   : > { %v2078_v26 = vpack.c.bf16 %v1305_v25, %v1305_v25  ;;  %v2070_v25 = vld [vmem:[%s3472_s9] ss:$0 sm:$0xff] }
 0x61b   : > { %v2161_v27 = vpop.f32.mrf.mxu0 }
 0x61c   : > { %1315 = vrot.lane.b32.xlu1 %v2078_v26, %s2835_s8 }
 0x61d   : > { %v1308_v28 = vpop.f32.mrf.mxu0 }
 0x61f   : > { %v2162_v29 = vpop.f32.mrf.mxu0 }
 0x621   : > { %v1424_v30 = vpop.f32.mrf.mxu0 }
 0x622   : > { %v2079_v31 = vpack.c.bf16 %v1424_v30, %v1424_v30 }
 0x623   : > { %v2173_v32 = vpop.f32.mrf.mxu0 }
 0x624   : > { %1434 = vrot.lane.b32.xlu0 %v2079_v31, %s2836_s6  ;;  %s3470_s6 = sld [smem:[#allocation49_spill]] }
 0x625   : > { %v1427_v33 = vpop.f32.mrf.mxu0 }
 0x627   : > { %v2174_v34 = vpop.f32.mrf.mxu0 }
 0x62a   : > { %v2066_v9 = vld [vmem:[%s3470_s6] ss:$0 sm:$0xff] }
 0x64e   : > { %v1543_v37 = vpop.f32.mrf.mxu0 }
 0x64f   : > { %v2080_v38 = vpack.c.bf16 %v1543_v37, %v1543_v37 }
 0x650   : > { %v2185_v39 = vpop.f32.mrf.mxu0 }
 0x651   : > { %1553 = vrot.lane.b32.xlu1 %v2080_v38, %s2837_s4  ;;  %s2075_s4 = sshll.u32 %s3471_s28, 7 }
 0x652   : > { %v1546_v40 = vpop.f32.mrf.mxu0  ;;  %s3331_s26 = scalar_lea.hbm %s3473_s23, %s2075_s4 }
 0x654   : > { %v2186_v41 = vpop.f32.mrf.mxu0 }
 0x68e   : > { %v1316_v42 = vpop.permute.xlu1 %1315 }
 0x68f   : > { %1319 = vst.msk [vmem:[#allocation4] sm:$0xf] %vm1318_vm7, %v1316_v42 }
 0x696   : > { %v1435_v43 = vpop.permute.xlu0 %1434 }
 0x697   : > { %1438 = vst.msk [vmem:[#allocation4] sm:$0xf] %vm1437_vm8, %v1435_v43 }
 0x6c3   : > { %v1554_v44 = vpop.permute.xlu1 %1553 }
 0x6c4   : > { %1557 = vst.msk [vmem:[#allocation4] sm:$0xf] %vm1556_vm9, %v1554_v44 }
 0x6cb   : > { %v1558_v45 = vld [vmem:[#allocation4] sm:$0xf] }
 0x6cc   : > { %2192 = vmatmul.mubr.msk.bf16.vlgmr.msra.gmra.mxu1 %vm805_vm0, %v1558_v45 }
 0x6cd   : > { %2207 = vmatprep.mubr.msk.bf16.mxu1 %vm2831_vm1, %v2830_v14  ;;  %2204 = vmatpush3.bf16.msra.mxu1 %v2391_v7 }
 0x6ce   : > { %2205 = vmatprep.subr.bf16.mxu1 %v2830_v14 }
 0x6d1   : > { %2206 = vmatpush3.bf16.msra.mxu1 %v2392_v8 }
 0x78c   : > { %v1612_v46 = vpop.f32.mrf.mxu1 }
 0x78d   : > { %v1618_v48 = vadd.f32 %v1612_v46, %v3193_v0 }
 0x78e   : > { %v2193_v49 = vpop.f32.mrf.mxu1 }
 0x78f   : > { %v1626_v50 = vadd.f32 %v2063_v47, %v1618_v48 }
 0x790   : > { %v1615_v51 = vpop.f32.mrf.mxu1 }
 0x791   : > { %v1629_v52 = vsel %vm805_vm0, %v1626_v50, 0.0 }
 0x792   : > { %1630 = vadd.xlane.f32.xlu0 %v1629_v52  ;;  %v2194_v53 = vpop.f32.mrf.mxu1 }
 0x81b   : > { %v1631_v54 = vpop.xlane.xlu0 %1630 }
 0x81c   : > { %v1632_v55 = vmul.f32 0.03125, %v1631_v54 }
 0x81e   : > { %v1633_v56 = vsub.f32 %v1626_v50, %v1632_v55 }
 0x820   : > { %v1634_v57 = vmul.f32 %v1633_v56, %v1633_v56 }
 0x822   : > { %v1635_v59 = vsel %vm805_vm0, %v1634_v57, 0.0 }
 0x823   : > { %1636 = vadd.xlane.f32.xlu1 %v1635_v59 }
 0x8ac   : > { %v1637_v0 = vpop.xlane.xlu1 %1636 }
 0x8ad   : > { %v1638_v62 = vmul.f32 0.03125, %v1637_v0 }
 0x8af   : > { %v1639_v63 = vadd.f32 1e-05, %v1638_v62 }
 0x8b1   : > { %2413 = vrsqrt.f32 %v1639_v63 }
 0x8be   : > { %v2414_v58 = vpop.eup %2413 }
 0x8bf   : > { %v1641_v2 = vmul.f32 %v2414_v58, %v1633_v56 }
 0x8c1   : > { %v1648_v4 = vmul.f32 %v2064_v1, %v1641_v2 }
 0x8c3   : > { %v1655_v5 = vadd.f32 %v2065_v3, %v1648_v4 }
 0x8c5   : > { %v1656_v6 = vpack.c.bf16 %v1655_v5, %v1655_v5 }
 0x8c7   : > { %2200 = vmatmul.mubr.msk.bf16.vlgmr.msra.gmra.mxu0 %vm805_vm0, %v1656_v6 }
 0x987   : > { %v1717_v10 = vpop.f32.mrf.mxu0 }
 0x988   : > { %v1718_v11 = vadd.f32 %v2066_v9, %v1717_v10 }
 0x989   : > { %v2201_v12 = vpop.f32.mrf.mxu0 }
 0x98a   : > { %v1723_v13 = vpack.c.bf16 %v1718_v11, %v1718_v11 }
 0x98b   : > { %v1720_v15 = vpop.f32.mrf.mxu0 }
 0x98c   : > { %v1725_v16 = vmul.bf16 1027030327, %v1723_v13  ;;  %v1724_v22 = vmul.bf16 1056980736, %v1723_v13 }
 0x98d   : > { %v2202_v17 = vpop.f32.mrf.mxu0 }
 0x98e   : > { %v1726_v18 = vmul.bf16 %v1725_v16, %v1723_v13 }
 0x990   : > { %v1727_v19 = vmul.bf16 %v1726_v18, %v1723_v13 }
 0x992   : > { %v1728_v20 = vadd.bf16 %v1727_v19, %v1723_v13 }
 0x994   : > { %v1729_v21 = vmul.bf16 1061961548, %v1728_v20 }
 0x996   : > { %2415 = vtanh.bf16 %v1729_v21 }
 0x9a4   : > { %v2416_v14 = vpop.eup %2415 }
 0x9a5   : > { %v1731_v23 = vadd.bf16 1065369472, %v2416_v14 }
 0x9a7   : > { %v1732_v24 = vmul.bf16 %v1731_v23, %v1724_v22 }
 0x9a9   : > { %2208 = vmatmul.mubr.msk.bf16.vlgmr.msra.gmra.mxu1 %vm805_vm0, %v1732_v24 }
 0xa69   : > { %v1793_v26 = vpop.f32.mrf.mxu1 }
 0xa6a   : > { %v1794_v27 = vadd.f32 %v2070_v25, %v1793_v26 }
 0xa6b   : > { %v2209_v28 = vpop.f32.mrf.mxu1 }
 0xa6c   : > { %v1799_v29 = vadd.f32 %v1794_v27, %v1626_v50 }
 0xa6d   : > { %v1796_v30 = vpop.f32.mrf.mxu1 }
 0xa6e   : > { %1800 = vst.msk [vmem:[%s792_s24] sm:$0xff] %vm805_vm0, %v1799_v29 }
 0xa6f   : > { %v2210_v31 = vpop.f32.mrf.mxu1 }
 0xa70   : > { %2720 = shalt.err (!%p2717_p5)
}
 0xa71   : > { %s2721_s8 = scalar_lea.hbm %s3331_s26, 128  ;;  %s2725_s28 = scalar_lea.hbm %s3473_s23, 256 }
 0xa72   : > { %p2722_p10 = scmp.ne.s32.totalorder %s3331_s26, %s2721_s8  ;;  %p2726_p13 = scmp.lt.s32.totalorder %s3331_s26, %s3473_s23 }
 0xa73   : > { %p2727_p0 = scmp.lt.s32.totalorder %s2725_s28, %s2721_s8 }
 0xa74   : > { %p2723_p12 = pnand %p2722_p10, %p3474_p9 }
 0xa75   : > { %p2728_p6 = por %p2727_p0, %p2726_p13 }
 0xa76   : > { %p2724_p2 = pneg %p2723_p12 }
 0xa78   : > { %p2729_p8 = pnand %p2728_p6, %p2724_p2 }
 0xa7a   : > { %2732 = shalt.err (!%p2729_p8)
}
 0xa7b   : > { %2251 = dma.vmem_to_hbm [thread:$0]  (%p3474_p9), %s3333_s13, 128, %s3331_s26, %s1802_s29  }
 0xa7c PF: > { %s3475_s9 = sld [smem:[#allocation33_spill]]  ;;  %p3477_p1 = scmp.ne.s32.totalorder %s3444_s19, 0 }
 0xa7d   : > { %s3476_s4 = sld [smem:[#allocation35_spill]] }
 0xa82   : > { %s1828_s24 = sand.u32 1, %s3475_s9  }
 0xa83   : > { %p3478_p11 = scmp.ge.s32.totalorder %s3476_s4, 2  ;;  %s1829_s22 = scalar_lea.sflag [#allocation7], %s1828_s24 }
 0xa85   : > { %p2289_p3 = pnand %p3478_p11, %p3477_p1 }
 0xa87   : > { %p2290_p4 = pneg %p2289_p3 }
 0xa89   : > { %2790 = dma.done.wait (%p2290_p4), %s1829_s22, 128  }
 0xa8a   : > { %2792 = vsyncadd (%p2290_p4), %s1829_s22, 4294967168  ;;  %s40_s22 = sadd.s32 1, %s3476_s4   ;;  %s3479_s3 = sld [smem:[#allocation37_spill]] }
 0xa8b   : > { %p37_p7 = scmp.ge.s32.totalorder %s40_s22, 4   ;;  %s3480_s13 = sld [smem:[#allocation36_spill]] }
 0xa8c   : > { %s3481_s0 = smov %s2799_s30  ;;  %s3482_s30 = smov %s2803_s20 }
 0xa8d   : > { %s3484_s21 = smov %s2811_s1  ;;  %39 = sbr.rel (!%p37_p7) target bundleno = 26 (0x1a), region = 194 }
 0xa90   : > { %s3483_s20 = smov %s3479_s3 }
 0xa91   : > { %s3485_s1 = smov %s3480_s13 }
 0xa92   :  { %1834 = vsyncpa [#allocation6], 1 }
 0xa93   :  { %1836 = vsyncpa [#allocation6 + $0x1], 1 }
 0xa94   :  { %1837 = vsyncpa [#allocation9], 1 }
 0xa95   :  { %1838 = vsyncpa [#allocation13], 1 }
 0xa96   :  { %1839 = vsyncpa [#allocation16], 1 }
 0xa97   :  { %1840 = vsyncpa [#allocation19], 1 }
 0xa98   :  { %1841 = vsyncpa [#allocation22], 1 }
 0xa99   :  { %1842 = vsyncpa [#allocation7], 1 }
 0xa9a   :  { %1844 = vsyncpa [#allocation7 + $0x1], 1 }

</bundles_post_ra>
